<compile_context>
chip_gen: v6e
topology: v6e:2x2x1
jax: 0.10.0
libtpu: 0.0.40
codegen_flags: <defaults>
</compile_context>

<pallas_src>
from itertools import combinations

import jax
import jax.numpy as jnp
import numpy as np
from jax.experimental import pallas as pl
from jax.experimental.pallas import tpu as pltpu


def _make_kernel(n_valid, D, Nd, hidden, pair_j):
    """Static config closed over: n_valid (true batch), embedding dim D, dense width Nd,
    MLP hidden sizes, and the j-index of each field pair (for the bilinear right operand)."""
    H0, H1, H2 = hidden

    def kernel(emb_ref, aux_ref,
               m_se1_ref, w_se2e_ref, w_left_ref,
               w1p_ref, w1q_ref, w1d_ref, w2_ref, w3_ref, bias_ref,
               out_ref):
        emb = emb_ref[...]                                   # (Bt, F*D) f32, lane-dense
        bt = emb.shape[0]
        aux = aux_ref[...]                                   # (Bt, 8): [dense | lr | label | pad]
        bias = bias_ref[...]                                 # (8, Hmax): b1,b2,b3,wout,bout rows

        # ---------------- SENETLayer (folded: two tiny bf16 matmuls) ----------------
        emb_bf = emb.astype(jnp.bfloat16)
        g = jnp.dot(emb_bf, m_se1_ref[...], preferred_element_type=jnp.float32)   # (Bt, Rp)
        g = jnp.maximum(g, 0.0)
        a_exp = jnp.dot(g.astype(jnp.bfloat16), w_se2e_ref[...],
                        preferred_element_type=jnp.float32)                       # (Bt, F*D)
        a_exp = jnp.maximum(a_exp, 0.0)
        v = emb * a_exp                                      # SENET-gated embeddings (f32)

        # ------- BilinearInteractionLayer ('field_interaction') -------
        # Stack emb / V on the sublane (batch) axis: one MXU pass against the (F*D, P*D)
        # left weight covers both p- and q-halves with zero structural-zero MACs.
        # Right operand = static field-j selection -> lane slices (off the MXU path, f32).
        xs = jnp.concatenate([emb, v], axis=0)               # (2*Bt, F*D) f32
        y = jnp.dot(xs.astype(jnp.bfloat16), w_left_ref[...],
                    preferred_element_type=jnp.float32)      # (2*Bt, P*D)
        r = jnp.concatenate([xs[:, j * D:(j + 1) * D] for j in pair_j], axis=-1)  # (2*Bt, P*D)
        c = y * r                                            # top half = p, bottom half = q
        c_bf = c.astype(jnp.bfloat16)
        c_p = c_bf[:bt]
        c_q = c_bf[bt:]

        # ---------------- MLPLayer (relu x3, linear head) ----------------
        h = (jnp.dot(c_p, w1p_ref[...], preferred_element_type=jnp.float32)
             + jnp.dot(c_q, w1q_ref[...], preferred_element_type=jnp.float32)
             + bias[0:1, :H0])
        # dense features: K=Nd is tiny -> VPU broadcast FMAs, not an MXU pass.
        w1d = w1d_ref[...]                                   # (Nd, H0) f32
        for k in range(Nd):
            h = h + aux[:, k:k + 1] * w1d[k:k + 1, :]
        h = jnp.maximum(h, 0.0)
        h = jnp.maximum(jnp.dot(h.astype(jnp.bfloat16), w2_ref[...],
                                preferred_element_type=jnp.float32) + bias[1:2, :H1], 0.0)
        h = jnp.maximum(jnp.dot(h.astype(jnp.bfloat16), w3_ref[...],
                                preferred_element_type=jnp.float32) + bias[2:3, :H2], 0.0)
        dnn_logit = (jnp.sum(h * bias[3:4, :H2], axis=-1, keepdims=True)
                     + bias[4:5, 0:1])                       # (Bt, 1)

        # -------- y_pred = sigmoid(lr + dnn); per-row BCE (masked for batch padding) --------
        lr_logit = aux[:, Nd:Nd + 1]
        label = aux[:, Nd + 1:Nd + 2]
        ypred = jax.nn.sigmoid(lr_logit + dnn_logit)
        eps = 1e-7
        yc = jnp.clip(ypred, eps, 1.0 - eps)
        bce = -(label * jnp.log(yc) + (1.0 - label) * jnp.log(1.0 - yc))
        row = pl.program_id(0) * bt + jax.lax.broadcasted_iota(jnp.int32, (bt, 1), 0)
        bce = jnp.where(row < n_valid, bce, 0.0)
        out_ref[...] = jnp.concatenate([ypred, bce], axis=-1)   # (Bt, 2): [y_pred | bce]

    return kernel


def prepare_kernel_params(params, F, D, Nd):
    """Host-side: fold SENET, pack per-pair bilinear weights, pre-transpose, pre-cast."""
    P = F * (F - 1) // 2
    FD, PD = F * D, P * D
    pairs = list(combinations(range(F), 2))

    # ----- SENET folded: emb -> relu(emb @ m_se1) -> relu(. @ w_se2e) = per-lane gate -----
    w_se1 = np.asarray(params["w_se1"], np.float32)          # (R, F)  torch (out, in)
    w_se2 = np.asarray(params["w_se2"], np.float32)          # (F, R)
    R = w_se1.shape[0]
    Rp = max(8, ((R + 7) // 8) * 8)                          # pad reduced dim (zero cols/rows)
    m_mean = np.zeros((FD, F), np.float32)
    e_exp = np.zeros((F, FD), np.float32)
    for f in range(F):
        m_mean[f * D:(f + 1) * D, f] = 1.0 / D
        e_exp[f, f * D:(f + 1) * D] = 1.0
    m_se1 = np.zeros((FD, Rp), np.float32)
    m_se1[:, :R] = m_mean @ w_se1.T
    w_se2e = np.zeros((Rp, FD), np.float32)
    w_se2e[:R, :] = w_se2.T @ e_exp

    # ----- bilinear: pack pair-k weight (pre-transposed) into the (i_k-block, k-block) -----
    w_bil = np.asarray(params["w_bil"], np.float32)          # (P, D, D), torch (out, in)
    w_left = np.zeros((FD, PD), np.float32)
    for k, (i, _j) in enumerate(pairs):
        w_left[i * D:(i + 1) * D, k * D:(k + 1) * D] = w_bil[k].T
    pair_j = tuple(j for (_i, j) in pairs)

    # ----- MLP: split layer-1 weight into p-half / q-half / dense, pre-transpose -----
    w1c = np.asarray(params["w1c"], np.float32)              # (H0, 2*P*D)
    w1d = np.asarray(params["w1d"], np.float32)              # (H0, Nd)
    w2 = np.asarray(params["w2"], np.float32)
    w3 = np.asarray(params["w3"], np.float32)
    H0, H1, H2 = w1c.shape[0], w2.shape[0], w3.shape[0]

    # ----- tiny vectors packed into one resident f32 slab -----
    Wmax = max(H0, H1, H2)
    bias_slab = np.zeros((8, Wmax), np.float32)
    bias_slab[0, :H0] = np.asarray(params["b1"], np.float32).reshape(-1)
    bias_slab[1, :H1] = np.asarray(params["b2"], np.float32).reshape(-1)
    bias_slab[2, :H2] = np.asarray(params["b3"], np.float32).reshape(-1)
    bias_slab[3, :H2] = np.asarray(params["wout"], np.float32).reshape(-1)
    bias_slab[4, 0] = float(np.asarray(params["bout"]).reshape(-1)[0])

    return {
        "pair_j": pair_j,
        "hidden": (H0, H1, H2),
        "m_se1": jnp.asarray(m_se1, jnp.bfloat16),           # (F*D, Rp)
        "w_se2e": jnp.asarray(w_se2e, jnp.bfloat16),         # (Rp, F*D)
        "w_left": jnp.asarray(w_left, jnp.bfloat16),         # (F*D, P*D)
        "w1p": jnp.asarray(w1c[:, :PD].T, jnp.bfloat16),     # (P*D, H0)
        "w1q": jnp.asarray(w1c[:, PD:].T, jnp.bfloat16),     # (P*D, H0)
        "w1d": jnp.asarray(w1d.T, jnp.float32),              # (Nd, H0)  VPU path, keep f32
        "w2": jnp.asarray(w2.T, jnp.bfloat16),               # (H0, H1)
        "w3": jnp.asarray(w3.T, jnp.bfloat16),               # (H1, H2)
        "bias": jnp.asarray(bias_slab, jnp.float32),         # (8, Hmax)
    }


def fibinet_forward(emb, dense, lr_logit, label, kparams, *, block_b=None):
    B, F, D = emb.shape
    FD = F * D
    Nd = dense.shape[1]
    if block_b is None:
        # nt >= 2 keeps both v7x TensorCores busy; larger tiles amortize per-step
        # pipeline overhead on v6e for big batches while staying far under VMEM limits.
        block_b = 128 if B <= 1024 else 256
    nt = pl.cdiv(B, block_b)
    B_pad = nt * block_b

    emb_flat = emb.reshape(B, FD).astype(jnp.float32)
    # Pack the narrow per-row streams (dense, lr_logit, label) into one (B, 8) slab.
    aux = jnp.zeros((B, 8), jnp.float32)
    aux = aux.at[:, :Nd].set(dense.astype(jnp.float32))
    aux = aux.at[:, Nd].set(lr_logit.astype(jnp.float32)[:, 0])
    aux = aux.at[:, Nd + 1].set(label.astype(jnp.float32)[:, 0])
    if B_pad != B:
        emb_flat = jnp.pad(emb_flat, ((0, B_pad - B), (0, 0)))
        aux = jnp.pad(aux, ((0, B_pad - B), (0, 0)))

    kp = kparams
    weights = (kp["m_se1"], kp["w_se2e"], kp["w_left"],
               kp["w1p"], kp["w1q"], kp["w1d"], kp["w2"], kp["w3"], kp["bias"])

    def row_spec(width):
        return pl.BlockSpec((block_b, width), lambda i: (i, 0))

    def resident_spec(arr):
        shape = tuple(arr.shape)
        return pl.BlockSpec(shape, lambda i, _s=shape: (0,) * len(_s))

    in_specs = ([row_spec(FD), row_spec(aux.shape[1])]
                + [resident_spec(w) for w in weights])
    out_specs = row_spec(2)

    grid_spec = pltpu.PrefetchScalarGridSpec(
        num_scalar_prefetch=0, grid=(nt,),
        in_specs=in_specs, out_specs=out_specs)

    # Advisory cost estimate so XLA schedules the embedding/LR glue around the kernel.
    P = len(kp["pair_j"])
    PD = P * D
    H0, H1, H2 = kp["hidden"]
    Rp = kp["m_se1"].shape[1]
    flops = 2 * B_pad * (2 * FD * Rp + 2 * FD * PD
                         + 2 * PD * H0 + Nd * H0 + H0 * H1 + H1 * H2 + H2)
    bytes_accessed = int(sum(int(np.prod(a.shape)) * a.dtype.itemsize
                             for a in (emb_flat, aux) + weights) + 2 * B_pad * 4)
    cost = pl.CostEstimate(flops=int(flops), transcendentals=int(3 * B_pad),
                           bytes_accessed=bytes_accessed)

    out = pl.pallas_call(
        _make_kernel(B, D, Nd, (H0, H1, H2), kp["pair_j"]),
        out_shape=jax.ShapeDtypeStruct((B_pad, 2), jnp.float32),
        grid_spec=grid_spec,
        compiler_params=pltpu.CompilerParams(
            dimension_semantics=("parallel",),
            vmem_limit_bytes=32 * 1024 * 1024),
        cost_estimate=cost,
    )(emb_flat, aux, *weights)

    y_pred = out[:B, 0:1]
    loss = jnp.sum(out[:, 1]) / B
    return y_pred, loss


def reference_forward(emb, dense, lr_logit, label, params):
    """Plain-JAX reference mirroring the PyTorch forward (f32, HIGHEST precision)."""
    hp = jax.lax.Precision.HIGHEST
    B, F, D = emb.shape
    Z = jnp.mean(emb, axis=-1)
    A1 = jnp.maximum(Z @ params["w_se1"].T, 0.0)
    A = jnp.maximum(A1 @ params["w_se2"].T, 0.0)
    V = emb * A[:, :, None]
    pairs = list(combinations(range(F), 2))

    def bilin(x):
        outs = [jnp.dot(x[:, i, :], params["w_bil"][k].T, precision=hp) * x[:, j, :]
                for k, (i, j) in enumerate(pairs)]
        return jnp.concatenate(outs, axis=-1)

    c = jnp.concatenate([bilin(emb), bilin(V)], axis=-1)
    dnn_in = jnp.concatenate([c, dense], axis=-1)
    w1 = jnp.concatenate([params["w1c"], params["w1d"]], axis=-1)
    h = jnp.maximum(jnp.dot(dnn_in, w1.T, precision=hp) + params["b1"], 0.0)
    h = jnp.maximum(jnp.dot(h, params["w2"].T, precision=hp) + params["b2"], 0.0)
    h = jnp.maximum(jnp.dot(h, params["w3"].T, precision=hp) + params["b3"], 0.0)
    dnn_logit = jnp.sum(h * params["wout"], axis=-1, keepdims=True) + params["bout"]
    y = jax.nn.sigmoid(lr_logit + dnn_logit)
    yc = jnp.clip(y, 1e-7, 1 - 1e-7)
    loss = jnp.mean(-(label * jnp.log(yc) + (1 - label) * jnp.log(1 - yc)))
    return y, loss


if __name__ == "__main__":
    # Small synthetic config implied by the module (batch chosen so the grid has 2 tiles).
    B = 256          # batch
    F = 4            # num sparse fields
    V = 50           # vocab per field
    D = 32           # embedding_dim
    Nd = 4           # num dense features
    H = [64, 64, 64]  # hidden_units
    reduction_ratio = 3
    R = max(1, int(F / reduction_ratio))
    P = F * (F - 1) // 2

    key = jax.random.PRNGKey(0)
    ks = jax.random.split(key, 20)

    # ----- deterministic synthetic parameters (PyTorch nn.Linear (out, in) convention) -----
    emb_table = jax.random.normal(ks[0], (F, V, D), jnp.float32) * 0.1
    lr_table = jax.random.normal(ks[1], (F, V, 1), jnp.float32) * 0.1
    w_lr_dense = jax.random.normal(ks[2], (Nd, 1), jnp.float32) * 0.1
    b_lr = jnp.zeros((1,), jnp.float32)

    params = {
        "w_se1": jax.random.normal(ks[3], (R, F), jnp.float32) * 0.3,     # SENET Linear 1
        "w_se2": jax.random.normal(ks[4], (F, R), jnp.float32) * 0.3,     # SENET Linear 2
        "w_bil": jax.random.normal(ks[5], (P, D, D), jnp.float32) * 0.1,  # bilinear, per pair
        "w1c": jax.random.normal(ks[6], (H[0], 2 * P * D), jnp.float32) * 0.05,
        "w1d": jax.random.normal(ks[7], (H[0], Nd), jnp.float32) * 0.05,
        "b1": jnp.zeros((1, H[0]), jnp.float32),
        "w2": jax.random.normal(ks[8], (H[1], H[0]), jnp.float32) * 0.1,
        "b2": jnp.zeros((1, H[1]), jnp.float32),
        "w3": jax.random.normal(ks[9], (H[2], H[1]), jnp.float32) * 0.1,
        "b3": jnp.zeros((1, H[2]), jnp.float32),
        "wout": jax.random.normal(ks[10], (1, H[2]), jnp.float32) * 0.1,
        "bout": jnp.zeros((1, 1), jnp.float32),
    }

    # ----- deterministic synthetic inputs (glue: embedding / LR lookup in plain JAX) -----
    ids = jax.random.randint(ks[11], (B, F), 0, V)
    dense = jax.random.uniform(ks[12], (B, Nd), jnp.float32)
    label = jax.random.bernoulli(ks[13], 0.5, (B, 1)).astype(jnp.float32)

    emb = emb_table[jnp.arange(F)[None, :], ids]                 # (B, F, D)
    # TODO(synk): LogRegLayer/EmbeddingLayer internals not given; synthesized as
    #             sum of 1-dim field embeddings + dense linear (standard LR-over-features).
    lr_logit = (lr_table[jnp.arange(F)[None, :], ids, 0].sum(axis=1, keepdims=True)
                + dense @ w_lr_dense + b_lr)                     # (B, 1)

    kparams = prepare_kernel_params(params, F, D, Nd)
    y_pred, loss = fibinet_forward(emb, dense, lr_logit, label, kparams)
    jax.block_until_ready((y_pred, loss))

    y_ref, loss_ref = reference_forward(emb, dense, lr_logit, label, params)
    np.testing.assert_allclose(np.asarray(y_pred), np.asarray(y_ref), rtol=1e-2, atol=1e-2)
    np.testing.assert_allclose(float(loss), float(loss_ref), rtol=1e-2, atol=1e-2)

    print("KERNEL_OK")
</pallas_src>

<mosaic_0001>
module attributes {stable_mosaic.version = 11 : i64} {
  func.func @kernel(%arg0: i32, %arg1: memref<128x128xf32, #tpu.memory_space<vmem>>, %arg2: memref<128x8xf32, #tpu.memory_space<vmem>>, %arg3: memref<128x8xbf16, #tpu.memory_space<vmem>>, %arg4: memref<8x128xbf16, #tpu.memory_space<vmem>>, %arg5: memref<128x192xbf16, #tpu.memory_space<vmem>>, %arg6: memref<192x64xbf16, #tpu.memory_space<vmem>>, %arg7: memref<192x64xbf16, #tpu.memory_space<vmem>>, %arg8: memref<4x64xf32, #tpu.memory_space<vmem>>, %arg9: memref<64x64xbf16, #tpu.memory_space<vmem>>, %arg10: memref<64x64xbf16, #tpu.memory_space<vmem>>, %arg11: memref<8x64xf32, #tpu.memory_space<vmem>>, %arg12: memref<128x2xf32, #tpu.memory_space<vmem>>) attributes {dimension_semantics = [#tpu.dimension_semantics<parallel>], iteration_bounds = array<i64: 2>, scalar_prefetch = 0 : i64, scratch_operands = 0 : i64, tpu.core_type = #tpu.core_type<tc>, window_params = [{transform_indices = @transform_0, window_bounds = array<i64: 128, 128>}, {transform_indices = @transform_1, window_bounds = array<i64: 128, 8>}, {pipeline_mode = #tpu.pipeline_mode<synchronous>, transform_indices = @transform_2, window_bounds = array<i64: 128, 8>}, {pipeline_mode = #tpu.pipeline_mode<synchronous>, transform_indices = @transform_3, window_bounds = array<i64: 8, 128>}, {pipeline_mode = #tpu.pipeline_mode<synchronous>, transform_indices = @transform_4, window_bounds = array<i64: 128, 192>}, {pipeline_mode = #tpu.pipeline_mode<synchronous>, transform_indices = @transform_5, window_bounds = array<i64: 192, 64>}, {pipeline_mode = #tpu.pipeline_mode<synchronous>, transform_indices = @transform_6, window_bounds = array<i64: 192, 64>}, {pipeline_mode = #tpu.pipeline_mode<synchronous>, transform_indices = @transform_7, window_bounds = array<i64: 4, 64>}, {pipeline_mode = #tpu.pipeline_mode<synchronous>, transform_indices = @transform_8, window_bounds = array<i64: 64, 64>}, {pipeline_mode = #tpu.pipeline_mode<synchronous>, transform_indices = @transform_9, window_bounds = array<i64: 64, 64>}, {pipeline_mode = #tpu.pipeline_mode<synchronous>, transform_indices = @transform_10, window_bounds = array<i64: 8, 64>}, {transform_indices = @transform_11, window_bounds = array<i64: 128, 2>}]} {
    %c0 = arith.constant 0 : index
    %c0_0 = arith.constant 0 : index
    %0 = vector.load %arg1[%c0, %c0_0] : memref<128x128xf32, #tpu.memory_space<vmem>>, vector<128x128xf32>
    %c0_1 = arith.constant 0 : index
    %c0_2 = arith.constant 0 : index
    %1 = vector.load %arg2[%c0_1, %c0_2] : memref<128x8xf32, #tpu.memory_space<vmem>>, vector<128x8xf32>
    %c0_3 = arith.constant 0 : index
    %c0_4 = arith.constant 0 : index
    %2 = vector.load %arg11[%c0_3, %c0_4] : memref<8x64xf32, #tpu.memory_space<vmem>>, vector<8x64xf32>
    %3 = arith.truncf %0 : vector<128x128xf32> to vector<128x128xbf16>
    %c0_5 = arith.constant 0 : index
    %c0_6 = arith.constant 0 : index
    %4 = vector.load %arg3[%c0_5, %c0_6] : memref<128x8xbf16, #tpu.memory_space<vmem>>, vector<128x8xbf16>
    %cst = arith.constant dense<0.000000e+00> : vector<128x8xf32>
    %5 = tpu.matmul %3, %4, %cst {dimension_numbers = #tpu.dot_dimension_numbers<[1], [0], [0], [1], [0, 0, 1, 1], [], []>} : vector<128x128xbf16>, vector<128x8xbf16>, vector<128x8xf32> -> vector<128x8xf32>
    %cst_7 = arith.constant 0.000000e+00 : f32
    %6 = vector.broadcast %cst_7 : f32 to vector<128x8xf32>
    %7 = arith.maximumf %5, %6 : vector<128x8xf32>
    %8 = arith.truncf %7 : vector<128x8xf32> to vector<128x8xbf16>
    %c0_8 = arith.constant 0 : index
    %c0_9 = arith.constant 0 : index
    %9 = vector.load %arg4[%c0_8, %c0_9] : memref<8x128xbf16, #tpu.memory_space<vmem>>, vector<8x128xbf16>
    %cst_10 = arith.constant dense<0.000000e+00> : vector<128x128xf32>
    %10 = tpu.matmul %8, %9, %cst_10 {dimension_numbers = #tpu.dot_dimension_numbers<[1], [0], [0], [1], [0, 0, 1, 1], [], []>} : vector<128x8xbf16>, vector<8x128xbf16>, vector<128x128xf32> -> vector<128x128xf32>
    %cst_11 = arith.constant 0.000000e+00 : f32
    %11 = vector.broadcast %cst_11 : f32 to vector<128x128xf32>
    %12 = arith.maximumf %10, %11 : vector<128x128xf32>
    %13 = arith.mulf %0, %12 : vector<128x128xf32>
    %14 = tpu.concatenate %0, %13 in 0 : vector<128x128xf32>, vector<128x128xf32> -> vector<256x128xf32>
    %15 = arith.truncf %14 : vector<256x128xf32> to vector<256x128xbf16>
    %c0_12 = arith.constant 0 : index
    %c0_13 = arith.constant 0 : index
    %16 = vector.load %arg5[%c0_12, %c0_13] : memref<128x192xbf16, #tpu.memory_space<vmem>>, vector<128x192xbf16>
    %cst_14 = arith.constant dense<0.000000e+00> : vector<256x192xf32>
    %17 = tpu.matmul %15, %16, %cst_14 {dimension_numbers = #tpu.dot_dimension_numbers<[1], [0], [0], [1], [0, 0, 1, 1], [], []>} : vector<256x128xbf16>, vector<128x192xbf16>, vector<256x192xf32> -> vector<256x192xf32>
    %18 = vector.extract_strided_slice %14 {offsets = [0, 32], sizes = [256, 32], strides = [1, 1]} : vector<256x128xf32> to vector<256x32xf32>
    %19 = vector.extract_strided_slice %14 {offsets = [0, 64], sizes = [256, 32], strides = [1, 1]} : vector<256x128xf32> to vector<256x32xf32>
    %20 = vector.extract_strided_slice %14 {offsets = [0, 96], sizes = [256, 32], strides = [1, 1]} : vector<256x128xf32> to vector<256x32xf32>
    %21 = vector.extract_strided_slice %14 {offsets = [0, 64], sizes = [256, 32], strides = [1, 1]} : vector<256x128xf32> to vector<256x32xf32>
    %22 = vector.extract_strided_slice %14 {offsets = [0, 96], sizes = [256, 32], strides = [1, 1]} : vector<256x128xf32> to vector<256x32xf32>
    %23 = vector.extract_strided_slice %14 {offsets = [0, 96], sizes = [256, 32], strides = [1, 1]} : vector<256x128xf32> to vector<256x32xf32>
    %24 = tpu.concatenate %18, %19, %20, %21, %22, %23 in 1 : vector<256x32xf32>, vector<256x32xf32>, vector<256x32xf32>, vector<256x32xf32>, vector<256x32xf32>, vector<256x32xf32> -> vector<256x192xf32>
    %25 = arith.mulf %17, %24 : vector<256x192xf32>
    %26 = arith.truncf %25 : vector<256x192xf32> to vector<256x192xbf16>
    %27 = vector.extract_strided_slice %26 {offsets = [0, 0], sizes = [128, 192], strides = [1, 1]} : vector<256x192xbf16> to vector<128x192xbf16>
    %28 = vector.extract_strided_slice %26 {offsets = [128, 0], sizes = [128, 192], strides = [1, 1]} : vector<256x192xbf16> to vector<128x192xbf16>
    %c0_15 = arith.constant 0 : index
    %c0_16 = arith.constant 0 : index
    %29 = vector.load %arg6[%c0_15, %c0_16] : memref<192x64xbf16, #tpu.memory_space<vmem>>, vector<192x64xbf16>
    %cst_17 = arith.constant dense<0.000000e+00> : vector<128x64xf32>
    %30 = tpu.matmul %27, %29, %cst_17 {dimension_numbers = #tpu.dot_dimension_numbers<[1], [0], [0], [1], [0, 0, 1, 1], [], []>} : vector<128x192xbf16>, vector<192x64xbf16>, vector<128x64xf32> -> vector<128x64xf32>
    %c0_18 = arith.constant 0 : index
    %c0_19 = arith.constant 0 : index
    %31 = vector.load %arg7[%c0_18, %c0_19] : memref<192x64xbf16, #tpu.memory_space<vmem>>, vector<192x64xbf16>
    %cst_20 = arith.constant dense<0.000000e+00> : vector<128x64xf32>
    %32 = tpu.matmul %28, %31, %cst_20 {dimension_numbers = #tpu.dot_dimension_numbers<[1], [0], [0], [1], [0, 0, 1, 1], [], []>} : vector<128x192xbf16>, vector<192x64xbf16>, vector<128x64xf32> -> vector<128x64xf32>
    %33 = arith.addf %30, %32 : vector<128x64xf32>
    %34 = vector.extract_strided_slice %2 {offsets = [0, 0], sizes = [1, 64], strides = [1, 1]} : vector<8x64xf32> to vector<1x64xf32>
    %35 = vector.broadcast %34 : vector<1x64xf32> to vector<128x64xf32>
    %36 = arith.addf %33, %35 : vector<128x64xf32>
    %c0_21 = arith.constant 0 : index
    %c0_22 = arith.constant 0 : index
    %37 = vector.load %arg8[%c0_21, %c0_22] : memref<4x64xf32, #tpu.memory_space<vmem>>, vector<4x64xf32>
    %38 = vector.extract_strided_slice %1 {offsets = [0, 0], sizes = [128, 1], strides = [1, 1]} : vector<128x8xf32> to vector<128x1xf32>
    %39 = vector.extract_strided_slice %37 {offsets = [0, 0], sizes = [1, 64], strides = [1, 1]} : vector<4x64xf32> to vector<1x64xf32>
    %40 = vector.broadcast %38 : vector<128x1xf32> to vector<128x64xf32>
    %41 = vector.broadcast %39 : vector<1x64xf32> to vector<128x64xf32>
    %42 = arith.mulf %40, %41 : vector<128x64xf32>
    %43 = arith.addf %36, %42 : vector<128x64xf32>
    %44 = vector.extract_strided_slice %1 {offsets = [0, 1], sizes = [128, 1], strides = [1, 1]} : vector<128x8xf32> to vector<128x1xf32>
    %45 = vector.extract_strided_slice %37 {offsets = [1, 0], sizes = [1, 64], strides = [1, 1]} : vector<4x64xf32> to vector<1x64xf32>
    %46 = vector.broadcast %44 : vector<128x1xf32> to vector<128x64xf32>
    %47 = vector.broadcast %45 : vector<1x64xf32> to vector<128x64xf32>
    %48 = arith.mulf %46, %47 : vector<128x64xf32>
    %49 = arith.addf %43, %48 : vector<128x64xf32>
    %50 = vector.extract_strided_slice %1 {offsets = [0, 2], sizes = [128, 1], strides = [1, 1]} : vector<128x8xf32> to vector<128x1xf32>
    %51 = vector.extract_strided_slice %37 {offsets = [2, 0], sizes = [1, 64], strides = [1, 1]} : vector<4x64xf32> to vector<1x64xf32>
    %52 = vector.broadcast %50 : vector<128x1xf32> to vector<128x64xf32>
    %53 = vector.broadcast %51 : vector<1x64xf32> to vector<128x64xf32>
    %54 = arith.mulf %52, %53 : vector<128x64xf32>
    %55 = arith.addf %49, %54 : vector<128x64xf32>
    %56 = vector.extract_strided_slice %1 {offsets = [0, 3], sizes = [128, 1], strides = [1, 1]} : vector<128x8xf32> to vector<128x1xf32>
    %57 = vector.extract_strided_slice %37 {offsets = [3, 0], sizes = [1, 64], strides = [1, 1]} : vector<4x64xf32> to vector<1x64xf32>
    %58 = vector.broadcast %56 : vector<128x1xf32> to vector<128x64xf32>
    %59 = vector.broadcast %57 : vector<1x64xf32> to vector<128x64xf32>
    %60 = arith.mulf %58, %59 : vector<128x64xf32>
    %61 = arith.addf %55, %60 : vector<128x64xf32>
    %cst_23 = arith.constant 0.000000e+00 : f32
    %62 = vector.broadcast %cst_23 : f32 to vector<128x64xf32>
    %63 = arith.maximumf %61, %62 : vector<128x64xf32>
    %64 = arith.truncf %63 : vector<128x64xf32> to vector<128x64xbf16>
    %c0_24 = arith.constant 0 : index
    %c0_25 = arith.constant 0 : index
    %65 = vector.load %arg9[%c0_24, %c0_25] : memref<64x64xbf16, #tpu.memory_space<vmem>>, vector<64x64xbf16>
    %cst_26 = arith.constant dense<0.000000e+00> : vector<128x64xf32>
    %66 = tpu.matmul %64, %65, %cst_26 {dimension_numbers = #tpu.dot_dimension_numbers<[1], [0], [0], [1], [0, 0, 1, 1], [], []>} : vector<128x64xbf16>, vector<64x64xbf16>, vector<128x64xf32> -> vector<128x64xf32>
    %67 = vector.extract_strided_slice %2 {offsets = [1, 0], sizes = [1, 64], strides = [1, 1]} : vector<8x64xf32> to vector<1x64xf32>
    %68 = vector.broadcast %67 : vector<1x64xf32> to vector<128x64xf32>
    %69 = arith.addf %66, %68 : vector<128x64xf32>
    %cst_27 = arith.constant 0.000000e+00 : f32
    %70 = vector.broadcast %cst_27 : f32 to vector<128x64xf32>
    %71 = arith.maximumf %69, %70 : vector<128x64xf32>
    %72 = arith.truncf %71 : vector<128x64xf32> to vector<128x64xbf16>
    %c0_28 = arith.constant 0 : index
    %c0_29 = arith.constant 0 : index
    %73 = vector.load %arg10[%c0_28, %c0_29] : memref<64x64xbf16, #tpu.memory_space<vmem>>, vector<64x64xbf16>
    %cst_30 = arith.constant dense<0.000000e+00> : vector<128x64xf32>
    %74 = tpu.matmul %72, %73, %cst_30 {dimension_numbers = #tpu.dot_dimension_numbers<[1], [0], [0], [1], [0, 0, 1, 1], [], []>} : vector<128x64xbf16>, vector<64x64xbf16>, vector<128x64xf32> -> vector<128x64xf32>
    %75 = vector.extract_strided_slice %2 {offsets = [2, 0], sizes = [1, 64], strides = [1, 1]} : vector<8x64xf32> to vector<1x64xf32>
    %76 = vector.broadcast %75 : vector<1x64xf32> to vector<128x64xf32>
    %77 = arith.addf %74, %76 : vector<128x64xf32>
    %cst_31 = arith.constant 0.000000e+00 : f32
    %78 = vector.broadcast %cst_31 : f32 to vector<128x64xf32>
    %79 = arith.maximumf %77, %78 : vector<128x64xf32>
    %80 = vector.extract_strided_slice %2 {offsets = [3, 0], sizes = [1, 64], strides = [1, 1]} : vector<8x64xf32> to vector<1x64xf32>
    %81 = vector.broadcast %80 : vector<1x64xf32> to vector<128x64xf32>
    %82 = arith.mulf %79, %81 : vector<128x64xf32>
    %cst_32 = arith.constant dense<0.000000e+00> : vector<128xf32>
    %83 = vector.multi_reduction <add>, %82, %cst_32 [1] : vector<128x64xf32> to vector<128xf32>
    %84 = vector.shape_cast %83 : vector<128xf32> to vector<128x1xf32>
    %85 = vector.extract_strided_slice %2 {offsets = [4, 0], sizes = [1, 1], strides = [1, 1]} : vector<8x64xf32> to vector<1x1xf32>
    %86 = vector.broadcast %85 : vector<1x1xf32> to vector<128x1xf32>
    %87 = arith.addf %84, %86 : vector<128x1xf32>
    %88 = vector.extract_strided_slice %1 {offsets = [0, 4], sizes = [128, 1], strides = [1, 1]} : vector<128x8xf32> to vector<128x1xf32>
    %89 = vector.extract_strided_slice %1 {offsets = [0, 5], sizes = [128, 1], strides = [1, 1]} : vector<128x8xf32> to vector<128x1xf32>
    %90 = arith.addf %88, %87 : vector<128x1xf32>
    %91 = arith.negf %90 : vector<128x1xf32>
    %92 = math.exp %91 : vector<128x1xf32>
    %cst_33 = arith.constant 1.000000e+00 : f32
    %93 = vector.broadcast %cst_33 : f32 to vector<128x1xf32>
    %94 = arith.addf %93, %92 : vector<128x1xf32>
    %95 = arith.divf %93, %94 : vector<128x1xf32>
    %cst_34 = arith.constant 1.000000e-07 : f32
    %cst_35 = arith.constant 0.99999988 : f32
    %96 = vector.broadcast %cst_34 : f32 to vector<128x1xf32>
    %97 = arith.maximumf %96, %95 : vector<128x1xf32>
    %98 = vector.broadcast %cst_35 : f32 to vector<128x1xf32>
    %99 = arith.minimumf %98, %97 : vector<128x1xf32>
    %100 = math.log %99 : vector<128x1xf32>
    %101 = arith.mulf %89, %100 : vector<128x1xf32>
    %cst_36 = arith.constant 1.000000e+00 : f32
    %102 = vector.broadcast %cst_36 : f32 to vector<128x1xf32>
    %103 = arith.subf %102, %89 : vector<128x1xf32>
    %cst_37 = arith.constant 1.000000e+00 : f32
    %104 = vector.broadcast %cst_37 : f32 to vector<128x1xf32>
    %105 = arith.subf %104, %99 : vector<128x1xf32>
    %106 = math.log %105 : vector<128x1xf32>
    %107 = arith.mulf %103, %106 : vector<128x1xf32>
    %108 = arith.addf %101, %107 : vector<128x1xf32>
    %cst_38 = arith.constant 0.000000e+00 : f32
    %109 = vector.broadcast %cst_38 : f32 to vector<128x1xf32>
    %110 = arith.subf %109, %108 : vector<128x1xf32>
    %c128_i32 = arith.constant 128 : i32
    %111 = arith.muli %arg0, %c128_i32 : i32
    %112 = tpu.iota {dimensions = array<i32: 0>} : vector<128x1xi32>
    %113 = vector.broadcast %111 : i32 to vector<128x1xi32>
    %114 = arith.addi %113, %112 : vector<128x1xi32>
    %c256_i32 = arith.constant 256 : i32
    %115 = vector.broadcast %c256_i32 : i32 to vector<128x1xi32>
    %116 = arith.cmpi slt, %114, %115 : vector<128x1xi32>
    %cst_39 = arith.constant 0.000000e+00 : f32
    %117 = vector.broadcast %cst_39 : f32 to vector<128x1xf32>
    %118 = arith.select %116, %110, %117 : vector<128x1xi1>, vector<128x1xf32>
    %119 = tpu.concatenate %95, %118 in 1 : vector<128x1xf32>, vector<128x1xf32> -> vector<128x2xf32>
    %c0_40 = arith.constant 0 : index
    %c0_41 = arith.constant 0 : index
    %120 = vector.load %arg12[%c0_40, %c0_41] : memref<128x2xf32, #tpu.memory_space<vmem>>, vector<128x2xf32>
    tpu.vector_store %arg12[%c0_40, %c0_41], %119 {strides = array<i32>} : memref<128x2xf32, #tpu.memory_space<vmem>>, vector<128x2xf32>,
    return
  }
  func.func @transform_0(%arg0: i32) -> (i32, i32) {
    %c0_i32 = arith.constant 0 : i32
    %c0_i32_0 = arith.constant 0 : i32
    return %arg0, %c0_i32 : i32, i32
  }
  func.func @transform_1(%arg0: i32) -> (i32, i32) {
    %c0_i32 = arith.constant 0 : i32
    %c0_i32_0 = arith.constant 0 : i32
    return %arg0, %c0_i32 : i32, i32
  }
  func.func @transform_2(%arg0: i32) -> (i32, i32) {
    %c0_i32 = arith.constant 0 : i32
    %c0_i32_0 = arith.constant 0 : i32
    %c0_i32_1 = arith.constant 0 : i32
    return %c0_i32, %c0_i32_0 : i32, i32
  }
  func.func @transform_3(%arg0: i32) -> (i32, i32) {
    %c0_i32 = arith.constant 0 : i32
    %c0_i32_0 = arith.constant 0 : i32
    %c0_i32_1 = arith.constant 0 : i32
    return %c0_i32, %c0_i32_0 : i32, i32
  }
  func.func @transform_4(%arg0: i32) -> (i32, i32) {
    %c0_i32 = arith.constant 0 : i32
    %c0_i32_0 = arith.constant 0 : i32
    %c0_i32_1 = arith.constant 0 : i32
    return %c0_i32, %c0_i32_0 : i32, i32
  }
  func.func @transform_5(%arg0: i32) -> (i32, i32) {
    %c0_i32 = arith.constant 0 : i32
    %c0_i32_0 = arith.constant 0 : i32
    %c0_i32_1 = arith.constant 0 : i32
    return %c0_i32, %c0_i32_0 : i32, i32
  }
  func.func @transform_6(%arg0: i32) -> (i32, i32) {
    %c0_i32 = arith.constant 0 : i32
    %c0_i32_0 = arith.constant 0 : i32
    %c0_i32_1 = arith.constant 0 : i32
    return %c0_i32, %c0_i32_0 : i32, i32
  }
  func.func @transform_7(%arg0: i32) -> (i32, i32) {
    %c0_i32 = arith.constant 0 : i32
    %c0_i32_0 = arith.constant 0 : i32
    %c0_i32_1 = arith.constant 0 : i32
    return %c0_i32, %c0_i32_0 : i32, i32
  }
  func.func @transform_8(%arg0: i32) -> (i32, i32) {
    %c0_i32 = arith.constant 0 : i32
    %c0_i32_0 = arith.constant 0 : i32
    %c0_i32_1 = arith.constant 0 : i32
    return %c0_i32, %c0_i32_0 : i32, i32
  }
  func.func @transform_9(%arg0: i32) -> (i32, i32) {
    %c0_i32 = arith.constant 0 : i32
    %c0_i32_0 = arith.constant 0 : i32
    %c0_i32_1 = arith.constant 0 : i32
    return %c0_i32, %c0_i32_0 : i32, i32
  }
  func.func @transform_10(%arg0: i32) -> (i32, i32) {
    %c0_i32 = arith.constant 0 : i32
    %c0_i32_0 = arith.constant 0 : i32
    %c0_i32_1 = arith.constant 0 : i32
    return %c0_i32, %c0_i32_0 : i32, i32
  }
  func.func @transform_11(%arg0: i32) -> (i32, i32) {
    %c0_i32 = arith.constant 0 : i32
    %c0_i32_0 = arith.constant 0 : i32
    return %arg0, %c0_i32 : i32, i32
  }
}

</mosaic_0001>

<bundles_post_ra>
// kernel: tpu_custom_call.1
= control target key start
LH: loop header
LB: loop body
LE: loop exit
PB: predicated region body
PF: predicated region fallthrough
CT: control target
= control target key end

     0   :  { %s4347_s17 = smov 0   ;;  %s6167_s0 = inlined_call_operand.vmem [shape: f32[256,128], index: 0, kind: input, shape index: {}]   ;;  %s6168_s1 = inlined_call_operand.vmem [shape: f32[256,8], index: 1, kind: input, shape index: {}]   ;;  %s6169_s2 = inlined_call_operand.vmem [shape: bf16[128,8], index: 2, kind: input, shape index: {}]   ;;  %s6170_s3 = inlined_call_operand.vmem [shape: bf16[8,128], index: 3, kind: input, shape index: {}]   ;;  %s6171_s4 = inlined_call_operand.vmem [shape: bf16[128,192], index: 4, kind: input, shape index: {}]   ;;  %s6172_s5 = inlined_call_operand.vmem [shape: bf16[192,64], index: 5, kind: input, shape index: {}]   ;;  %s6173_s6 = inlined_call_operand.vmem [shape: bf16[192,64], index: 6, kind: input, shape index: {}]   ;;  %s6174_s7 = inlined_call_operand.vmem [shape: f32[4,64], index: 7, kind: input, shape index: {}]   ;;  %s6175_s8 = inlined_call_operand.vmem [shape: bf16[64,64], index: 8, kind: input, shape index: {}]   ;;  %s6176_s9 = inlined_call_operand.vmem [shape: bf16[64,64], index: 9, kind: input, shape index: {}]   ;;  %s6177_s10 = inlined_call_operand.vmem [shape: f32[8,64], index: 10, kind: input, shape index: {}]   ;;  %s6178_s11 = inlined_call_operand.vmem [shape: f32[256,2], index: 11, kind: output, shape index: {}]  }
   0x1 LB: > { %s3740_s18 = sadd.s32 4294967295, %s4275_s17   ;;  %p3744_p0 = scmp.ge.s32.totalorder %s4275_s17, 1  ;;  %s4275_s17 = sphi %s4347_s17, %s21_s17  }
   0x2   : > { %p349_p1 = scmp.lt.s32.totalorder %s4275_s17, 3 }
   0x4   : > { %p350_p2 = pnand %p3744_p0, %p349_p1 }
   0x6   : > { %353 = sbr.rel (%p350_p2) target bundleno = 1966 (0x7ae), region = 64 }
   0xb   : > { %v4061_v0 = vld [vmem:[%s6169_s2 + $0x38] sm:$0xff]   ;;  %s3745_s21 = sshll.u32 %s3740_s18, 4  ;;  %v4062_v1 = vld [vmem:[%s6169_s2 + $0x30] sm:$0xff]   ;;  %v4063_v2 = vld [vmem:[%s6169_s2 + $0x28] sm:$0xff]   ;;  %vm665_vm0 = vcmask 1043456   ;;  %v6181_v35 = vmov 0  }
   0xc   : > { %p395_p3 = scmp.lt.s32.totalorder %s3745_s21, 31  ;;  %3915 = vmatprep.subr.bf16.mxu0 %v4061_v0  ;;  %v4064_v3 = vld [vmem:[%s6169_s2 + $0x20] sm:$0xff]   ;;  %v4065_v7 = vld [vmem:[%s6169_s2 + $0x18] sm:$0xff]   ;;  %v4066_v8 = vld [vmem:[%s6169_s2 + $0x10] sm:$0xff]   ;;  %4040 = vset.pattern.permute.xlu1 %v6181_v35  ;;  %s4278_s28 = smov 32   ;;  %vm640_vm1 = vcmask 64512  }
   0xd   : > { %3916 = vmatpush3.bf16.msra.mxu0 %v4061_v0  ;;  %v4067_v9 = vld [vmem:[%s6169_s2 + $0x8] sm:$0xff]   ;;  %v4068_v10 = vld [vmem:[%s6169_s2] sm:$0xff]   ;;  %v4071_v34 = vld [vmem:[%s6171_s4 + $0x74] ss:$8 sps:$4 sm:$0xff]   ;;  %s4280_s30 = smov 96   ;;  %vm1449_vm2 = vcmask 785408  }
   0xe   : > { %s6330_s21 = smov (!%p395_p3, %s3745_s21), 31  ;;  %3917 = vmatprep.subr.bf16.mxu0 %v4062_v1  ;;  %v639_v32 = vld [vmem:[%s6170_s3] sm:$0xf]  ;;  %v4069_v46 = vld [vmem:[%s6171_s4 + $0x70] ss:$8 sps:$4 sm:$0xff]   ;;  %vm1415_vm3 = vcmask 261120  }
   0xf   : > { %s4366_s26 = sshll.u32 %s6330_s21, 3  ;;  %4021 = vmatprep.subr.msk.bf16.mxu1 %vm665_vm0, %v639_v32  ;;  %v667_v33 = vsel %vm665_vm0, %v639_v32, 0  ;;  %v4074_v49 = vld [vmem:[%s6171_s4 + $0x64] ss:$8 sps:$4 sm:$0xff]   ;;  %v4072_v54 = vld [vmem:[%s6171_s4 + $0x60] ss:$8 sps:$4 sm:$0xff]  }
  0x10   : > { %s4372_s29 = scalar_lea.vmem %s6167_s0, %s4366_s26  ;;  %3948 = vmatpush3.bf16.msra.mxu1 %v667_v33  ;;  %v4077_v56 = vld [vmem:[%s6171_s4 + $0x54] ss:$8 sps:$4 sm:$0xff]   ;;  %v4075_v61 = vld [vmem:[%s6171_s4 + $0x50] ss:$8 sps:$4 sm:$0xff]   ;;  %v4080_v63 = vld [vmem:[%s6171_s4 + $0x44] ss:$8 sps:$4 sm:$0xff]   ;;  %s4929_s15 = scalar_lea.vmem %s6168_s1, %s4366_s26 }
  0x11   : > { %3918 = vmatpush3.bf16.msra.mxu0 %v4062_v1  ;;  %v4378_v4 = vld [vmem:[%s4372_s29] sm:$0xff]  ;;  %v4381_v5 = vld [vmem:[%s4372_s29 + $0x8] sm:$0xff]  ;;  %v4401_v11 = vld [vmem:[%s4372_s29 + $0x10] sm:$0xff]  ;;  %902 = vmatprep.subr.bf16.mxu1 %v4071_v34  ;;  %vm1416_vm4 = vcmask 523264   ;;  %s4284_s14 = smov 4   ;;  %s6114_s19 = scalar_lea.vmem %s6178_s11, %s4366_s26 }
  0x12   : > { %3919 = vmatprep.subr.bf16.mxu0 %v4063_v2  ;;  %v4385_v6 = vpack.c.bf16 %v4381_v5, %v4378_v4  ;;  %v4404_v12 = vld [vmem:[%s4372_s29 + $0x18] sm:$0xff]  ;;  %v4407_v13 = vld [vmem:[%s4372_s29 + $0x20] sm:$0xff]  ;;  %v4410_v14 = vld [vmem:[%s4372_s29 + $0x28] sm:$0xff]  ;;  %1223 = vrot.lane.b32.xlu0 %v4378_v4, %s4278_s28 }
  0x13   : > { %v4414_v15 = vpack.c.bf16 %v4404_v12, %v4401_v11  ;;  %v4418_v16 = vpack.c.bf16 %v4410_v14, %v4407_v13  ;;  %v4421_v17 = vld [vmem:[%s4372_s29 + $0x30] sm:$0xff]  ;;  %v4424_v18 = vld [vmem:[%s4372_s29 + $0x38] sm:$0xff]  ;;  %v4428_v19 = vld [vmem:[%s4372_s29 + $0x40] sm:$0xff]  ;;  %1225 = vrot.lane.b32.xlu1 %v4381_v5, %s4278_s28 }
  0x14   : > { %3931 = vmatprep.mubr.bf16.mxu0 %v4385_v6  ;;  %v4431_v20 = vld [vmem:[%s4372_s29 + $0x48] sm:$0xff]  ;;  %v4436_v21 = vpack.c.bf16 %v4424_v18, %v4421_v17  ;;  %v4445_v23 = vld [vmem:[%s4372_s29 + $0x50] sm:$0xff]  ;;  %v4448_v24 = vld [vmem:[%s4372_s29 + $0x58] sm:$0xff] }
  0x15   : > { %3920 = vmatpush3.bf16.msra.mxu0 %v4063_v2  ;;  %v4440_v22 = vpack.c.bf16 %v4431_v20, %v4428_v19  ;;  %v4451_v25 = vld [vmem:[%s4372_s29 + $0x60] sm:$0xff]  ;;  %v4454_v26 = vld [vmem:[%s4372_s29 + $0x68] sm:$0xff]  ;;  %v4458_v27 = vpack.c.bf16 %v4448_v24, %v4445_v23  ;;  %v4467_v29 = vld [vmem:[%s4372_s29 + $0x70] sm:$0xff] }
  0x16   : > { %3921 = vmatprep.subr.bf16.mxu0 %v4064_v3  ;;  %v4462_v28 = vpack.c.bf16 %v4454_v26, %v4451_v25  ;;  %v4470_v30 = vld [vmem:[%s4372_s29 + $0x78] sm:$0xff]  ;;  %s4279_s29 = smov 64  }
  0x17   : > { %v4474_v31 = vpack.c.bf16 %v4470_v30, %v4467_v29  ;;  %1319 = vrot.lane.b32.xlu0 %v4378_v4, %s4279_s29  ;;  %1321 = vrot.lane.b32.xlu1 %v4381_v5, %s4279_s29 }
  0x19   : > { %3922 = vmatpush3.bf16.msra.mxu0 %v4064_v3 }
  0x1a   : > { %3923 = vmatprep.subr.bf16.mxu0 %v4065_v7 }
  0x1b   : > { %1127 = vrot.lane.b32.xlu0 %v4378_v4, %s4280_s30  ;;  %1129 = vrot.lane.b32.xlu1 %v4381_v5, %s4280_s30 }
  0x1d   : > { %3924 = vmatpush3.bf16.msra.mxu0 %v4065_v7  ;;  %v4078_v7 = vld [vmem:[%s6171_s4 + $0x40] ss:$8 sps:$4 sm:$0xff]  }
  0x1e   : > { %3925 = vmatprep.subr.bf16.mxu0 %v4066_v8 }
  0x1f   : > { %1227 = vrot.lane.b32.xlu0 %v4401_v11, %s4278_s28  ;;  %1229 = vrot.lane.b32.xlu1 %v4404_v12, %s4278_s28 }
  0x21   : > { %3926 = vmatpush3.bf16.msra.mxu0 %v4066_v8 }
  0x22   : > { %3927 = vmatprep.subr.bf16.mxu0 %v4067_v9 }
  0x23   : > { %1323 = vrot.lane.b32.xlu0 %v4401_v11, %s4279_s29  ;;  %1325 = vrot.lane.b32.xlu1 %v4404_v12, %s4279_s29 }
  0x25   : > { %3928 = vmatpush3.bf16.msra.mxu0 %v4067_v9  ;;  %v4083_v9 = vld [vmem:[%s6171_s4 + $0x34] ss:$8 sps:$4 sm:$0xff]  }
  0x26   : > { %3929 = vmatprep.subr.bf16.mxu0 %v4068_v10 }
  0x27   : > { %1131 = vrot.lane.b32.xlu0 %v4401_v11, %s4280_s30  ;;  %1133 = vrot.lane.b32.xlu1 %v4404_v12, %s4280_s30 }
  0x29   : > { %3930 = vmatpush3.bf16.msra.mxu0 %v4068_v10 }
  0x2a   : > { %1754 = vmatprep.subr.bf16.mxu0 %v6181_v35 }
  0x2c   : > { %3932 = vmatmul.mubr.bf16.vlgmr.msra.gmra.mxu0 %v4414_v15 }
  0x2d   : > { %3935 = vmatprep.mubr.bf16.mxu0 %v4418_v16 }
  0x34   : > { %3936 = vmatmul.mubr.bf16.gmra.mxu0 %v4436_v21 }
  0x35   : > { %3939 = vmatprep.mubr.bf16.mxu0 %v4440_v22 }
  0x3c   : > { %3940 = vmatmul.mubr.bf16.gmra.mxu0 %v4458_v27 }
  0x3d   : > { %3943 = vmatprep.mubr.bf16.mxu0 %v4462_v28 }
  0x44   : > { %3944 = vmatmul.mubr.bf16.gmra.mxu0 %v4474_v31 }
  0xec   : > { %v3933_v36 = vpop.f32.mrf.mxu0 }
  0xed   : > { %v617_v43 = vmax.f32 %v3933_v36, 0.0  ;;  %v4081_v36 = vld [vmem:[%s6171_s4 + $0x30] ss:$8 sps:$4 sm:$0xff]  }
  0xee   : > { %v552_v37 = vpop.f32.mrf.mxu0 }
  0xef   : > { %v615_v41 = vmax.f32 %v552_v37, 0.0 }
  0xf0   : > { %v3934_v38 = vpop.f32.mrf.mxu0 }
  0xf1   : > { %v618_v39 = vmax.f32 %v3934_v38, 0.0  ;;  %v4086_v38 = vld [vmem:[%s6171_s4 + $0x24] ss:$8 sps:$4 sm:$0xff]  }
  0xf2   : > { %v555_v40 = vpop.f32.mrf.mxu0 }
  0xf3   : > { %v616_v42 = vmax.f32 %v555_v40, 0.0  ;;  %v632_v47 = vpack.c.bf16 %v618_v39, %v617_v43  ;;  %v4084_v43 = vld [vmem:[%s6171_s4 + $0x20] ss:$8 sps:$4 sm:$0xff]  }
  0xf4   : > { %v3937_v44 = vpop.f32.mrf.mxu0 }
  0xf5   : > { %v631_v45 = vpack.c.bf16 %v616_v42, %v615_v41  ;;  %v621_v50 = vmax.f32 %v3937_v44, 0.0 }
  0xf6   : > { %v568_v48 = vpop.f32.mrf.mxu0 }
  0xf7   : > { %3949 = vmatprep.mubr.msk.bf16.mxu1 %vm640_vm1, %v631_v45  ;;  %v619_v52 = vmax.f32 %v568_v48, 0.0  ;;  %v4089_v45 = vld [vmem:[%s6171_s4 + $0x14] ss:$8 sps:$4 sm:$0xff]  }
  0xf8   : > { %v3938_v51 = vpop.f32.mrf.mxu0  ;;  %3950 = vmatmul.mubr.msk.bf16.vlgmr.msra.gmra.mxu1 %vm640_vm1, %v632_v47 }
  0xf9   : > { %v622_v53 = vmax.f32 %v3938_v51, 0.0  ;;  %903 = vmatpush1.bf16.msra.mxu1 %v4069_v46  ;;  %v4090_v51 = vld [vmem:[%s6171_s4] ss:$8 sps:$4 sm:$0xff]  }
  0xfa   : > { %v571_v55 = vpop.f32.mrf.mxu0  ;;  %904 = vmatprep.subr.bf16.mxu1 %v4074_v49  ;;  %v4087_v49 = vld [vmem:[%s6171_s4 + $0x10] ss:$8 sps:$4 sm:$0xff]  }
  0xfb   : > { %v620_v57 = vmax.f32 %v571_v55, 0.0  ;;  %v634_v58 = vpack.c.bf16 %v622_v53, %v621_v50  ;;  %v4092_v50 = vld [vmem:[%s6171_s4 + $0x4] ss:$8 sps:$4 sm:$0xff]  }
  0xfc   : > { %v3941_v59 = vpop.f32.mrf.mxu0 }
  0xfd   : > { %v633_v60 = vpack.c.bf16 %v620_v57, %v619_v52  ;;  %905 = vmatpush1.bf16.msra.mxu1 %v4072_v54  ;;  %v625_v0 = vmax.f32 %v3941_v59, 0.0  ;;  %v1224_v57 = vpop.permute.xlu0 %1223 }
  0xfe   : > { %v584_v62 = vpop.f32.mrf.mxu0  ;;  %906 = vmatprep.subr.bf16.mxu1 %v4077_v56 }
  0xff   : > { %3953 = vmatprep.mubr.msk.bf16.mxu1 %vm640_vm1, %v633_v60  ;;  %v623_v2 = vmax.f32 %v584_v62, 0.0 }
 0x100   : > { %3954 = vmatmul.mubr.msk.bf16.gmra.mxu1 %vm640_vm1, %v634_v58  ;;  %v3942_v1 = vpop.f32.mrf.mxu0 }
 0x101   : > { %v626_v3 = vmax.f32 %v3942_v1, 0.0  ;;  %907 = vmatpush1.bf16.msra.mxu1 %v4075_v61 }
 0x102   : > { %v587_v8 = vpop.f32.mrf.mxu0  ;;  %908 = vmatprep.subr.bf16.mxu1 %v4080_v63 }
 0x103   : > { %v624_v10 = vmax.f32 %v587_v8, 0.0  ;;  %v636_v32 = vpack.c.bf16 %v626_v3, %v625_v0 }
 0x104   : > { %v3945_v33 = vpop.f32.mrf.mxu0 }
 0x105   : > { %v635_v34 = vpack.c.bf16 %v624_v10, %v623_v2  ;;  %909 = vmatpush1.bf16.msra.mxu1 %v4078_v7  ;;  %v629_v39 = vmax.f32 %v3945_v33, 0.0 }
 0x106   : > { %v600_v37 = vpop.f32.mrf.mxu0  ;;  %910 = vmatprep.subr.bf16.mxu1 %v4083_v9 }
 0x107   : > { %3957 = vmatprep.mubr.msk.bf16.mxu1 %vm640_vm1, %v635_v34  ;;  %v627_v41 = vmax.f32 %v600_v37, 0.0 }
 0x108   : > { %3958 = vmatmul.mubr.msk.bf16.gmra.mxu1 %vm640_vm1, %v636_v32  ;;  %v3946_v40 = vpop.f32.mrf.mxu0 }
 0x109   : > { %v630_v42 = vmax.f32 %v3946_v40, 0.0  ;;  %911 = vmatpush1.bf16.msra.mxu1 %v4081_v36 }
 0x10a   : > { %v603_v44 = vpop.f32.mrf.mxu0  ;;  %912 = vmatprep.subr.bf16.mxu1 %v4086_v38 }
 0x10b   : > { %v628_v46 = vmax.f32 %v603_v44, 0.0  ;;  %v638_v47 = vpack.c.bf16 %v630_v42, %v629_v39 }
 0x10d   : > { %v637_v48 = vpack.c.bf16 %v628_v46, %v627_v41  ;;  %913 = vmatpush1.bf16.msra.mxu1 %v4084_v43 }
 0x10e   : > { %914 = vmatprep.subr.bf16.mxu1 %v4089_v45 }
 0x10f   : > { %3961 = vmatprep.mubr.msk.bf16.mxu1 %vm640_vm1, %v637_v48 }
 0x110   : > { %3962 = vmatmul.mubr.msk.bf16.gmra.mxu1 %vm640_vm1, %v638_v47 }
 0x111   : > { %915 = vmatpush1.bf16.msra.mxu1 %v4087_v49  ;;  %934 = vmatprep.mubr.bf16.mxu1 %v6181_v35 }
 0x112   : > { %916 = vmatprep.subr.bf16.mxu1 %v4092_v50 }
 0x115   : > { %917 = vmatpush1.bf16.msra.mxu1 %v4090_v51 }
 0x118   : > { %935 = vmatmul.mubr.bf16.vlgmr.msra.gmra.mxu1 %v4385_v6 }
 0x119   : > { %944 = vmatprep.mubr.bf16.mxu1 %v6181_v35 }
 0x120   : > { %945 = vmatmul.mubr.bf16.gmra.mxu1 %v4414_v15 }
 0x121   : > { %954 = vmatprep.mubr.bf16.mxu1 %v6181_v35 }
 0x128   : > { %955 = vmatmul.mubr.bf16.gmra.mxu1 %v4418_v16 }
 0x129   : > { %964 = vmatprep.mubr.bf16.mxu1 %v6181_v35 }
 0x130   : > { %965 = vmatmul.mubr.bf16.gmra.mxu1 %v4436_v21 }
 0x131   : > { %974 = vmatprep.mubr.bf16.mxu1 %v6181_v35 }
 0x138   : > { %975 = vmatmul.mubr.bf16.gmra.mxu1 %v4440_v22 }
 0x139   : > { %984 = vmatprep.mubr.bf16.mxu1 %v6181_v35 }
 0x140   : > { %985 = vmatmul.mubr.bf16.gmra.mxu1 %v4458_v27 }
 0x141   : > { %994 = vmatprep.mubr.bf16.mxu1 %v6181_v35 }
 0x148   : > { %995 = vmatmul.mubr.bf16.gmra.mxu1 %v4462_v28 }
 0x149   : > { %1004 = vmatprep.mubr.bf16.mxu1 %v6181_v35 }
 0x150   : > { %1005 = vmatmul.mubr.bf16.gmra.mxu1 %v4474_v31 }
 0x151   : > { %1014 = vmatprep.mubr.bf16.mxu1 %v6181_v35 }
 0x1b8   : > { %v3951_v6 = vpop.f32.mrf.mxu1 }
 0x1b9   : > { %v768_v15 = vmax.f32 %v3951_v6, 0.0 }
 0x1ba   : > { %v703_v16 = vpop.f32.mrf.mxu1 }
 0x1bb   : > { %v784_v21 = vmul.f32 %v768_v15, %v4401_v11  ;;  %v766_v22 = vmax.f32 %v703_v16, 0.0 }
 0x1bc   : > { %v3952_v52 = vpop.f32.mrf.mxu1 }
 0x1bd   : > { %v782_v53 = vmul.f32 %v766_v22, %v4378_v4  ;;  %v769_v27 = vmax.f32 %v3952_v52, 0.0  ;;  %1259 = vrot.lane.b32.xlu0 %v784_v21, %s4278_s28  ;;  %v1226_v4 = vpop.permute.xlu1 %1225 }
 0x1be   : > { %v706_v54 = vpop.f32.mrf.mxu1 }
 0x1bf   : > { %v767_v28 = vmax.f32 %v706_v54, 0.0  ;;  %1351 = vrot.lane.b32.xlu1 %v782_v53, %s4279_s29  ;;  %v785_v31 = vmul.f32 %v769_v27, %v4404_v12  ;;  %v1320_v12 = vpop.permute.xlu0 %1319 }
 0x1c0   : > { %v3955_v55 = vpop.f32.mrf.mxu1  ;;  %v1482_v48 = vsel %vm1415_vm3, %v1224_v57, %v1320_v12 }
 0x1c1   : > { %v783_v56 = vmul.f32 %v767_v28, %v4381_v5  ;;  %1355 = vrot.lane.b32.xlu0 %v784_v21, %s4279_s29  ;;  %v1322_v5 = vpop.permute.xlu1 %1321  ;;  %v799_v0 = vpack.c.bf16 %v785_v31, %v784_v21  ;;  %v772_v8 = vmax.f32 %v3955_v55, 0.0 }
 0x1c2   : > { %v719_v11 = vpop.f32.mrf.mxu1  ;;  %v1483_v22 = vsel %vm1415_vm3, %v1226_v4, %v1322_v5 }
 0x1c3   : > { %1261 = vrot.lane.b32.xlu1 %v785_v31, %s4278_s28  ;;  %v798_v58 = vpack.c.bf16 %v783_v56, %v782_v53  ;;  %v770_v2 = vmax.f32 %v719_v11, 0.0  ;;  %v1128_v3 = vpop.permute.xlu0 %1127  ;;  %v788_v37 = vmul.f32 %v772_v8, %v4421_v17 }
 0x1c4   : > { %v3956_v59 = vpop.f32.mrf.mxu1  ;;  %v1450_v45 = vsel %vm1449_vm2, %v1128_v3, %v1224_v57  ;;  %v4093_v57 = vld [vmem:[%s6173_s6 + $0x38] sm:$0xff]  }
 0x1c5   : > { %1163 = vrot.lane.b32.xlu0 %v784_v21, %s4280_s30  ;;  %1015 = vmatmul.mubr.bf16.gmra.mxu1 %v798_v58  ;;  %v1130_v10 = vpop.permute.xlu1 %1129  ;;  %v4605_v33 = vmul.f32 %v770_v2, %v4407_v13  ;;  %v773_v34 = vmax.f32 %v3956_v59, 0.0 }
 0x1c6   : > { %v722_v60 = vpop.f32.mrf.mxu1  ;;  %1024 = vmatprep.mubr.bf16.mxu1 %v6181_v35  ;;  %v1451_v49 = vsel %vm1449_vm2, %v1130_v10, %v1226_v4  ;;  %1755 = vmatpush1.bf16.msra.mxu0 %v4093_v57 }
 0x1c7   : > { %1357 = vrot.lane.b32.xlu1 %v785_v31, %s4279_s29  ;;  %v771_v63 = vmax.f32 %v722_v60, 0.0  ;;  %v1228_v39 = vpop.permute.xlu0 %1227  ;;  %v789_v41 = vmul.f32 %v773_v34, %v4424_v18  ;;  %1756 = vmatprep.subr.bf16.mxu0 %v6181_v35 }
 0x1c8   : > { %v4590_v61 = vpop.f32.mrf.mxu1 }
 0x1c9   : > { %1255 = vrot.lane.b32.xlu0 %v782_v53, %s4278_s28  ;;  %v4599_v9 = vmul.f32 %v771_v63, %v4410_v14  ;;  %v1230_v42 = vpop.permute.xlu1 %1229  ;;  %v801_v6 = vpack.c.bf16 %v789_v41, %v788_v37  ;;  %v776_v60 = vmax.f32 %v4590_v61, 0.0  ;;  %v4094_v61 = vld [vmem:[%s6173_s6 + $0x30] sm:$0xff]  }
 0x1ca   : > { %v735_v62 = vpop.f32.mrf.mxu1  ;;  %1757 = vmatpush1.bf16.msra.mxu0 %v4094_v61 }
 0x1cb   : > { %1165 = vrot.lane.b32.xlu1 %v785_v31, %s4280_s30  ;;  %v800_v38 = vpack.c.bf16 %v4599_v9, %v4605_v33  ;;  %v1324_v46 = vpop.permute.xlu0 %1323  ;;  %v774_v50 = vmax.f32 %v735_v62, 0.0  ;;  %v792_v10 = vmul.f32 %v776_v60, %v4445_v23  ;;  %1758 = vmatprep.subr.bf16.mxu0 %v6181_v35 }
 0x1cc   : > { %v4594_v1 = vpop.f32.mrf.mxu1  ;;  %v1484_v5 = vsel %vm1415_vm3, %v1228_v39, %v1324_v46 }
 0x1cd   : > { %1159 = vrot.lane.b32.xlu0 %v782_v53, %s4280_s30  ;;  %1025 = vmatmul.mubr.bf16.gmra.mxu1 %v799_v0  ;;  %v1326_v15 = vpop.permute.xlu1 %1325  ;;  %v4637_v54 = vmul.f32 %v774_v50, %v4428_v19  ;;  %v777_v63 = vmax.f32 %v4594_v1, 0.0  ;;  %v4098_v50 = vld [vmem:[%s6173_s6 + $0x10] sm:$0xff]  }
 0x1ce   : > { %v738_v7 = vpop.f32.mrf.mxu1  ;;  %1034 = vmatprep.mubr.bf16.mxu1 %v6181_v35 }
 0x1cf   : > { %1353 = vrot.lane.b32.xlu1 %v783_v56, %s4279_s29  ;;  %v775_v51 = vmax.f32 %v738_v7, 0.0  ;;  %v1132_v55 = vpop.permute.xlu0 %1131  ;;  %v1485_v7 = vsel %vm1415_vm3, %v1230_v42, %v1326_v15  ;;  %v4100_v15 = vld [vmem:[%s6173_s6] sm:$0xff]  }
 0x1d0   : > { %v4602_v32 = vpop.f32.mrf.mxu1  ;;  %v1452_v58 = vsel %vm1449_vm2, %v1132_v55, %v1228_v39 }
 0x1d1   : > { %1257 = vrot.lane.b32.xlu0 %v783_v56, %s4278_s28  ;;  %v4640_v28 = vmul.f32 %v775_v51, %v4431_v20  ;;  %v1134_v4 = vpop.permute.xlu1 %1133 }
 0x1d2   : > { %v4608_v36 = vpop.f32.mrf.mxu1  ;;  %v1453_v62 = vsel %vm1449_vm2, %v1134_v4, %v1230_v42 }
 0x1d3   : > { %1161 = vrot.lane.b32.xlu1 %v783_v56, %s4280_s30  ;;  %v802_v0 = vpack.c.bf16 %v4640_v28, %v4637_v54 }
 0x1d4   : > { %v4614_v40 = vpop.f32.mrf.mxu1 }
 0x1d5   : > { %1267 = vrot.lane.b32.xlu0 %v788_v37, %s4278_s28  ;;  %1035 = vmatmul.mubr.bf16.gmra.mxu1 %v800_v38 }
 0x1d6   : > { %1044 = vmatprep.mubr.bf16.mxu1 %v6181_v35  ;;  %v4619_v43 = vpop.f32.mrf.mxu1 }
 0x1d7   : > { %1269 = vrot.lane.b32.xlu1 %v789_v41, %s4278_s28 }
 0x1d8   : > { %v936_v44 = vpop.f32.mrf.mxu1 }
 0x1d9   : > { %1363 = vrot.lane.b32.xlu0 %v788_v37, %s4279_s29  ;;  %v4627_v16 = vmul.f32 %v1450_v45, %v936_v44  ;;  %v778_v44 = vmax.f32 %v4608_v36, 0.0  ;;  %v779_v45 = vmax.f32 %v4619_v43, 0.0  ;;  %v780_v43 = vmax.f32 %v4602_v32, 0.0 }
 0x1da   : > { %v938_v47 = vpop.f32.mrf.mxu1 }
 0x1db   : > { %1365 = vrot.lane.b32.xlu1 %v789_v41, %s4279_s29  ;;  %6203 = vst [vmem:[#allocation2_spill] sm:$0xff] %v4627_v16  ;;  %v4631_v52 = vmul.f32 %v1482_v48, %v938_v47  ;;  %v4096_v47 = vld [vmem:[%s6173_s6 + $0x20] sm:$0xff]   ;;  %v795_v36 = vmul.f32 %v779_v45, %v4454_v26  ;;  %v781_v48 = vmax.f32 %v4614_v40, 0.0  ;;  %v796_v51 = vmul.f32 %v780_v43, %v4467_v29  ;;  %v4099_v40 = vld [vmem:[%s6173_s6 + $0x8] sm:$0xff]  }
 0x1dc   : > { %v940_v21 = vpop.f32.mrf.mxu1 }
 0x1dd   : > { %1171 = vrot.lane.b32.xlu0 %v788_v37, %s4280_s30  ;;  %1045 = vmatmul.mubr.bf16.gmra.mxu1 %v801_v6  ;;  %6204 = vst [vmem:[#allocation3_spill] sm:$0xff] %v4631_v52  ;;  %v4633_v53 = vmul.f32 %v1451_v49, %v940_v21  ;;  %v793_v37 = vmul.f32 %v777_v63, %v4448_v24  ;;  %v4101_v21 = vld [vmem:[%s6173_s6 + $0x58] sm:$0xff]  }
 0x1de   : > { %1054 = vmatprep.mubr.bf16.mxu1 %v6181_v35  ;;  %v942_v27 = vpop.f32.mrf.mxu1  ;;  %v797_v32 = vmul.f32 %v781_v48, %v4470_v30 }
 0x1df   : > { %6205 = vst [vmem:[#allocation4_spill] sm:$0xff] %v4633_v53  ;;  %1173 = vrot.lane.b32.xlu1 %v789_v41, %s4280_s30  ;;  %v4645_v56 = vmul.f32 %v1483_v22, %v942_v27  ;;  %v4095_v41 = vld [vmem:[%s6173_s6 + $0x28] sm:$0xff]   ;;  %v803_v46 = vpack.c.bf16 %v793_v37, %v792_v10  ;;  %v4102_v22 = vld [vmem:[%s6173_s6 + $0x50] sm:$0xff]  }
 0x1e0   : > { %v946_v11 = vpop.f32.mrf.mxu1  ;;  %1759 = vmatpush1.bf16.msra.mxu0 %v4095_v41  ;;  %v805_v6 = vpack.c.bf16 %v797_v32, %v796_v51  ;;  %v4103_v27 = vld [vmem:[%s6173_s6 + $0x48] sm:$0xff]  }
 0x1e1   : > { %6206 = vst [vmem:[#allocation5_spill] sm:$0xff] %v4645_v56  ;;  %1263 = vrot.lane.b32.xlu0 %v4605_v33, %s4278_s28  ;;  %v4664_v2 = vmul.f32 %v1452_v58, %v946_v11  ;;  %1760 = vmatprep.subr.bf16.mxu0 %v6181_v35 }
 0x1e2   : > { %v948_v12 = vpop.f32.mrf.mxu1 }
 0x1e3   : > { %1265 = vrot.lane.b32.xlu1 %v4599_v9, %s4278_s28  ;;  %6207 = vst [vmem:[#allocation6_spill] sm:$0xff] %v4664_v2  ;;  %v4672_v1 = vmul.f32 %v1484_v5, %v948_v12 }
 0x1e4   : > { %v950_v3 = vpop.f32.mrf.mxu1  ;;  %1761 = vmatpush1.bf16.msra.mxu0 %v4096_v47 }
 0x1e5   : > { %1359 = vrot.lane.b32.xlu0 %v4605_v33, %s4279_s29  ;;  %1055 = vmatmul.mubr.bf16.gmra.mxu1 %v802_v0  ;;  %6208 = vst [vmem:[#allocation7_spill] sm:$0xff] %v4672_v1  ;;  %v4674_v8 = vmul.f32 %v1453_v62, %v950_v3 }
 0x1e6   : > { %1064 = vmatprep.mubr.bf16.mxu1 %v6181_v35  ;;  %v952_v34 = vpop.f32.mrf.mxu1  ;;  %1762 = vmatprep.subr.bf16.mxu0 %v6181_v35 }
 0x1e7   : > { %6209 = vst [vmem:[#allocation8_spill] sm:$0xff] %v4674_v8  ;;  %1361 = vrot.lane.b32.xlu1 %v4599_v9, %s4279_s29  ;;  %v4683_v39 = vmul.f32 %v1485_v7, %v952_v34 }
 0x1e9   : > { %6210 = vst [vmem:[#allocation9_spill] sm:$0xff] %v4683_v39  ;;  %1167 = vrot.lane.b32.xlu0 %v4605_v33, %s4280_s30  ;;  %v794_v33 = vmul.f32 %v778_v44, %v4451_v25  ;;  %v5034_v39 = vld [vmem:[%s4929_s15 + $0x60] sm:$0xff] }
 0x1eb   : > { %1169 = vrot.lane.b32.xlu1 %v4599_v9, %s4280_s30  ;;  %v4097_v9 = vld [vmem:[%s6173_s6 + $0x18] sm:$0xff]   ;;  %v804_v49 = vpack.c.bf16 %v795_v36, %v794_v33 }
 0x1ec   : > { %1763 = vmatpush1.bf16.msra.mxu0 %v4097_v9 }
 0x1ed   : > { %1275 = vrot.lane.b32.xlu0 %v792_v10, %s4278_s28  ;;  %1065 = vmatmul.mubr.bf16.gmra.mxu1 %v803_v46 }
 0x1ee   : > { %1074 = vmatprep.mubr.bf16.mxu1 %v6181_v35  ;;  %1764 = vmatprep.subr.bf16.mxu0 %v6181_v35 }
 0x1ef   : > { %1277 = vrot.lane.b32.xlu1 %v793_v37, %s4278_s28 }
 0x1f0   : > { %1765 = vmatpush1.bf16.msra.mxu0 %v4098_v50 }
 0x1f1   : > { %1371 = vrot.lane.b32.xlu0 %v792_v10, %s4279_s29  ;;  %1766 = vmatprep.subr.bf16.mxu0 %v6181_v35 }
 0x1f3   : > { %1373 = vrot.lane.b32.xlu1 %v793_v37, %s4279_s29 }
 0x1f4   : > { %1767 = vmatpush1.bf16.msra.mxu0 %v4099_v40 }
 0x1f5   : > { %1179 = vrot.lane.b32.xlu0 %v792_v10, %s4280_s30  ;;  %1075 = vmatmul.mubr.bf16.gmra.mxu1 %v804_v49 }
 0x1f6   : > { %1084 = vmatprep.mubr.bf16.mxu1 %v6181_v35  ;;  %1768 = vmatprep.subr.bf16.mxu0 %v6181_v35 }
 0x1f7   : > { %1181 = vrot.lane.b32.xlu1 %v793_v37, %s4280_s30 }
 0x1f8   : > { %1769 = vmatpush1.bf16.msra.mxu0 %v4100_v15  ;;  %v4938_v15 = vld [vmem:[%s4929_s15 + $0x8] sm:$0xff] }
 0x1f9   : > { %1271 = vrot.lane.b32.xlu0 %v4637_v54, %s4278_s28  ;;  %1778 = vmatprep.subr.bf16.mxu0 %v6181_v35 }
 0x1fb   : > { %1273 = vrot.lane.b32.xlu1 %v4640_v28, %s4278_s28 }
 0x1fc   : > { %1779 = vmatpush2.bf16.msra.mxu0 %v4101_v21  ;;  %v4944_v21 = vld [vmem:[%s4929_s15 + $0x28] sm:$0xff] }
 0x1fd   : > { %1367 = vrot.lane.b32.xlu0 %v4637_v54, %s4279_s29  ;;  %1085 = vmatmul.mubr.bf16.gmra.mxu1 %v805_v6 }
 0x1fe   : > { %1780 = vmatprep.subr.bf16.mxu0 %v6181_v35 }
 0x1ff   : > { %1369 = vrot.lane.b32.xlu1 %v4640_v28, %s4279_s29 }
 0x200   : > { %1781 = vmatpush2.bf16.msra.mxu0 %v4102_v22 }
 0x201   : > { %1175 = vrot.lane.b32.xlu0 %v4637_v54, %s4280_s30  ;;  %1782 = vmatprep.subr.bf16.mxu0 %v6181_v35  ;;  %v4104_v54 = vld [vmem:[%s6173_s6 + $0x40] sm:$0xff]  }
 0x203   : > { %1177 = vrot.lane.b32.xlu1 %v4640_v28, %s4280_s30  ;;  %v4784_v28 = vpop.f32.mrf.mxu1 }
 0x204   : > { %1783 = vmatpush2.bf16.msra.mxu0 %v4103_v27  ;;  %6211 = vst [vmem:[#allocation10_spill] sm:$0xff] %v4784_v28 }
 0x205   : > { %1283 = vrot.lane.b32.xlu0 %v796_v51, %s4278_s28  ;;  %1784 = vmatprep.subr.bf16.mxu0 %v6181_v35  ;;  %v4790_v55 = vpop.f32.mrf.mxu1 }
 0x206   : > { %6212 = vst [vmem:[#allocation11_spill] sm:$0xff] %v4790_v55 }
 0x207   : > { %1285 = vrot.lane.b32.xlu1 %v797_v32, %s4278_s28 }
 0x208   : > { %1785 = vmatpush2.bf16.msra.mxu0 %v4104_v54  ;;  %v431_v54 = vld [vmem:[%s4929_s15 + $0x10] sm:$0xff] }
 0x209   : > { %1379 = vrot.lane.b32.xlu0 %v796_v51, %s4279_s29  ;;  %1947 = vmatprep.subr.bf16.mxu0 %v6181_v35 }
 0x20b   : > { %1381 = vrot.lane.b32.xlu1 %v797_v32, %s4279_s29 }
 0x20d   : > { %1187 = vrot.lane.b32.xlu0 %v796_v51, %s4280_s30 }
 0x20f   : > { %1189 = vrot.lane.b32.xlu1 %v797_v32, %s4280_s30 }
 0x211   : > { %1279 = vrot.lane.b32.xlu0 %v794_v33, %s4278_s28 }
 0x213   : > { %1281 = vrot.lane.b32.xlu1 %v795_v36, %s4278_s28 }
 0x215   : > { %1375 = vrot.lane.b32.xlu0 %v794_v33, %s4279_s29 }
 0x217   : > { %1377 = vrot.lane.b32.xlu1 %v795_v36, %s4279_s29 }
 0x219   : > { %1183 = vrot.lane.b32.xlu0 %v794_v33, %s4280_s30 }
 0x21b   : > { %1185 = vrot.lane.b32.xlu1 %v795_v36, %s4280_s30 }
 0x21d   : > { %1231 = vrot.lane.b32.xlu0 %v4407_v13, %s4278_s28 }
 0x21f   : > { %1233 = vrot.lane.b32.xlu1 %v4410_v14, %s4278_s28 }
 0x221   : > { %1327 = vrot.lane.b32.xlu0 %v4407_v13, %s4279_s29 }
 0x223   : > { %1329 = vrot.lane.b32.xlu1 %v4410_v14, %s4279_s29 }
 0x225   : > { %1135 = vrot.lane.b32.xlu0 %v4407_v13, %s4280_s30  ;;  %v4798_v13 = vpop.f32.mrf.mxu1 }
 0x226   : > { %6213 = vst [vmem:[#allocation12_spill] sm:$0xff] %v4798_v13 }
 0x227   : > { %1137 = vrot.lane.b32.xlu1 %v4410_v14, %s4280_s30  ;;  %v4808_v58 = vpop.f32.mrf.mxu1 }
 0x228   : > { %6214 = vst [vmem:[#allocation13_spill] sm:$0xff] %v4808_v58  ;;  %v6242_v58 = vmov 3  }
 0x229   : > { %1235 = vrot.lane.b32.xlu0 %v4421_v17, %s4278_s28  ;;  %v4818_v12 = vpop.f32.mrf.mxu1 }
 0x22a   : > { %6215 = vst [vmem:[#allocation14_spill] sm:$0xff] %v4818_v12  ;;  %v4996_v12 = vld [vmem:[%s4929_s15 + $0x20] sm:$0xff] }
 0x22b   : > { %1237 = vrot.lane.b32.xlu1 %v4424_v18, %s4278_s28  ;;  %v4828_v5 = vpop.f32.mrf.mxu1 }
 0x22c   : > { %6216 = vst [vmem:[#allocation15_spill] sm:$0xff] %v4828_v5  ;;  %v6186_v5 = vmov 2  }
 0x22d   : > { %1331 = vrot.lane.b32.xlu0 %v4421_v17, %s4279_s29  ;;  %v4838_v0 = vpop.f32.mrf.mxu1 }
 0x22e   : > { %6217 = vst [vmem:[#allocation16_spill] sm:$0xff] %v4838_v0  ;;  %v5004_v0 = vld [vmem:[%s4929_s15 + $0x38] sm:$0xff] }
 0x22f   : > { %v4794_v57 = vpop.permute.xlu0 %1259  ;;  %1333 = vrot.lane.b32.xlu1 %v4424_v18, %s4279_s29  ;;  %v4848_v7 = vpop.f32.mrf.mxu1 }
 0x230   : > { %6218 = vst [vmem:[#allocation17_spill] sm:$0xff] %v4848_v7  ;;  %v5014_v7 = vld [vmem:[%s4929_s15 + $0x40] sm:$0xff] }
 0x231   : > { %v4800_v14 = vpop.permute.xlu1 %1351  ;;  %1139 = vrot.lane.b32.xlu0 %v4421_v17, %s4280_s30  ;;  %v4859_v34 = vpop.f32.mrf.mxu1 }
 0x232   : > { %6219 = vst [vmem:[#allocation18_spill] sm:$0xff] %v4859_v34 }
 0x233   : > { %v4804_v11 = vpop.permute.xlu0 %1355  ;;  %1141 = vrot.lane.b32.xlu1 %v4424_v18, %s4280_s30  ;;  %v4869_v44 = vpop.f32.mrf.mxu1 }
 0x234   : > { %6220 = vst [vmem:[#allocation19_spill] sm:$0xff] %v4869_v44 }
 0x235   : > { %v4810_v4 = vpop.permute.xlu1 %1261  ;;  %1239 = vrot.lane.b32.xlu0 %v4428_v19, %s4278_s28  ;;  %v4879_v47 = vpop.f32.mrf.mxu1 }
 0x236   : > { %6221 = vst [vmem:[#allocation20_spill] sm:$0xff] %v4879_v47 }
 0x237   : > { %v4814_v60 = vpop.permute.xlu0 %1163  ;;  %1241 = vrot.lane.b32.xlu1 %v4431_v20, %s4278_s28  ;;  %v4889_v33 = vpop.f32.mrf.mxu1 }
 0x238   : > { %6222 = vst [vmem:[#allocation21_spill] sm:$0xff] %v4889_v33 }
 0x239   : > { %v4820_v17 = vpop.permute.xlu1 %1357  ;;  %1335 = vrot.lane.b32.xlu0 %v4428_v19, %s4279_s29  ;;  %v4899_v43 = vpop.f32.mrf.mxu1 }
 0x23a   : > { %6223 = vst [vmem:[#allocation22_spill] sm:$0xff] %v4899_v43  ;;  %v6183_v43 = vmov 1  }
 0x23b   : > { %v4824_v18 = vpop.permute.xlu0 %1255  ;;  %1337 = vrot.lane.b32.xlu1 %v4431_v20, %s4279_s29  ;;  %v4909_v50 = vpop.f32.mrf.mxu1 }
 0x23c   : > { %6224 = vst [vmem:[#allocation23_spill] sm:$0xff] %v4909_v50  ;;  %v1498_v56 = vsel %vm1415_vm3, %v4824_v18, %v4800_v14 }
 0x23d   : > { %v4830_v62 = vpop.permute.xlu1 %1165  ;;  %1143 = vrot.lane.b32.xlu0 %v4428_v19, %s4280_s30  ;;  %v4919_v51 = vpop.f32.mrf.mxu1 }
 0x23e   : > { %6225 = vst [vmem:[#allocation24_spill] sm:$0xff] %v4919_v51 }
 0x23f   : > { %v4834_v63 = vpop.permute.xlu0 %1159  ;;  %1145 = vrot.lane.b32.xlu1 %v4431_v20, %s4280_s30  ;;  %v6179_v20 = vmov 3   ;;  %v4935_v6 = vpop.f32.mrf.mxu1 }
 0x240   : > { %4044 = vset.pattern.permute.xlu0 %v6179_v20  ;;  %6226 = vst [vmem:[#allocation25_spill] sm:$0xff] %v4935_v6  ;;  %v4965_v20 = vld [vmem:[%s4929_s15] sm:$0xff] }
 0x241   : > { %v4840_v61 = vpop.permute.xlu1 %1353  ;;  %1243 = vrot.lane.b32.xlu0 %v4445_v23, %s4278_s28  ;;  %v4948_v27 = vpop.f32.mrf.mxu1 }
 0x242   : > { %6227 = vst [vmem:[#allocation26_spill] sm:$0xff] %v4948_v27 }
 0x243   : > { %v4844_v3 = vpop.permute.xlu0 %1257  ;;  %1245 = vrot.lane.b32.xlu1 %v4448_v24, %s4278_s28  ;;  %v4960_v31 = vpop.f32.mrf.mxu1 }
 0x244   : > { %6228 = vst [vmem:[#allocation27_spill] sm:$0xff] %v4960_v31  ;;  %v6230_v31 = vmov 0  }
 0x245   : > { %v4850_v19 = vpop.permute.xlu1 %1161  ;;  %1339 = vrot.lane.b32.xlu0 %v4445_v23, %s4279_s29  ;;  %v4970_v27 = vpop.f32.mrf.mxu1 }
 0x246   : > { %6229 = vst [vmem:[#allocation28_spill] sm:$0xff] %v4970_v27  ;;  %v4985_v27 = vld [vmem:[%s4929_s15 + $0x18] sm:$0xff]  ;;  %v1467_v52 = vsel %vm1449_vm2, %v4850_v19, %v4844_v3  ;;  %v1466_v19 = vsel %vm1449_vm2, %v4834_v63, %v4824_v18 }
 0x247   : > { %v4855_v10 = vpop.permute.xlu0 %1267  ;;  %1341 = vrot.lane.b32.xlu1 %v4448_v24, %s4279_s29  ;;  %v4980_v34 = vpop.f32.mrf.mxu1 }
 0x248   : > { %6231 = vst [vmem:[#allocation29_spill] sm:$0xff] %v4980_v34 }
 0x249   : > { %v4861_v37 = vpop.permute.xlu1 %1269  ;;  %1147 = vrot.lane.b32.xlu0 %v4445_v23, %s4280_s30  ;;  %v4990_v47 = vpop.f32.mrf.mxu1 }
 0x24a   : > { %6233 = vst [vmem:[#allocation31_spill] sm:$0xff] %v4990_v47 }
 0x24b   : > { %v4865_v41 = vpop.permute.xlu0 %1363  ;;  %1149 = vrot.lane.b32.xlu1 %v4448_v24, %s4280_s30  ;;  %v4999_v34 = vpop.f32.mrf.mxu1 }
 0x24c   : > { %6235 = vst [vmem:[#allocation33_spill] sm:$0xff] %v4999_v34 }
 0x24d   : > { %v4871_v45 = vpop.permute.xlu1 %1365  ;;  %1247 = vrot.lane.b32.xlu0 %v4451_v25, %s4278_s28  ;;  %v5011_v47 = vpop.f32.mrf.mxu1 }
 0x24e   : > { %6238 = vst [vmem:[#allocation36_spill] sm:$0xff] %v5011_v47 }
 0x24f   : > { %v4875_v46 = vpop.permute.xlu0 %1171  ;;  %1249 = vrot.lane.b32.xlu1 %v4454_v26, %s4278_s28  ;;  %v5021_v2 = vpop.f32.mrf.mxu1 }
 0x250   : > { %6241 = vst [vmem:[#allocation39_spill] sm:$0xff] %v5021_v2  ;;  %v5041_v2 = vld [vmem:[%s6175_s8 + $0x18] sm:$0xff]  }
 0x251   : > { %v4881_v23 = vpop.permute.xlu1 %1173  ;;  %1343 = vrot.lane.b32.xlu0 %v4451_v25, %s4279_s29  ;;  %4013 = vmatprep.subr.bf16.mxu1 %v5041_v2 }
 0x252   : > { %4017 = vmatpush3.bf16.msra.mxu1 %v5041_v2 }
 0x253   : > { %v4885_v24 = vpop.permute.xlu0 %1263  ;;  %1345 = vrot.lane.b32.xlu1 %v4454_v26, %s4279_s29 }
 0x255   : > { %v4891_v36 = vpop.permute.xlu1 %1265  ;;  %1151 = vrot.lane.b32.xlu0 %v4451_v25, %s4280_s30 }
 0x257   : > { %v4895_v9 = vpop.permute.xlu0 %1359  ;;  %1153 = vrot.lane.b32.xlu1 %v4454_v26, %s4280_s30 }
 0x259   : > { %v4901_v48 = vpop.permute.xlu1 %1361  ;;  %1251 = vrot.lane.b32.xlu0 %v4467_v29, %s4278_s28 }
 0x25b   : > { %v4905_v49 = vpop.permute.xlu0 %1167  ;;  %1253 = vrot.lane.b32.xlu1 %v4470_v30, %s4278_s28 }
 0x25d   : > { %v4911_v25 = vpop.permute.xlu1 %1169  ;;  %1347 = vrot.lane.b32.xlu0 %v4467_v29, %s4279_s29 }
 0x25f   : > { %v4915_v26 = vpop.permute.xlu0 %1275  ;;  %1349 = vrot.lane.b32.xlu1 %v4470_v30, %s4279_s29  ;;  %s4285_s29 = smov 1  }
 0x261   : > { %v4921_v32 = vpop.permute.xlu1 %1277  ;;  %1155 = vrot.lane.b32.xlu0 %v4467_v29, %s4280_s30 }
 0x263   : > { %v4931_v40 = vpop.permute.xlu0 %1371  ;;  %1157 = vrot.lane.b32.xlu1 %v4470_v30, %s4280_s30  ;;  %v4956_v30 = vld [vmem:[%s4929_s15 + $0x48] sm:$0xff]  ;;  %s3863_s30 = sshll.u32 %s3740_s18, 7 }
 0x265   : > { %v4940_v29 = vpop.permute.xlu1 %1373  ;;  %2386 = vperm.xlu0 %4044, %v4938_v15  }
 0x267   : > { %v4946_v22 = vpop.permute.xlu0 %1179  ;;  %2072 = vperm.xlu1 %4040, %v4938_v15  }
 0x269   : > { %v4952_v38 = vpop.permute.xlu1 %1181  ;;  %2402 = vperm.xlu0 %4044, %v4944_v21  }
 0x26b   : > { %v4958_v42 = vpop.permute.xlu0 %1271  ;;  %2077 = vperm.xlu1 %4040, %v431_v54  }
 0x26d   : > { %v4962_v59 = vpop.permute.xlu1 %1273  ;;  %2418 = vperm.xlu0 %4044, %v4956_v30  }
 0x26f   : > { %v4968_v35 = vpop.permute.xlu0 %1367  ;;  %4041 = vset.pattern.permute.xlu1 %v6183_v43 }
 0x270   : > { %2182 = vperm.xlu1 %4041, %v4965_v20  }
 0x271   : > { %v4974_v51 = vpop.permute.xlu1 %1369  ;;  %4053 = vset.pattern.permute.xlu0 %v6230_v31 }
 0x272   : > { %2067 = vperm.xlu0 %4053, %v4965_v20  }
 0x273   : > { %v4978_v50 = vpop.permute.xlu0 %1175 }
 0x274   : > { %2190 = vperm.xlu1 %4041, %v431_v54  }
 0x275   : > { %v4982_v6 = vpop.permute.xlu1 %1177 }
 0x276   : > { %2082 = vperm.xlu0 %4053, %v4985_v27  }
 0x277   : > { %v4988_v43 = vpop.permute.xlu0 %1283 }
 0x278   : > { %6232 = vst [vmem:[#allocation30_spill] sm:$0xff] %v4988_v43  ;;  %2194 = vperm.xlu1 %4041, %v4985_v27   ;;  %v1499_v43 = vsel %vm1415_vm3, %v4844_v3, %v4840_v61  ;;  %v4105_v3 = vld [vmem:[%s6172_s5 + $0x38] sm:$0xff]  }
 0x279   : > { %v4993_v44 = vpop.permute.xlu1 %1285 }
 0x27a   : > { %6234 = vst [vmem:[#allocation32_spill] sm:$0xff] %v4993_v44  ;;  %2087 = vperm.xlu0 %4053, %v4996_v12  }
 0x27b   : > { %v5001_v33 = vpop.permute.xlu0 %1379 }
 0x27c   : > { %6236 = vst [vmem:[#allocation34_spill] sm:$0xff] %v5001_v33  ;;  %4042 = vset.pattern.permute.xlu1 %v6186_v5  ;;  %v5024_v5 = vld [vmem:[%s4929_s15 + $0x58] sm:$0xff] }
 0x27d   : > { %v5007_v28 = vpop.permute.xlu1 %1381  ;;  %2286 = vperm.xlu1 %4042, %v4938_v15   ;;  %v5054_v33 = vld [vmem:[%s4929_s15 + $0x78] sm:$0xff] }
 0x27e   : > { %6237 = vst [vmem:[#allocation35_spill] sm:$0xff] %v5007_v28  ;;  %2102 = vperm.xlu0 %4053, %v5004_v0  }
 0x27f   : > { %v5016_v13 = vpop.permute.xlu0 %1187 }
 0x280   : > { %6239 = vst [vmem:[#allocation37_spill] sm:$0xff] %v5016_v13 }
 0x281   : > { %v5018_v34 = vpop.permute.xlu1 %1189  ;;  %2290 = vperm.xlu1 %4042, %v431_v54  }
 0x282   : > { %6240 = vst [vmem:[#allocation38_spill] sm:$0xff] %v5018_v34  ;;  %2107 = vperm.xlu0 %4053, %v5014_v7  }
 0x283   : > { %v5029_v47 = vpop.permute.xlu0 %1279 }
 0x285   : > { %v1016_v8 = vpop.f32.mrf.mxu1  ;;  %v5026_v55 = vpop.permute.xlu1 %1281  ;;  %4043 = vset.pattern.permute.xlu1 %v6242_v58 }
 0x286   : > { %2382 = vperm.xlu1 %4043, %v4965_v20   ;;  %2122 = vperm.xlu0 %4053, %v5024_v5  }
 0x287   : > { %v1018_v1 = vpop.f32.mrf.mxu1 }
 0x288   : > { %v1547_v34 = vmul.f32 %v1498_v56, %v1018_v1 }
 0x289   : > { %v1020_v16 = vpop.f32.mrf.mxu1  ;;  %v5036_v53 = vpop.permute.xlu1 %1377 }
 0x28a   : > { %2390 = vperm.xlu1 %4043, %v431_v54   ;;  %2127 = vperm.xlu0 %4053, %v5034_v39   ;;  %v1548_v13 = vmul.f32 %v1467_v52, %v1020_v16  ;;  %v5060_v54 = vpop.permute.xlu0 %1375  ;;  %v1546_v16 = vmul.f32 %v1466_v19, %v1016_v8  ;;  %v1501_v19 = vsel %vm1415_vm3, %v4810_v4, %v4820_v17  ;;  %v4107_v17 = vld [vmem:[%s6172_s5 + $0x28] sm:$0xff]  }
 0x28b   : > { %v1022_v28 = vpop.f32.mrf.mxu1 }
 0x28c   : > { %v1549_v44 = vmul.f32 %v1499_v43, %v1022_v28  ;;  %v1594_v18 = vpack.c.bf16 %v1548_v13, %v1546_v16  ;;  %v1469_v28 = vsel %vm1449_vm2, %v4830_v62, %v4810_v4  ;;  %v1500_v13 = vsel %vm1415_vm3, %v4794_v57, %v4804_v11 }
 0x28d   : > { %v1026_v52 = vpop.f32.mrf.mxu1  ;;  %v5063_v14 = vpop.permute.xlu1 %1185  ;;  %v1468_v62 = vsel %vm1449_vm2, %v4814_v60, %v4794_v57 }
 0x28e   : > { %v1595_v61 = vpack.c.bf16 %v1549_v44, %v1547_v34  ;;  %2394 = vperm.xlu1 %4043, %v4985_v27   ;;  %2142 = vperm.xlu0 %4053, %v5054_v33   ;;  %v5073_v8 = vpop.permute.xlu0 %1183  ;;  %v4106_v34 = vld [vmem:[%s6172_s5 + $0x30] sm:$0xff]   ;;  %v1550_v11 = vmul.f32 %v1468_v62, %v1026_v52 }
 0x28f   : > { %v1028_v63 = vpop.f32.mrf.mxu1 }
 0x290   : > { %3795 = vmatprep.mubr.msk.bf16.mxu0 %vm1416_vm4, %v1595_v61  ;;  %v1551_v16 = vmul.f32 %v1500_v13, %v1028_v63  ;;  %v1502_v13 = vsel %vm1415_vm3, %v4885_v24, %v4895_v9 }
 0x291   : > { %v1030_v56 = vpop.f32.mrf.mxu1  ;;  %1787 = vmatmul.mubr.bf16.vlgmr.msra.gmra.mxu0 %v1594_v18  ;;  %v5071_v1 = vpop.permute.xlu1 %1233  ;;  %v6244_v18 = vmov 1  }
 0x292   : > { %6243 = vst [vmem:[#allocation40_spill] sm:$0xff] %v5071_v1  ;;  %1948 = vmatpush1.bf16.msra.mxu0 %v4105_v3  ;;  %4045 = vset.pattern.permute.xlu1 %v6230_v31  ;;  %v1552_v44 = vmul.f32 %v1469_v28, %v1030_v56  ;;  %v5094_v3 = vld [vmem:[%s4929_s15 + $0x30] sm:$0xff]  ;;  %v5105_v60 = vpop.permute.xlu0 %1231 }
 0x293   : > { %v1032_v43 = vpop.f32.mrf.mxu1  ;;  %1949 = vmatprep.subr.bf16.mxu0 %v6230_v31  ;;  %2092 = vperm.xlu1 %4045, %v4944_v21  }
 0x294   : > { %v1553_v61 = vmul.f32 %v1501_v19, %v1032_v43  ;;  %4055 = vset.pattern.permute.xlu0 %v6244_v18  ;;  %v1596_v1 = vpack.c.bf16 %v1552_v44, %v1550_v11  ;;  %v1503_v43 = vsel %vm1415_vm3, %v4891_v36, %v4901_v48  ;;  %v5136_v48 = vld [vmem:[%s4929_s15 + $0x68] sm:$0xff] }
 0x295   : > { %v1036_v56 = vpop.f32.mrf.mxu1  ;;  %v5097_v28 = vpop.permute.xlu1 %1329  ;;  %2186 = vperm.xlu0 %4055, %v4938_v15   ;;  %v1471_v15 = vsel %vm1449_vm2, %v4911_v25, %v4891_v36  ;;  %v1470_v25 = vsel %vm1449_vm2, %v4905_v49, %v4885_v24  ;;  %v4109_v36 = vld [vmem:[%s6172_s5 + $0x18] sm:$0xff]  }
 0x296   : > { %v1597_v4 = vpack.c.bf16 %v1553_v61, %v1551_v16  ;;  %1950 = vmatpush1.bf16.msra.mxu0 %v4106_v34  ;;  %v4108_v34 = vld [vmem:[%s6172_s5 + $0x20] sm:$0xff]   ;;  %v1554_v9 = vmul.f32 %v1470_v25, %v1036_v56  ;;  %v5130_v61 = vpop.permute.xlu0 %1327 }
 0x297   : > { %v1038_v57 = vpop.f32.mrf.mxu1  ;;  %1951 = vmatprep.subr.bf16.mxu0 %v6230_v31  ;;  %2097 = vperm.xlu1 %4045, %v5094_v3  }
 0x298   : > { %3796 = vmatprep.mubr.msk.bf16.mxu0 %vm1416_vm4, %v1597_v4  ;;  %v1555_v19 = vmul.f32 %v1502_v13, %v1038_v57  ;;  %v4110_v57 = vld [vmem:[%s6172_s5 + $0x10] sm:$0xff]   ;;  %v1505_v13 = vsel %vm1415_vm3, %v4861_v37, %v4871_v45 }
 0x299   : > { %v1040_v52 = vpop.f32.mrf.mxu1  ;;  %1795 = vmatmul.mubr.bf16.gmra.mxu0 %v1596_v1  ;;  %v5108_v63 = vpop.permute.xlu1 %1137  ;;  %2202 = vperm.xlu0 %4055, %v4944_v21  }
 0x29a   : > { %1952 = vmatpush1.bf16.msra.mxu0 %v4107_v17  ;;  %v1556_v44 = vmul.f32 %v1471_v15, %v1040_v52  ;;  %v1473_v17 = vsel %vm1449_vm2, %v4881_v23, %v4861_v37  ;;  %v1504_v52 = vsel %vm1415_vm3, %v4855_v10, %v4865_v41  ;;  %v1472_v23 = vsel %vm1449_vm2, %v4875_v46, %v4855_v10  ;;  %v4111_v37 = vld [vmem:[%s6172_s5 + $0x8] sm:$0xff]  }
 0x29b   : > { %v1042_v1 = vpop.f32.mrf.mxu1  ;;  %1953 = vmatprep.subr.bf16.mxu0 %v6230_v31  ;;  %4046 = vset.pattern.permute.xlu1 %v6244_v18 }
 0x29c   : > { %v1557_v62 = vmul.f32 %v1503_v43, %v1042_v1  ;;  %2198 = vperm.xlu1 %4046, %v4996_v12   ;;  %v1598_v4 = vpack.c.bf16 %v1556_v44, %v1554_v9  ;;  %v5157_v44 = vpop.permute.xlu0 %1135 }
 0x29d   : > { %v1046_v16 = vpop.f32.mrf.mxu1  ;;  %2218 = vperm.xlu0 %4055, %v4956_v30   ;;  %v5138_v24 = vpop.permute.xlu1 %1237 }
 0x29e   : > { %v1599_v11 = vpack.c.bf16 %v1557_v62, %v1555_v19  ;;  %1954 = vmatpush1.bf16.msra.mxu0 %v4108_v34  ;;  %v1558_v25 = vmul.f32 %v1472_v23, %v1046_v16  ;;  %v6245_v62 = vmov 2   ;;  %v4114_v23 = vld [vmem:[%s6172_s5 + $0x50] sm:$0xff]  }
 0x29f   : > { %v1048_v49 = vpop.f32.mrf.mxu1  ;;  %1955 = vmatprep.subr.bf16.mxu0 %v6230_v31 }
 0x2a0   : > { %3797 = vmatprep.mubr.msk.bf16.mxu0 %vm1416_vm4, %v1599_v11  ;;  %2206 = vperm.xlu1 %4046, %v5094_v3   ;;  %v1559_v1 = vmul.f32 %v1504_v52, %v1048_v49  ;;  %v5174_v16 = vpop.permute.xlu0 %1235  ;;  %v1475_v11 = vsel %vm1449_vm2, %v4982_v6, %v4962_v59  ;;  %v1474_v6 = vsel %vm1449_vm2, %v4978_v50, %v4958_v42 }
 0x2a1   : > { %v1050_v56 = vpop.f32.mrf.mxu1  ;;  %1803 = vmatmul.mubr.bf16.gmra.mxu0 %v1598_v4  ;;  %2234 = vperm.xlu0 %4055, %v5136_v48   ;;  %v5163_v41 = vpop.permute.xlu1 %1333  ;;  %v1506_v4 = vsel %vm1415_vm3, %v4958_v42, %v4968_v35  ;;  %v4113_v35 = vld [vmem:[%s6172_s5 + $0x58] sm:$0xff]  }
 0x2a2   : > { %1956 = vmatpush1.bf16.msra.mxu0 %v4109_v36  ;;  %v1560_v15 = vmul.f32 %v1473_v17, %v1050_v56  ;;  %v1507_v56 = vsel %vm1415_vm3, %v4962_v59, %v4974_v51 }
 0x2a3   : > { %v1052_v34 = vpop.f32.mrf.mxu1  ;;  %1957 = vmatprep.subr.bf16.mxu0 %v6230_v31 }
 0x2a4   : > { %v1561_v43 = vmul.f32 %v1505_v13, %v1052_v34  ;;  %2210 = vperm.xlu1 %4046, %v5004_v0   ;;  %v1600_v45 = vpack.c.bf16 %v1560_v15, %v1558_v25  ;;  %v5201_v34 = vpop.permute.xlu0 %1331  ;;  %v1477_v13 = vsel %vm1449_vm2, %v4952_v38, %v4921_v32  ;;  %v1476_v38 = vsel %vm1449_vm2, %v4946_v22, %v4915_v26 }
 0x2a5   : > { %v1056_v19 = vpop.f32.mrf.mxu1  ;;  %4057 = vset.pattern.permute.xlu0 %v6245_v62  ;;  %v5183_v36 = vpop.permute.xlu1 %1141  ;;  %v1479_v22 = vsel %vm1449_vm2, %v5063_v14, %v5026_v55 }
 0x2a6   : > { %v1601_v9 = vpack.c.bf16 %v1561_v43, %v1559_v1  ;;  %1958 = vmatpush1.bf16.msra.mxu0 %v4110_v57  ;;  %2282 = vperm.xlu0 %4057, %v4965_v20   ;;  %v4112_v20 = vld [vmem:[%s6172_s5] sm:$0xff]   ;;  %v1562_v57 = vmul.f32 %v1474_v6, %v1056_v19  ;;  %v1508_v1 = vsel %vm1415_vm3, %v4915_v26, %v4931_v40 }
 0x2a7   : > { %v1058_v10 = vpop.f32.mrf.mxu1  ;;  %1959 = vmatprep.subr.bf16.mxu0 %v6230_v31  ;;  %v1509_v19 = vsel %vm1415_vm3, %v4921_v32, %v4940_v29  ;;  %v4115_v32 = vld [vmem:[%s6172_s5 + $0x48] sm:$0xff]  }
 0x2a8   : > { %3798 = vmatprep.mubr.msk.bf16.mxu0 %vm1416_vm4, %v1601_v9  ;;  %4047 = vset.pattern.permute.xlu1 %v6245_v62  ;;  %v1563_v17 = vmul.f32 %v1506_v4, %v1058_v10  ;;  %v5225_v10 = vpop.permute.xlu0 %1139 }
 0x2a9   : > { %v1060_v46 = vpop.f32.mrf.mxu1  ;;  %1811 = vmatmul.mubr.bf16.gmra.mxu0 %v1600_v45  ;;  %2302 = vperm.xlu1 %4047, %v4944_v21   ;;  %v5204_v42 = vpop.permute.xlu1 %1241 }
 0x2aa   : > { %1960 = vmatpush1.bf16.msra.mxu0 %v4111_v37  ;;  %2294 = vperm.xlu0 %4057, %v4985_v27   ;;  %v1564_v21 = vmul.f32 %v1475_v11, %v1060_v46 }
 0x2ab   : > { %v1062_v49 = vpop.f32.mrf.mxu1  ;;  %1961 = vmatprep.subr.bf16.mxu0 %v6230_v31 }
 0x2ac   : > { %v1565_v27 = vmul.f32 %v1507_v56, %v1062_v49  ;;  %v1602_v59 = vpack.c.bf16 %v1564_v21, %v1562_v57  ;;  %v1511_v49 = vsel %vm1415_vm3, %v5026_v55, %v5036_v53  ;;  %v5251_v14 = vpop.permute.xlu0 %1239 }
 0x2ad   : > { %v1066_v52 = vpop.f32.mrf.mxu1  ;;  %2306 = vperm.xlu1 %4047, %v5094_v3   ;;  %v5231_v29 = vpop.permute.xlu1 %1337 }
 0x2ae   : > { %v1603_v15 = vpack.c.bf16 %v1565_v27, %v1563_v17  ;;  %1962 = vmatpush1.bf16.msra.mxu0 %v4112_v20  ;;  %2298 = vperm.xlu0 %4057, %v4996_v12   ;;  %v1566_v37 = vmul.f32 %v1476_v38, %v1066_v52  ;;  %v1510_v20 = vsel %vm1415_vm3, %v5029_v47, %v5060_v54  ;;  %v5263_v52 = vld [vmem:[%s4929_s15 + $0x50] sm:$0xff]  ;;  %v6251_v38 = vld [vmem:[#allocation37_spill] sm:$0xff] }
 0x2af   : > { %v1068_v51 = vpop.f32.mrf.mxu1  ;;  %1971 = vmatprep.subr.bf16.mxu0 %v6230_v31 }
 0x2b0   : > { %3799 = vmatprep.mubr.msk.bf16.mxu0 %vm1416_vm4, %v1603_v15  ;;  %v1567_v9 = vmul.f32 %v1508_v1, %v1068_v51  ;;  %v6246_v15 = vld [vmem:[#allocation32_spill] sm:$0xff] }
 0x2b1   : > { %v1070_v50 = vpop.f32.mrf.mxu1  ;;  %1819 = vmatmul.mubr.bf16.gmra.mxu0 %v1602_v59  ;;  %4048 = vset.pattern.permute.xlu1 %v6242_v58  ;;  %v5256_v54 = vpop.permute.xlu1 %1145 }
 0x2b2   : > { %1972 = vmatpush2.bf16.msra.mxu0 %v4113_v35  ;;  %2398 = vperm.xlu1 %4048, %v4996_v12   ;;  %v1568_v43 = vmul.f32 %v1477_v13, %v1070_v50  ;;  %v6247_v35 = vld [vmem:[#allocation38_spill] sm:$0xff] }
 0x2b3   : > { %v1072_v25 = vpop.f32.mrf.mxu1  ;;  %1973 = vmatprep.subr.bf16.mxu0 %v6230_v31  ;;  %2310 = vperm.xlu0 %4057, %v5004_v0   ;;  %v1481_v59 = vsel %vm1449_vm2, %v6247_v35, %v6246_v15  ;;  %v6248_v50 = vld [vmem:[#allocation34_spill] sm:$0xff]  ;;  %v6263_v35 = vld [vmem:[#allocation11_spill] sm:$0xff] }
 0x2b4   : > { %v1569_v12 = vmul.f32 %v1509_v19, %v1072_v25  ;;  %v1604_v46 = vpack.c.bf16 %v1568_v43, %v1566_v37  ;;  %v6249_v13 = vld [vmem:[#allocation30_spill] sm:$0xff]  ;;  %v6250_v25 = vld [vmem:[#allocation35_spill] sm:$0xff] }
 0x2b5   : > { %v1076_v45 = vpop.f32.mrf.mxu1  ;;  %v5271_v51 = vpop.permute.xlu1 %1245  ;;  %v1513_v19 = vsel %vm1415_vm3, %v6246_v15, %v6250_v25  ;;  %v6267_v25 = vld [vmem:[#allocation12_spill] sm:$0xff] }
 0x2b6   : > { %v1605_v40 = vpack.c.bf16 %v1569_v12, %v1567_v9  ;;  %1974 = vmatpush2.bf16.msra.mxu0 %v4114_v23  ;;  %2406 = vperm.xlu1 %4048, %v5094_v3   ;;  %v4116_v3 = vld [vmem:[%s6172_s5 + $0x40] sm:$0xff]   ;;  %v1512_v23 = vsel %vm1415_vm3, %v6249_v13, %v6248_v50  ;;  %v1480_v9 = vsel %vm1449_vm2, %v6251_v38, %v6249_v13  ;;  %v6264_v13 = vld [vmem:[#allocation8_spill] sm:$0xff]  ;;  %v6268_v38 = vld [vmem:[#allocation17_spill] sm:$0xff] }
 0x2b7   : > { %v1078_v11 = vpop.f32.mrf.mxu1  ;;  %1975 = vmatprep.subr.bf16.mxu0 %v6230_v31  ;;  %2314 = vperm.xlu0 %4057, %v5014_v7  }
 0x2b8   : > { %3800 = vmatprep.mubr.msk.bf16.mxu0 %vm1416_vm4, %v1605_v40  ;;  %v1571_v56 = vmul.f32 %v1510_v20, %v1078_v11 }
 0x2b9   : > { %1827 = vmatmul.mubr.bf16.gmra.mxu0 %v1604_v46  ;;  %v1080_v26 = vpop.f32.mrf.mxu1  ;;  %v1342_v11 = vpop.permute.xlu1 %1341 }
 0x2ba   : > { %1976 = vmatpush2.bf16.msra.mxu0 %v4115_v32  ;;  %2410 = vperm.xlu1 %4048, %v5004_v0   ;;  %v1572_v4 = vmul.f32 %v1479_v22, %v1080_v26  ;;  %v1478_v0 = vsel %vm1449_vm2, %v5073_v8, %v5029_v47  ;;  %v5266_v8 = vpop.permute.xlu0 %1335  ;;  %v6252_v26 = vld [vmem:[#allocation5_spill] sm:$0xff]  ;;  %v6253_v22 = vld [vmem:[#allocation3_spill] sm:$0xff] }
 0x2bb   : > { %v1082_v21 = vpop.f32.mrf.mxu1  ;;  %1977 = vmatprep.subr.bf16.mxu0 %v6230_v31  ;;  %2326 = vperm.xlu0 %4057, %v5024_v5   ;;  %v1570_v17 = vmul.f32 %v1478_v0, %v1076_v45  ;;  %v6256_v0 = vld [vmem:[#allocation4_spill] sm:$0xff] }
 0x2bc   : > { %v1573_v6 = vmul.f32 %v1511_v49, %v1082_v21  ;;  %v6255_v21 = vld [vmem:[#allocation40_spill] sm:$0xff] }
 0x2bd   : > { %v1086_v27 = vpop.f32.mrf.mxu1  ;;  %v1606_v53 = vpack.c.bf16 %v1572_v4, %v1570_v17  ;;  %v5298_v4 = vpop.permute.xlu1 %1149  ;;  %v1487_v49 = vsel %vm1415_vm3, %v6255_v21, %v5097_v28  ;;  %v6259_v17 = vld [vmem:[#allocation9_spill] sm:$0xff] }
 0x2be   : > { %v1607_v57 = vpack.c.bf16 %v1573_v6, %v1571_v56  ;;  %1978 = vmatpush2.bf16.msra.mxu0 %v4116_v3  ;;  %4049 = vset.pattern.permute.xlu1 %v6230_v31  ;;  %v1574_v45 = vmul.f32 %v1480_v9, %v1086_v27  ;;  %v5286_v46 = vpop.permute.xlu0 %1143  ;;  %v6254_v3 = vpack.c.bf16 %v6252_v26, %v6253_v22  ;;  %v6257_v56 = vld [vmem:[#allocation2_spill] sm:$0xff]  ;;  %v6260_v27 = vld [vmem:[#allocation7_spill] sm:$0xff] }
 0x2bf   : > { %v1088_v55 = vpop.f32.mrf.mxu1  ;;  %2112 = vperm.xlu1 %4049, %v4956_v30   ;;  %2330 = vperm.xlu0 %4057, %v5034_v39   ;;  %v6258_v6 = vpack.c.bf16 %v6256_v0, %v6257_v56  ;;  %v6273_v0 = vld [vmem:[#allocation14_spill] sm:$0xff] }
 0x2c0   : > { %3801 = vmatprep.mubr.msk.bf16.mxu0 %vm1416_vm4, %v1607_v57  ;;  %3965 = vmatprep.subr.bf16.mxu0 %v5041_v2  ;;  %v1575_v12 = vmul.f32 %v1512_v23, %v1088_v55  ;;  %v6261_v57 = vpack.c.bf16 %v6259_v17, %v6260_v27  ;;  %v6262_v55 = vld [vmem:[#allocation13_spill] sm:$0xff]  ;;  %v6265_v23 = vld [vmem:[#allocation6_spill] sm:$0xff] }
 0x2c1   : > { %v1090_v47 = vpop.f32.mrf.mxu1  ;;  %1835 = vmatmul.mubr.bf16.gmra.mxu0 %v1606_v53  ;;  %v1486_v53 = vsel %vm1415_vm3, %v5105_v60, %v5130_v61  ;;  %v5317_v28 = vpop.permute.xlu1 %1249  ;;  %v1489_v61 = vsel %vm1415_vm3, %v5138_v24, %v5163_v41 }
 0x2c2   : > { %v1576_v1 = vmul.f32 %v1481_v59, %v1090_v47  ;;  %v5296_v20 = vpop.permute.xlu0 %1243  ;;  %v1525_v47 = vmul.f32 %v1487_v49, %v6262_v55  ;;  %v1523_v59 = vmul.f32 %v1486_v53, %v6263_v35  ;;  %v1529_v9 = vmul.f32 %v1489_v61, %v6268_v38  ;;  %v6278_v61 = vld [vmem:[#allocation23_spill] sm:$0xff]  ;;  %v6280_v38 = vld [vmem:[#allocation29_spill] sm:$0xff] }
 0x2c3   : > { %v1092_v43 = vpop.f32.mrf.mxu1  ;;  %2117 = vperm.xlu1 %4049, %v5263_v52   ;;  %2342 = vperm.xlu0 %4057, %v5054_v33   ;;  %v1458_v53 = vsel %vm1449_vm2, %v5286_v46, %v5251_v14 }
 0x2c4   : > { %v1577_v37 = vmul.f32 %v1513_v19, %v1092_v43  ;;  %v1608_v32 = vpack.c.bf16 %v1576_v1, %v1574_v45  ;;  %v1583_v50 = vpack.c.bf16 %v1525_v47, %v1523_v59  ;;  %v6266_v1 = vpack.c.bf16 %v6264_v13, %v6265_v23  ;;  %v6270_v45 = vld [vmem:[#allocation15_spill] sm:$0xff]  ;;  %v6277_v59 = vld [vmem:[#allocation18_spill] sm:$0xff] }
 0x2c5   : > { %v1346_v41 = vpop.permute.xlu1 %1345 }
 0x2c6   : > { %v1609_v40 = vpack.c.bf16 %v1577_v37, %v1575_v12  ;;  %v1340_v15 = vpop.permute.xlu0 %1339  ;;  %v6269_v12 = vld [vmem:[#allocation10_spill] sm:$0xff] }
 0x2c7   : > { %4050 = vset.pattern.permute.xlu1 %v6244_v18  ;;  %4060 = vset.pattern.permute.xlu0 %v6242_v58  ;;  %v1492_v47 = vsel %vm1415_vm3, %v5296_v20, %v1340_v15  ;;  %v1495_v15 = vsel %vm1415_vm3, %v5317_v28, %v1346_v41 }
 0x2c8   : > { %3802 = vmatprep.mubr.msk.bf16.mxu0 %vm1416_vm4, %v1609_v40  ;;  %2214 = vperm.xlu1 %4050, %v5014_v7  }
 0x2c9   : > { %1843 = vmatmul.mubr.bf16.gmra.mxu0 %v1608_v32  ;;  %2434 = vperm.xlu0 %4060, %v5136_v48   ;;  %v1457_v32 = vsel %vm1449_vm2, %v5183_v36, %v5138_v24  ;;  %v1154_v22 = vpop.permute.xlu1 %1153  ;;  %v6271_v24 = vld [vmem:[#allocation16_spill] sm:$0xff] }
 0x2ca   : > { %3815 = vmatprep.mubr.msk.bf16.mxu0 %vm1416_vm4, %v6254_v3  ;;  %v1148_v43 = vpop.permute.xlu0 %1147  ;;  %v4118_v3 = vld [vmem:[%s6175_s8 + $0x10] sm:$0xff]   ;;  %v1528_v36 = vmul.f32 %v1457_v32, %v6271_v24  ;;  %v6285_v24 = vld [vmem:[#allocation26_spill] sm:$0xff] }
 0x2cb   : > { %4014 = vmatprep.subr.bf16.mxu1 %v4118_v3  ;;  %v1460_v23 = vsel %vm1449_vm2, %v1148_v43, %v5296_v20 }
 0x2cc   : > { %2222 = vperm.xlu1 %4050, %v5263_v52   ;;  %4018 = vmatpush3.bf16.msra.mxu1 %v4118_v3 }
 0x2ce   : > { %v5347_v26 = vpop.permute.xlu0 %1247 }
 0x2d0   : > { %2226 = vperm.xlu1 %4050, %v5024_v5  }
 0x2d1   : > { %1980 = vmatmul.mubr.bf16.vlgmr.msra.gmra.mxu0 %v6258_v6  ;;  %v6274_v6 = vld [vmem:[#allocation19_spill] sm:$0xff] }
 0x2d2   : > { %3816 = vmatprep.mubr.msk.bf16.mxu0 %vm1416_vm4, %v6261_v57  ;;  %3966 = vmatpush3.bf16.msra.mxu0 %v5041_v2  ;;  %v1455_v2 = vsel %vm1449_vm2, %v5108_v63, %v6255_v21  ;;  %v1488_v63 = vsel %vm1415_vm3, %v5174_v16, %v5201_v34  ;;  %v1491_v34 = vsel %vm1415_vm3, %v5204_v42, %v5231_v29  ;;  %v6272_v21 = vld [vmem:[#allocation21_spill] sm:$0xff] }
 0x2d3   : > { %v1524_v19 = vmul.f32 %v1455_v2, %v6267_v25  ;;  %v1527_v40 = vmul.f32 %v1488_v63, %v6270_v45  ;;  %v1490_v29 = vsel %vm1415_vm3, %v5251_v14, %v5266_v8  ;;  %3967 = vmatprep.subr.bf16.mxu0 %v4118_v3  ;;  %v1533_v49 = vmul.f32 %v1491_v34, %v6272_v21 }
 0x2d4   : > { %4051 = vset.pattern.permute.xlu1 %v6245_v62  ;;  %v1459_v8 = vsel %vm1449_vm2, %v5256_v54, %v5204_v42  ;;  %v1493_v57 = vsel %vm1415_vm3, %v5271_v51, %v1342_v11  ;;  %v6276_v42 = vld [vmem:[#allocation25_spill] sm:$0xff]  ;;  %v443_v11 = vld [vmem:[%s4929_s15 + $0x70] sm:$0xff]  ;;  %v1535_v14 = vmul.f32 %v1492_v47, %v6278_v61  ;;  %v1463_v45 = vsel %vm1449_vm2, %v1154_v22, %v5317_v28  ;;  %v4120_v47 = vld [vmem:[%s6175_s8] sm:$0xff]  }
 0x2d5   : > { %2318 = vperm.xlu1 %4051, %v4956_v30   ;;  %v1454_v30 = vsel %vm1449_vm2, %v5157_v44, %v5105_v60  ;;  %v1585_v44 = vpack.c.bf16 %v1529_v9, %v1527_v40  ;;  %v1537_v54 = vmul.f32 %v1493_v57, %v6276_v42  ;;  %v6282_v9 = vld [vmem:[#allocation27_spill] sm:$0xff] }
 0x2d6   : > { %v1522_v37 = vmul.f32 %v1454_v30, %v6269_v12  ;;  %3968 = vmatpush3.bf16.msra.mxu0 %v4118_v3  ;;  %v6279_v30 = vld [vmem:[#allocation24_spill] sm:$0xff]  ;;  %v6284_v3 = vld [vmem:[#allocation39_spill] sm:$0xff] }
 0x2d7   : > { %v1589_v13 = vpack.c.bf16 %v1537_v54, %v1535_v14 }
 0x2d8   : > { %v1582_v60 = vpack.c.bf16 %v1524_v19, %v1522_v37 }
 0x2d9   : > { %1988 = vmatmul.mubr.bf16.gmra.mxu0 %v6266_v1  ;;  %2322 = vperm.xlu1 %4051, %v5263_v52  }
 0x2da   : > { %3817 = vmatprep.mubr.msk.bf16.mxu0 %vm1416_vm4, %v1583_v50  ;;  %v1530_v50 = vmul.f32 %v1458_v53, %v6277_v59 }
 0x2dd   : > { %4052 = vset.pattern.permute.xlu1 %v6242_v58 }
 0x2de   : > { %2414 = vperm.xlu1 %4052, %v5014_v7   ;;  %v1456_v7 = vsel %vm1449_vm2, %v5225_v10, %v5174_v16  ;;  %v1531_v16 = vmul.f32 %v1490_v29, %v6274_v6  ;;  %v1344_v10 = vpop.permute.xlu0 %1343 }
 0x2df   : > { %v1526_v56 = vmul.f32 %v1456_v7, %v6273_v0  ;;  %v1494_v19 = vsel %vm1415_vm3, %v5347_v26, %v1344_v10 }
 0x2e0   : > { %v1587_v27 = vpack.c.bf16 %v1533_v49, %v1531_v16  ;;  %v1539_v12 = vmul.f32 %v1494_v19, %v6282_v9  ;;  %v6287_v16 = vld [vmem:[#allocation36_spill] sm:$0xff] }
 0x2e1   : > { %1996 = vmatmul.mubr.bf16.gmra.mxu0 %v1582_v60  ;;  %v1584_v17 = vpack.c.bf16 %v1528_v36, %v1526_v56  ;;  %v6286_v36 = vld [vmem:[#allocation33_spill] sm:$0xff]  ;;  %v4119_v56 = vld [vmem:[%s6175_s8 + $0x8] sm:$0xff]  }
 0x2e2   : > { %3818 = vmatprep.mubr.msk.bf16.mxu0 %vm1416_vm4, %v1585_v44  ;;  %2422 = vperm.xlu1 %4052, %v5263_v52   ;;  %v1254_v52 = vpop.permute.xlu1 %1253  ;;  %v1152_v35 = vpop.permute.xlu0 %1151  ;;  %v6283_v44 = vld [vmem:[#allocation28_spill] sm:$0xff] }
 0x2e3   : > { %v1540_v32 = vmul.f32 %v1463_v45, %v6283_v44  ;;  %4015 = vmatprep.subr.bf16.mxu1 %v4119_v56  ;;  %3969 = vmatprep.subr.bf16.mxu0 %v4119_v56 }
 0x2e4   : > { %4019 = vmatpush3.bf16.msra.mxu1 %v4119_v56  ;;  %3970 = vmatpush3.bf16.msra.mxu0 %v4119_v56 }
 0x2e5   : > { %3971 = vmatprep.subr.bf16.mxu0 %v4120_v47  ;;  %4016 = vmatprep.subr.bf16.mxu1 %v4120_v47 }
 0x2e6   : > { %2426 = vperm.xlu1 %4052, %v5024_v5   ;;  %v6275_v5 = vld [vmem:[#allocation20_spill] sm:$0xff]  ;;  %v1350_v2 = vpop.permute.xlu1 %1349  ;;  %v1252_v1 = vpop.permute.xlu0 %1251 }
 0x2e7   : > { %v1532_v55 = vmul.f32 %v1459_v8, %v6275_v5  ;;  %v1497_v60 = vsel %vm1415_vm3, %v1254_v52, %v1350_v2 }
 0x2e8   : > { %v1545_v7 = vmul.f32 %v1497_v60, %v6284_v3  ;;  %3972 = vmatpush3.bf16.msra.mxu0 %v4120_v47  ;;  %4020 = vmatpush3.bf16.msra.mxu1 %v4120_v47 }
 0x2e9   : > { %2004 = vmatmul.mubr.bf16.gmra.mxu0 %v1584_v17  ;;  %v1586_v46 = vpack.c.bf16 %v1532_v55, %v1530_v50 }
 0x2ea   : > { %3819 = vmatprep.mubr.msk.bf16.mxu0 %vm1416_vm4, %v1587_v27  ;;  %4054 = vset.pattern.permute.xlu1 %v6230_v31  ;;  %v1461_v31 = vsel %vm1449_vm2, %v5298_v4, %v5271_v51  ;;  %v1158_v63 = vpop.permute.xlu1 %1157  ;;  %v1541_v51 = vmul.f32 %v1495_v15, %v6280_v38  ;;  %v6281_v4 = vld [vmem:[#allocation22_spill] sm:$0xff]  ;;  %v1348_v40 = vpop.permute.xlu0 %1347 }
 0x2eb   : > { %2132 = vperm.xlu1 %4054, %v5136_v48   ;;  %v1536_v25 = vmul.f32 %v1461_v31, %v6279_v30  ;;  %v1534_v41 = vmul.f32 %v1460_v23, %v6281_v4  ;;  %v1496_v34 = vsel %vm1415_vm3, %v1252_v1, %v1348_v40 }
 0x2ec   : > { %v1591_v37 = vpack.c.bf16 %v1541_v51, %v1539_v12  ;;  %v1543_v29 = vmul.f32 %v1496_v34, %v6286_v36  ;;  %v5491_v51 = vld [vmem:[%s6176_s9 + $0x18] sm:$0xff]  }
 0x2ed   : > { %v1588_v20 = vpack.c.bf16 %v1536_v25, %v1534_v41  ;;  %6290 = vst [vmem:[#allocation38_spill] sm:$0xff] %v5491_v51  ;;  %3989 = vmatprep.subr.bf16.mxu1 %v5491_v51 }
 0x2ee   : > { %v5402_v43 = vpop.permute.xlu1 %2072  ;;  %v1156_v21 = vpop.permute.xlu0 %1155  ;;  %v1593_v0 = vpack.c.bf16 %v1545_v7, %v1543_v29 }
 0x2ef   : > { %2137 = vperm.xlu1 %4054, %v443_v11   ;;  %v1464_v6 = vsel %vm1449_vm2, %v1156_v21, %v1252_v1 }
 0x2f1   : > { %2012 = vmatmul.mubr.bf16.gmra.mxu0 %v1586_v46 }
 0x2f2   : > { %3820 = vmatprep.mubr.msk.bf16.mxu0 %vm1416_vm4, %v1589_v13  ;;  %v5415_v22 = vpop.permute.xlu1 %2077  ;;  %v5456_v54 = vpop.permute.xlu0 %2386 }
 0x2f3   : > { %4056 = vset.pattern.permute.xlu1 %v6244_v18  ;;  %v1462_v18 = vsel %vm1449_vm2, %v1152_v35, %v5347_v26  ;;  %v1465_v26 = vsel %vm1449_vm2, %v1158_v63, %v1254_v52 }
 0x2f4   : > { %2230 = vperm.xlu1 %4056, %v5034_v39   ;;  %v1538_v28 = vmul.f32 %v1462_v18, %v6285_v24  ;;  %v1544_v10 = vmul.f32 %v1465_v26, %v6287_v16 }
 0x2f6   : > { %v1590_v49 = vpack.c.bf16 %v1540_v32, %v1538_v28  ;;  %v5427_v17 = vpop.permute.xlu1 %2182 }
 0x2f8   : > { %2238 = vperm.xlu1 %4056, %v443_v11  }
 0x2f9   : > { %2020 = vmatmul.mubr.bf16.gmra.mxu0 %v1588_v20 }
 0x2fa   : > { %3821 = vmatprep.mubr.msk.bf16.mxu0 %vm1416_vm4, %v1591_v37  ;;  %v5430_v27 = vpop.permute.xlu1 %2190 }
 0x2fc   : > { %2242 = vperm.xlu1 %4056, %v5054_v33  }
 0x2fe   : > { %v5434_v8 = vpop.permute.xlu1 %2194 }
 0x300   : > { %4058 = vset.pattern.permute.xlu1 %v6245_v62  ;;  %v6288_v62 = vld [vmem:[#allocation31_spill] sm:$0xff] }
 0x301   : > { %2028 = vmatmul.mubr.bf16.gmra.mxu0 %v1590_v49  ;;  %2334 = vperm.xlu1 %4058, %v5136_v48   ;;  %v1542_v52 = vmul.f32 %v1464_v6, %v6288_v62 }
 0x302   : > { %3822 = vmatprep.mubr.msk.bf16.mxu0 %vm1416_vm4, %v1593_v0  ;;  %v5437_v57 = vpop.permute.xlu1 %2286 }
 0x303   : > { %v1592_v48 = vpack.c.bf16 %v1544_v10, %v1542_v52 }
 0x305   : > { %2338 = vperm.xlu1 %4058, %v443_v11  }
 0x306   : > { %v5439_v53 = vpop.permute.xlu1 %2290 }
 0x309   : > { %2036 = vmatmul.mubr.bf16.gmra.mxu0 %v1592_v48  ;;  %4059 = vset.pattern.permute.xlu1 %v6242_v58 }
 0x30a   : > { %2430 = vperm.xlu1 %4059, %v5034_v39   ;;  %v5441_v5 = vpop.permute.xlu1 %2382 }
 0x30e   : > { %2438 = vperm.xlu1 %4059, %v443_v11   ;;  %v5443_v55 = vpop.permute.xlu1 %2390  ;;  %v5460_v11 = vpop.permute.xlu0 %2402 }
 0x312   : > { %2442 = vperm.xlu1 %4059, %v5054_v33   ;;  %v5448_v39 = vpop.permute.xlu1 %2394  ;;  %v5464_v50 = vpop.permute.xlu0 %2418 }
 0x313   : > { %6289 = vst [vmem:[#allocation32_spill] sm:$0xff] %v5464_v50 }
 0x316   : > { %v5450_v58 = vpop.permute.xlu1 %2092  ;;  %v5468_v61 = vpop.permute.xlu0 %2067 }
 0x31a   : > { %v5452_v33 = vpop.permute.xlu1 %2097  ;;  %v5474_v31 = vpop.permute.xlu0 %2082 }
 0x31e   : > { %v5454_v42 = vpop.permute.xlu1 %2198  ;;  %v5482_v25 = vpop.permute.xlu0 %2087 }
 0x322   : > { %v5458_v35 = vpop.permute.xlu1 %2206  ;;  %v5493_v41 = vpop.permute.xlu0 %2102 }
 0x326   : > { %v5462_v59 = vpop.permute.xlu1 %2210  ;;  %v5502_v45 = vpop.permute.xlu0 %2107 }
 0x32a   : > { %v5466_v2 = vpop.permute.xlu1 %2302  ;;  %v5508_v32 = vpop.permute.xlu0 %2122 }
 0x32b   : > { %6291 = vst [vmem:[#allocation34_spill] sm:$0xff] %v5508_v32 }
 0x32e   : > { %v5472_v46 = vpop.permute.xlu1 %2306  ;;  %v5516_v28 = vpop.permute.xlu0 %2127 }
 0x32f   : > { %6293 = vst [vmem:[#allocation35_spill] sm:$0xff] %v5516_v28 }
 0x332   : > { %v5478_v1 = vpop.permute.xlu1 %2398  ;;  %v5522_v0 = vpop.permute.xlu0 %2142 }
 0x333   : > { %6294 = vst [vmem:[#allocation37_spill] sm:$0xff] %v5522_v0 }
 0x336   : > { %v5486_v38 = vpop.permute.xlu1 %2406  ;;  %v2187_v16 = vpop.permute.xlu0 %2186 }
 0x33a   : > { %v5498_v20 = vpop.permute.xlu1 %2410  ;;  %v5534_v47 = vpop.permute.xlu0 %2202 }
 0x33e   : > { %v5504_v60 = vpop.permute.xlu1 %2112 }
 0x342   : > { %v5512_v3 = vpop.permute.xlu1 %2117 }
 0x343   : > { %6292 = vst [vmem:[#allocation30_spill] sm:$0xff] %v5512_v3 }
 0x346   : > { %v5518_v29 = vpop.permute.xlu1 %2214 }
 0x34a   : > { %v5526_v56 = vpop.permute.xlu1 %2222 }
 0x34b   : > { %6295 = vst [vmem:[#allocation5_spill] sm:$0xff] %v5526_v56 }
 0x34e   : > { %v5530_v52 = vpop.permute.xlu1 %2226 }
 0x34f   : > { %6297 = vst [vmem:[#allocation40_spill] sm:$0xff] %v5530_v52 }
 0x351   : > { %v5470_v14 = vpop.f32.mrf.mxu0 }
 0x353   : > { %v1790_v13 = vpop.f32.mrf.mxu0 }
 0x355   : > { %v5476_v15 = vpop.f32.mrf.mxu0 }
 0x357   : > { %v1793_v23 = vpop.f32.mrf.mxu0 }
 0x358   : > { %v5536_v23 = vpop.permute.xlu1 %2318 }
 0x359   : > { %v5480_v30 = vpop.f32.mrf.mxu0  ;;  %6299 = vst [vmem:[#allocation2_spill] sm:$0xff] %v5536_v23 }
 0x35b   : > { %v1798_v19 = vpop.f32.mrf.mxu0 }
 0x35d   : > { %v5484_v63 = vpop.f32.mrf.mxu0 }
 0x35f   : > { %v1801_v4 = vpop.f32.mrf.mxu0 }
 0x360   : > { %v2044_v4 = vlaneseq }
 0x361   : > { %v5496_v9 = vpop.f32.mrf.mxu0 }
 0x363   : > { %v1806_v12 = vpop.f32.mrf.mxu0 }
 0x365   : > { %v5500_v37 = vpop.f32.mrf.mxu0 }
 0x367   : > { %v1809_v40 = vpop.f32.mrf.mxu0 }
 0x368   : > { %v5540_v40 = vpop.permute.xlu0 %2218 }
 0x369   : > { %v5506_v18 = vpop.f32.mrf.mxu0 }
 0x36b   : > { %v1814_v44 = vpop.f32.mrf.mxu0 }
 0x36c   : > { %v5557_v0 = vpop.permute.xlu0 %2234 }
 0x36d   : > { %v5510_v34 = vpop.f32.mrf.mxu0  ;;  %6305 = vst [vmem:[#allocation6_spill] sm:$0xff] %v5557_v0 }
 0x36f   : > { %v1817_v7 = vpop.f32.mrf.mxu0 }
 0x370   : > { %v5544_v7 = vpop.permute.xlu1 %2322  ;;  %v2283_v32 = vpop.permute.xlu0 %2282 }
 0x371   : > { %v5514_v24 = vpop.f32.mrf.mxu0  ;;  %6302 = vst [vmem:[#allocation13_spill] sm:$0xff] %v5544_v7 }
 0x373   : > { %v1822_v36 = vpop.f32.mrf.mxu0 }
 0x374   : > { %v5546_v36 = vshrl.u32 %v2044_v4, 7 }
 0x375   : > { %v5520_v21 = vpop.f32.mrf.mxu0 }
 0x376   : > { %v2447_v7 = vsub.s32 3, %v5546_v36 }
 0x377   : > { %v1825_v49 = vpop.f32.mrf.mxu0 }
 0x379   : > { %v5524_v26 = vpop.f32.mrf.mxu0 }
 0x37b   : > { %v1830_v6 = vpop.f32.mrf.mxu0 }
 0x37d   : > { %v5528_v10 = vpop.f32.mrf.mxu0 }
 0x37e   : > { %6296 = vst [vmem:[#allocation3_spill] sm:$0xff] %v5528_v10 }
 0x37f   : > { %v1833_v62 = vpop.f32.mrf.mxu0 }
 0x380   : > { %v5553_v62 = vld [vmem:[%s6177_s10] sm:$0xff] }
 0x381   : > { %v5532_v48 = vpop.f32.mrf.mxu0  ;;  %6304 = vst [vmem:[#allocation8_spill] sm:$0xff] %v5553_v62 }
 0x382   : > { %6298 = vst [vmem:[#allocation4_spill] sm:$0xff] %v5532_v48 }
 0x383   : > { %v1838_v13 = vpop.f32.mrf.mxu0 }
 0x384   : > { %v2046_v13 = vsub.s32 0, %v5546_v36 }
 0x385   : > { %v5538_v19 = vpop.f32.mrf.mxu0 }
 0x386   : > { %6300 = vst [vmem:[#allocation9_spill] sm:$0xff] %v5538_v19  ;;  %v5562_v19 = vpop.permute.xlu1 %2414 }
 0x387   : > { %v1841_v12 = vpop.f32.mrf.mxu0  ;;  %6306 = vst [vmem:[#allocation12_spill] sm:$0xff] %v5562_v19 }
 0x388   : > { %v6201_v12 = vsub.s32 1, %v5546_v36 }
 0x389   : > { %v5542_v44 = vpop.f32.mrf.mxu0 }
 0x38a   : > { %6301 = vst [vmem:[#allocation7_spill] sm:$0xff] %v5542_v44  ;;  %v2064_v44 = vld [vmem:[%s6174_s7] sm:$0xf]  ;;  %v5583_v56 = vpop.permute.xlu1 %2422 }
 0x38b   : > { %v1846_v49 = vpop.f32.mrf.mxu0  ;;  %v5568_v48 = vrot.slane %v2064_v44, %v2046_v13  ;;  %v5572_v52 = vrot.slane %v2064_v44, %v6201_v12  ;;  %6307 = vst [vmem:[#allocation17_spill] sm:$0xff] %v5583_v56 }
 0x38c   : > { %v6202_v49 = vsub.s32 2, %v5546_v36 }
 0x38d   : > { %v5548_v6 = vpop.f32.mrf.mxu0  ;;  %v2249_v12 = vmul.f32 %v5572_v52, %v5427_v17  ;;  %v2250_v19 = vmul.f32 %v5572_v52, %v2187_v16 }
 0x38e   : > { %6303 = vst [vmem:[#allocation11_spill] sm:$0xff] %v5548_v6  ;;  %v5566_v6 = vrot.slane %v5553_v62, %v2046_v13  ;;  %v2149_v62 = vmul.f32 %v5568_v48, %v5468_v61  ;;  %v2150_v61 = vmul.f32 %v5568_v48, %v5402_v43 }
 0x38f   : > { %v1849_v4 = vpop.f32.mrf.mxu0 }
 0x390   : > { %v5578_v4 = vrot.slane %v2064_v44, %v6202_v49  ;;  %v5591_v49 = vrot.slane %v2064_v44, %v2447_v7  ;;  %v5600_v44 = vpop.permute.xlu1 %2426 }
 0x391   : > { %v1981_v28 = vpop.f32.mrf.mxu0 }
 0x392   : > { %v1982_v0 = vadd.f32 %v1981_v28, %v5470_v14  ;;  %v2349_v14 = vmul.f32 %v5578_v4, %v2283_v32  ;;  %v2350_v43 = vmul.f32 %v5578_v4, %v5437_v57  ;;  %v2450_v16 = vmul.f32 %v5591_v49, %v5456_v54 }
 0x393   : > { %v1983_v51 = vpop.f32.mrf.mxu0 }
 0x394   : > { %v2048_v13 = vadd.f32 %v5566_v6, %v1982_v0  ;;  %v5614_v57 = vpop.permute.xlu1 %2132 }
 0x395   : > { %v1984_v10 = vpop.f32.mrf.mxu0 }
 0x396   : > { %v2165_v28 = vadd.f32 %v2149_v62, %v2048_v13  ;;  %v1985_v51 = vadd.f32 %v1984_v10, %v5476_v15  ;;  %v2449_v15 = vmul.f32 %v5591_v49, %v5441_v5  ;;  %v2251_v5 = vmul.f32 %v5572_v52, %v5430_v27 }
 0x397   : > { %v1986_v50 = vpop.f32.mrf.mxu0  ;;  %v2252_v27 = vmul.f32 %v5572_v52, %v5434_v8 }
 0x398   : > { %v2265_v0 = vadd.f32 %v2249_v12, %v2165_v28  ;;  %v2049_v23 = vadd.f32 %v5566_v6, %v1985_v51  ;;  %v2151_v50 = vmul.f32 %v5568_v48, %v5415_v22  ;;  %v2152_v22 = vmul.f32 %v5568_v48, %v5474_v31 }
 0x399   : > { %v1989_v56 = vpop.f32.mrf.mxu0 }
 0x39a   : > { %v2365_v17 = vadd.f32 %v2349_v14, %v2265_v0  ;;  %v2166_v3 = vadd.f32 %v2150_v61, %v2049_v23  ;;  %v1990_v32 = vadd.f32 %v1989_v56, %v5480_v30 }
 0x39b   : > { %v1991_v10 = vpop.f32.mrf.mxu0 }
 0x39c   : > { %v2266_v62 = vadd.f32 %v2250_v19, %v2166_v3  ;;  %v2050_v12 = vadd.f32 %v5566_v6, %v1990_v32  ;;  %v2465_v30 = vadd.f32 %v2449_v15, %v2365_v17  ;;  %v2351_v3 = vmul.f32 %v5578_v4, %v5439_v53  ;;  %v2295_v19 = vpop.permute.xlu0 %2294 }
 0x39d   : > { %v1992_v23 = vpop.f32.mrf.mxu0  ;;  %v2451_v10 = vmul.f32 %v5591_v49, %v5443_v55  ;;  %v2153_v53 = vmul.f32 %v5568_v48, %v5482_v25  ;;  %v2253_v55 = vmul.f32 %v5572_v52, %v5454_v42  ;;  %v2254_v42 = vmul.f32 %v5572_v52, %v5534_v47 }
 0x39e   : > { %v2366_v56 = vadd.f32 %v2350_v43, %v2266_v62  ;;  %v2167_v13 = vadd.f32 %v2151_v50, %v2050_v12  ;;  %v1993_v14 = vadd.f32 %v1992_v23, %v5484_v63  ;;  %v2481_v17 = vmax.f32 %v2465_v30, 0.0 }
 0x39f   : > { %v1994_v28 = vpop.f32.mrf.mxu0  ;;  %v2352_v43 = vmul.f32 %v5578_v4, %v2295_v19 }
 0x3a0   : > { %v2267_v54 = vadd.f32 %v2251_v5, %v2167_v13  ;;  %v2051_v51 = vadd.f32 %v5566_v6, %v1993_v14  ;;  %v2466_v61 = vadd.f32 %v2450_v16, %v2366_v56  ;;  %v2452_v16 = vmul.f32 %v5591_v49, %v5448_v39  ;;  %v2299_v5 = vpop.permute.xlu0 %2298 }
 0x3a1   : > { %v1997_v0 = vpop.f32.mrf.mxu0  ;;  %v2154_v14 = vmul.f32 %v5568_v48, %v5450_v58  ;;  %v2353_v39 = vmul.f32 %v5578_v4, %v2299_v5  ;;  %v2155_v58 = vmul.f32 %v5568_v48, %v5452_v33  ;;  %v2255_v33 = vmul.f32 %v5572_v52, %v5458_v35 }
 0x3a2   : > { %v2367_v63 = vadd.f32 %v2351_v3, %v2267_v54  ;;  %v2168_v32 = vadd.f32 %v2152_v22, %v2051_v51  ;;  %v1998_v31 = vadd.f32 %v1997_v0, %v5496_v9  ;;  %v2482_v15 = vmax.f32 %v2466_v61, 0.0  ;;  %v5630_v9 = vpop.permute.xlu1 %2137 }
 0x3a3   : > { %v1999_v50 = vpop.f32.mrf.mxu0  ;;  %v2256_v35 = vmul.f32 %v5572_v52, %v5462_v59 }
 0x3a4   : > { %v2268_v62 = vadd.f32 %v2252_v27, %v2168_v32  ;;  %v2052_v12 = vadd.f32 %v5566_v6, %v1998_v31  ;;  %v2497_v8 = vpack.c.bf16 %v2482_v15, %v2481_v17  ;;  %v2467_v23 = vadd.f32 %v2451_v10, %v2367_v63  ;;  %v2311_v47 = vpop.permute.xlu0 %2310 }
 0x3a5   : > { %v2000_v30 = vpop.f32.mrf.mxu0  ;;  %v2453_v17 = vmul.f32 %v5591_v49, %v5478_v1  ;;  %v2354_v31 = vmul.f32 %v5578_v4, %v5466_v2  ;;  %v2156_v2 = vmul.f32 %v5568_v48, %v5493_v41 }
 0x3a6   : > { %v2368_v56 = vadd.f32 %v2352_v43, %v2268_v62  ;;  %v2169_v25 = vadd.f32 %v2153_v53, %v2052_v12  ;;  %v2001_v13 = vadd.f32 %v2000_v30, %v5500_v37  ;;  %3973 = vmatprep.mubr.msk.bf16.mxu0 %vm1416_vm4, %v2497_v8  ;;  %v2483_v54 = vmax.f32 %v2467_v23, 0.0  ;;  %v5647_v32 = vpop.permute.xlu1 %2230 }
 0x3a7   : > { %v2002_v22 = vpop.f32.mrf.mxu0 }
 0x3a8   : > { %v2468_v28 = vadd.f32 %v2452_v16, %v2368_v56  ;;  %v2269_v3 = vadd.f32 %v2253_v55, %v2169_v25  ;;  %v2053_v19 = vadd.f32 %v5566_v6, %v2001_v13  ;;  %v2355_v16 = vmul.f32 %v5578_v4, %v5472_v46  ;;  %v2315_v56 = vpop.permute.xlu0 %2314 }
 0x3a9   : > { %v2005_v51 = vpop.f32.mrf.mxu0  ;;  %v2157_v46 = vmul.f32 %v5568_v48, %v5502_v45  ;;  %v2455_v22 = vmul.f32 %v5591_v49, %v5486_v38  ;;  %v2357_v38 = vmul.f32 %v5578_v4, %v2315_v56 }
 0x3aa   : > { %v2484_v61 = vmax.f32 %v2468_v28, 0.0  ;;  %v2369_v27 = vadd.f32 %v2353_v39, %v2269_v3  ;;  %v2170_v37 = vadd.f32 %v2154_v14, %v2053_v19  ;;  %v2006_v0 = vadd.f32 %v2005_v51, %v5506_v18  ;;  %v5665_v5 = vpop.permute.xlu1 %2238 }
 0x3ab   : > { %v2007_v63 = vpop.f32.mrf.mxu0  ;;  %v2454_v18 = vmul.f32 %v5591_v49, %v5460_v11  ;;  %v2356_v28 = vmul.f32 %v5578_v4, %v2311_v47 }
 0x3ac   : > { %v2498_v15 = vpack.c.bf16 %v2484_v61, %v2483_v54  ;;  %v2270_v10 = vadd.f32 %v2254_v42, %v2170_v37  ;;  %v2054_v53 = vadd.f32 %v5566_v6, %v2006_v0  ;;  %v2469_v43 = vadd.f32 %v2453_v17, %v2369_v27 }
 0x3ad   : > { %v2008_v50 = vpop.f32.mrf.mxu0  ;;  %v2456_v42 = vmul.f32 %v5591_v49, %v5498_v20  ;;  %v2327_v20 = vpop.permute.xlu0 %2326 }
 0x3ae   : > { %v2370_v1 = vadd.f32 %v2354_v31, %v2270_v10  ;;  %v2171_v62 = vadd.f32 %v2155_v58, %v2054_v53  ;;  %v2009_v12 = vadd.f32 %v2008_v50, %v5510_v34  ;;  %3974 = vmatmul.mubr.msk.bf16.vlgmr.msra.gmra.mxu0 %vm1416_vm4, %v2498_v15  ;;  %v2485_v34 = vmax.f32 %v2469_v43, 0.0  ;;  %v5681_v37 = vpop.permute.xlu1 %2242  ;;  %v6308_v50 = vld [vmem:[#allocation30_spill] sm:$0xff] }
 0x3af   : > { %v2010_v8 = vpop.f32.mrf.mxu0  ;;  %v2158_v58 = vmul.f32 %v5568_v48, %v5504_v60  ;;  %v2159_v43 = vmul.f32 %v5568_v48, %v6308_v50 }
 0x3b0   : > { %v2271_v23 = vadd.f32 %v2255_v33, %v2171_v62  ;;  %v2055_v11 = vadd.f32 %v5566_v6, %v2009_v12  ;;  %v2470_v30 = vadd.f32 %v2454_v18, %v2370_v1  ;;  %v6309_v33 = vld [vmem:[#allocation12_spill] sm:$0xff]  ;;  %v6310_v12 = vld [vmem:[#allocation2_spill] sm:$0xff] }
 0x3b1   : > { %v2013_v55 = vpop.f32.mrf.mxu0  ;;  %v2457_v60 = vmul.f32 %v5591_v49, %v6309_v33  ;;  %v2331_v56 = vpop.permute.xlu0 %2330  ;;  %v2460_v33 = vmul.f32 %v5591_v49, %v5600_v44 }
 0x3b2   : > { %v2371_v25 = vadd.f32 %v2355_v16, %v2271_v23  ;;  %v2172_v13 = vadd.f32 %v2156_v2, %v2055_v11  ;;  %v2014_v41 = vadd.f32 %v2013_v55, %v5514_v24  ;;  %v2486_v14 = vmax.f32 %v2470_v30, 0.0  ;;  %v5693_v62 = vpop.permute.xlu1 %2334  ;;  %v6311_v23 = vld [vmem:[#allocation32_spill] sm:$0xff]  ;;  %v6312_v55 = vld [vmem:[#allocation5_spill] sm:$0xff] }
 0x3b3   : > { %v2015_v39 = vpop.f32.mrf.mxu0  ;;  %v2257_v24 = vmul.f32 %v5572_v52, %v5518_v29  ;;  %v2258_v29 = vmul.f32 %v5572_v52, %v5540_v40  ;;  %v2358_v2 = vmul.f32 %v5578_v4, %v6310_v12  ;;  %v2458_v11 = vmul.f32 %v5591_v49, %v6311_v23 }
 0x3b4   : > { %v2272_v59 = vadd.f32 %v2256_v35, %v2172_v13  ;;  %v2056_v3 = vadd.f32 %v5566_v6, %v2014_v41  ;;  %v2499_v19 = vpack.c.bf16 %v2486_v14, %v2485_v34  ;;  %v2471_v54 = vadd.f32 %v2455_v22, %v2371_v25  ;;  %v6313_v41 = vld [vmem:[#allocation3_spill] sm:$0xff] }
 0x3b5   : > { %v2016_v51 = vpop.f32.mrf.mxu0  ;;  %v2259_v34 = vmul.f32 %v5572_v52, %v6312_v55  ;;  %v2261_v12 = vmul.f32 %v5572_v52, %v5647_v32 }
 0x3b6   : > { %v2372_v61 = vadd.f32 %v2356_v28, %v2272_v59  ;;  %v2173_v45 = vadd.f32 %v2157_v46, %v2056_v3  ;;  %v2017_v27 = vadd.f32 %v2016_v51, %v5520_v21  ;;  %3977 = vmatprep.mubr.msk.bf16.mxu1 %vm1416_vm4, %v2499_v19  ;;  %v2487_v47 = vmax.f32 %v2471_v54, 0.0  ;;  %v6314_v46 = vld [vmem:[#allocation34_spill] sm:$0xff]  ;;  %v6316_v59 = vld [vmem:[#allocation13_spill] sm:$0xff]  ;;  %v6317_v51 = vld [vmem:[#allocation40_spill] sm:$0xff] }
 0x3b7   : > { %v2018_v0 = vpop.f32.mrf.mxu0  ;;  %v2160_v22 = vmul.f32 %v5568_v48, %v6314_v46  ;;  %v6315_v28 = vld [vmem:[#allocation38_spill] sm:$0xff]  ;;  %v2359_v3 = vmul.f32 %v5578_v4, %v6316_v59 }
 0x3b8   : > { %v2472_v17 = vadd.f32 %v2456_v42, %v2372_v61  ;;  %v2273_v63 = vadd.f32 %v2257_v24, %v2173_v45  ;;  %v2057_v31 = vadd.f32 %v5566_v6, %v2017_v27  ;;  %v2260_v24 = vmul.f32 %v5572_v52, %v6317_v51  ;;  %v2339_v61 = vpop.permute.xlu1 %2338 }
 0x3b9   : > { %v2021_v21 = vpop.f32.mrf.mxu0  ;;  %v2263_v51 = vmul.f32 %v5572_v52, %v5665_v5  ;;  %v2264_v5 = vmul.f32 %v5572_v52, %v5681_v37 }
 0x3ba   : > { %v2488_v15 = vmax.f32 %v2472_v17, 0.0  ;;  %v2373_v10 = vadd.f32 %v2357_v38, %v2273_v63  ;;  %v2174_v53 = vadd.f32 %v2158_v58, %v2057_v31  ;;  %v2022_v18 = vadd.f32 %v2021_v21, %v5524_v26  ;;  %v4122_v26 = vld [vmem:[%s6176_s9 + $0x10] sm:$0xff]   ;;  %v6319_v31 = vld [vmem:[#allocation35_spill] sm:$0xff] }
 0x3bb   : > { %v2023_v1 = vpop.f32.mrf.mxu0  ;;  %v6318_v58 = vld [vmem:[#allocation4_spill] sm:$0xff] }
 0x3bc   : > { %v2500_v40 = vpack.c.bf16 %v2488_v15, %v2487_v47  ;;  %v2274_v8 = vadd.f32 %v2258_v29, %v2174_v53  ;;  %v2058_v16 = vadd.f32 %v5566_v6, %v2022_v18  ;;  %v2473_v35 = vadd.f32 %v2457_v60, %v2373_v10  ;;  %v6320_v47 = vld [vmem:[#allocation17_spill] sm:$0xff]  ;;  %v2343_v53 = vpop.permute.xlu0 %2342 }
 0x3bd   : > { %v2024_v30 = vpop.f32.mrf.mxu0  ;;  %v2161_v29 = vmul.f32 %v5568_v48, %v6319_v31  ;;  %v2459_v21 = vmul.f32 %v5591_v49, %v6320_v47  ;;  %v2360_v10 = vmul.f32 %v5578_v4, %v2327_v20  ;;  %v2361_v20 = vmul.f32 %v5578_v4, %v2331_v56  ;;  %v6323_v56 = vld [vmem:[#allocation7_spill] sm:$0xff] }
 0x3be   : > { %v2374_v25 = vadd.f32 %v2358_v2, %v2274_v8  ;;  %v2175_v13 = vadd.f32 %v2159_v43, %v2058_v16  ;;  %v2025_v14 = vadd.f32 %v2024_v30, %v6313_v41  ;;  %3978 = vmatmul.mubr.msk.bf16.vlgmr.msra.gmra.mxu1 %vm1416_vm4, %v2500_v40  ;;  %v2489_v27 = vmax.f32 %v2473_v35, 0.0  ;;  %v6321_v8 = vld [vmem:[#allocation9_spill] sm:$0xff] }
 0x3bf   : > { %v2026_v39 = vpop.f32.mrf.mxu0  ;;  %3990 = vmatpush3.bf16.msra.mxu1 %v6315_v28  ;;  %v2363_v31 = vmul.f32 %v5578_v4, %v2339_v61 }
 0x3c0   : > { %v2275_v19 = vadd.f32 %v2259_v34, %v2175_v13  ;;  %v2059_v42 = vadd.f32 %v5566_v6, %v2025_v14  ;;  %v2474_v54 = vadd.f32 %v2458_v11, %v2374_v25  ;;  %3991 = vmatprep.subr.bf16.mxu1 %v4122_v26  ;;  %v2162_v11 = vmul.f32 %v5568_v48, %v5614_v57  ;;  %v2435_v35 = vpop.permute.xlu0 %2434  ;;  %v6322_v34 = vld [vmem:[#allocation6_spill] sm:$0xff] }
 0x3c1   : > { %v2029_v45 = vpop.f32.mrf.mxu0  ;;  %v2262_v32 = vmul.f32 %v5572_v52, %v6322_v34  ;;  %v2163_v57 = vmul.f32 %v5568_v48, %v5630_v9  ;;  %v2462_v59 = vmul.f32 %v5591_v49, %v2435_v35 }
 0x3c2   : > { %v2375_v38 = vadd.f32 %v2359_v3, %v2275_v19  ;;  %v2176_v0 = vadd.f32 %v2160_v22, %v2059_v42  ;;  %v2030_v17 = vadd.f32 %v2029_v45, %v6318_v58  ;;  %v2490_v63 = vmax.f32 %v2474_v54, 0.0  ;;  %v6324_v58 = vld [vmem:[#allocation11_spill] sm:$0xff] }
 0x3c3   : > { %v2031_v15 = vpop.f32.mrf.mxu0  ;;  %3992 = vmatpush3.bf16.msra.mxu1 %v4122_v26  ;;  %v2431_v26 = vpop.permute.xlu1 %2430  ;;  %v2362_v3 = vmul.f32 %v5578_v4, %v5693_v62 }
 0x3c4   : > { %v2276_v18 = vadd.f32 %v2260_v24, %v2176_v0  ;;  %v2060_v50 = vadd.f32 %v5566_v6, %v2030_v17  ;;  %v2501_v43 = vpack.c.bf16 %v2490_v63, %v2489_v27  ;;  %v2475_v1 = vadd.f32 %v2459_v21, %v2375_v38  ;;  %v6325_v17 = vld [vmem:[#allocation37_spill] sm:$0xff] }
 0x3c5   : > { %v2032_v60 = vpop.f32.mrf.mxu0  ;;  %v2461_v25 = vmul.f32 %v5591_v49, %v2431_v26  ;;  %v2164_v63 = vmul.f32 %v5568_v48, %v6325_v17 }
 0x3c6   : > { %v2376_v2 = vadd.f32 %v2360_v10, %v2276_v18  ;;  %v2177_v40 = vadd.f32 %v2161_v29, %v2060_v50  ;;  %v2033_v16 = vadd.f32 %v2032_v60, %v6321_v8  ;;  %3981 = vmatprep.mubr.msk.bf16.mxu1 %vm1416_vm4, %v2501_v43  ;;  %v2491_v41 = vmax.f32 %v2475_v1, 0.0 }
 0x3c7   : > { %v2034_v23 = vpop.f32.mrf.mxu0  ;;  %v2439_v24 = vpop.permute.xlu1 %2438  ;;  %v6326_v8 = vsub.s32 1, %v5546_v36 }
 0x3c8   : > { %v2277_v30 = vadd.f32 %v2261_v12, %v2177_v40  ;;  %v2061_v44 = vadd.f32 %v5566_v6, %v2033_v16  ;;  %v2476_v55 = vadd.f32 %v2460_v33, %v2376_v2  ;;  %v2364_v33 = vmul.f32 %v5578_v4, %v2343_v53  ;;  %v4123_v4 = vld [vmem:[%s6176_s9 + $0x8] sm:$0xff]   ;;  %v6327_v16 = vld [vmem:[#allocation8_spill] sm:$0xff] }
 0x3c9   : > { %v2037_v13 = vpop.f32.mrf.mxu0  ;;  %v2463_v60 = vmul.f32 %v5591_v49, %v2439_v24  ;;  %3993 = vmatprep.subr.bf16.mxu1 %v4123_v4 }
 0x3ca   : > { %v2377_v14 = vadd.f32 %v2361_v20, %v2277_v30  ;;  %v2178_v46 = vadd.f32 %v2162_v11, %v2061_v44  ;;  %v2038_v22 = vadd.f32 %v2037_v13, %v6323_v56  ;;  %v2492_v39 = vmax.f32 %v2476_v55, 0.0  ;;  %3994 = vmatpush3.bf16.msra.mxu1 %v4123_v4 }
 0x3cb   : > { %v2039_v28 = vpop.f32.mrf.mxu0  ;;  %v2443_v43 = vpop.permute.xlu1 %2442  ;;  %v2516_v20 = vrot.slane %v6327_v16, %v6326_v8  ;;  %v5783_v8 = vrot.slane %v6327_v16, %v2447_v7 }
 0x3cc   : > { %v2062_v19 = vadd.f32 %v5566_v6, %v2038_v22  ;;  %v2278_v42 = vadd.f32 %v2262_v32, %v2178_v46  ;;  %v2502_v54 = vpack.c.bf16 %v2492_v39, %v2491_v41  ;;  %v2477_v27 = vadd.f32 %v2461_v25, %v2377_v14 }
 0x3cd   : > { %v2040_v45 = vpop.f32.mrf.mxu0  ;;  %v2464_v61 = vmul.f32 %v5591_v49, %v2443_v43  ;;  %v4124_v49 = vld [vmem:[%s6176_s9] sm:$0xff]  }
 0x3ce   : > { %v2179_v38 = vadd.f32 %v2163_v57, %v2062_v19  ;;  %v2378_v0 = vadd.f32 %v2362_v3, %v2278_v42  ;;  %v2041_v9 = vadd.f32 %v2040_v45, %v6324_v58  ;;  %3982 = vmatmul.mubr.msk.bf16.gmra.mxu1 %vm1416_vm4, %v2502_v54  ;;  %v2493_v15 = vmax.f32 %v2477_v27, 0.0  ;;  %3995 = vmatprep.subr.bf16.mxu1 %v4124_v49 }
 0x3cf   : > { %v2042_v62 = vpop.f32.mrf.mxu0  ;;  %3996 = vmatpush3.bf16.msra.mxu1 %v4124_v49 }
 0x3d0   : > { %v2279_v29 = vadd.f32 %v2263_v51, %v2179_v38  ;;  %v2478_v47 = vadd.f32 %v2462_v59, %v2378_v0  ;;  %v2063_v21 = vadd.f32 %v5566_v6, %v2041_v9 }
 0x3d2   : > { %v2379_v10 = vadd.f32 %v2363_v31, %v2279_v29  ;;  %v2494_v18 = vmax.f32 %v2478_v47, 0.0  ;;  %v2180_v50 = vadd.f32 %v2164_v63, %v2063_v21 }
 0x3d4   : > { %v2503_v48 = vpack.c.bf16 %v2494_v18, %v2493_v15  ;;  %v2280_v1 = vadd.f32 %v2264_v5, %v2180_v50  ;;  %v2479_v6 = vadd.f32 %v2463_v60, %v2379_v10 }
 0x3d6   : > { %v2380_v12 = vadd.f32 %v2364_v33, %v2280_v1  ;;  %3985 = vmatprep.mubr.msk.bf16.mxu1 %vm1416_vm4, %v2503_v48  ;;  %v2495_v40 = vmax.f32 %v2479_v6, 0.0 }
 0x3d8   : > { %v2480_v2 = vadd.f32 %v2464_v61, %v2380_v12 }
 0x3da   : > { %v2496_v52 = vmax.f32 %v2480_v2, 0.0 }
 0x3dc   : > { %v2504_v37 = vpack.c.bf16 %v2496_v52, %v2495_v40 }
 0x3de   : > { %3986 = vmatmul.mubr.msk.bf16.gmra.mxu1 %vm1416_vm4, %v2504_v37  ;;  %v6328_v37 = vsub.s32 2, %v5546_v36 }
 0x3e0   : > { %v5777_v4 = vrot.slane %v6327_v16, %v6328_v37 }
 0x46e   : > { %v3975_v53 = vpop.f32.mrf.mxu0 }
 0x46f   : > { %v2608_v44 = vadd.f32 %v3975_v53, %v2516_v20 }
 0x470   : > { %v2599_v26 = vpop.f32.mrf.mxu0 }
 0x471   : > { %v2600_v11 = vadd.f32 %v2599_v26, %v2516_v20  ;;  %v2664_v13 = vmax.f32 %v2608_v44, 0.0 }
 0x472   : > { %v3976_v23 = vpop.f32.mrf.mxu0 }
 0x473   : > { %v2611_v30 = vadd.f32 %v3976_v23, %v2516_v20  ;;  %v2662_v32 = vmax.f32 %v2600_v11, 0.0 }
 0x474   : > { %v2602_v35 = vpop.f32.mrf.mxu0 }
 0x475   : > { %v2603_v55 = vadd.f32 %v2602_v35, %v2516_v20  ;;  %v2665_v34 = vmax.f32 %v2611_v30, 0.0 }
 0x477   : > { %v2663_v25 = vmax.f32 %v2603_v55, 0.0  ;;  %v2679_v14 = vpack.c.bf16 %v2665_v34, %v2664_v13 }
 0x479   : > { %v2678_v41 = vpack.c.bf16 %v2663_v25, %v2662_v32 }
 0x47b   : > { %3997 = vmatprep.mubr.msk.bf16.mxu1 %vm1416_vm4, %v2678_v41 }
 0x47c   : > { %3998 = vmatmul.mubr.msk.bf16.vlgmr.msra.gmra.mxu1 %vm1416_vm4, %v2679_v14 }
 0x47e   : > { %v3979_v46 = vpop.f32.mrf.mxu1 }
 0x47f   : > { %v2624_v28 = vadd.f32 %v3979_v46, %v2516_v20 }
 0x480   : > { %v2615_v56 = vpop.f32.mrf.mxu1 }
 0x481   : > { %v2616_v39 = vadd.f32 %v2615_v56, %v2516_v20  ;;  %v2668_v51 = vmax.f32 %v2624_v28, 0.0 }
 0x482   : > { %v3980_v22 = vpop.f32.mrf.mxu1 }
 0x483   : > { %v2627_v57 = vadd.f32 %v3980_v22, %v2516_v20  ;;  %v2666_v42 = vmax.f32 %v2616_v39, 0.0 }
 0x484   : > { %v2618_v59 = vpop.f32.mrf.mxu1 }
 0x485   : > { %v2619_v3 = vadd.f32 %v2618_v59, %v2516_v20  ;;  %v2669_v19 = vmax.f32 %v2627_v57, 0.0 }
 0x487   : > { %v2667_v54 = vmax.f32 %v2619_v3, 0.0  ;;  %v2681_v45 = vpack.c.bf16 %v2669_v19, %v2668_v51 }
 0x489   : > { %v2680_v24 = vpack.c.bf16 %v2667_v54, %v2666_v42 }
 0x48b   : > { %4001 = vmatprep.mubr.msk.bf16.mxu1 %vm1416_vm4, %v2680_v24 }
 0x48c   : > { %4002 = vmatmul.mubr.msk.bf16.gmra.mxu1 %vm1416_vm4, %v2681_v45 }
 0x48e   : > { %v3983_v27 = vpop.f32.mrf.mxu1 }
 0x48f   : > { %v2640_v17 = vadd.f32 %v3983_v27, %v2516_v20 }
 0x490   : > { %v2631_v38 = vpop.f32.mrf.mxu1 }
 0x491   : > { %v2632_v58 = vadd.f32 %v2631_v38, %v2516_v20  ;;  %v2672_v21 = vmax.f32 %v2640_v17, 0.0 }
 0x492   : > { %v3984_v0 = vpop.f32.mrf.mxu1 }
 0x493   : > { %v2643_v9 = vadd.f32 %v3984_v0, %v2516_v20  ;;  %v2670_v29 = vmax.f32 %v2632_v58, 0.0 }
 0x494   : > { %v2634_v63 = vpop.f32.mrf.mxu1 }
 0x495   : > { %v2635_v62 = vadd.f32 %v2634_v63, %v2516_v20  ;;  %v2673_v31 = vmax.f32 %v2643_v9, 0.0 }
 0x497   : > { %v2671_v47 = vmax.f32 %v2635_v62, 0.0  ;;  %v2683_v15 = vpack.c.bf16 %v2673_v31, %v2672_v21 }
 0x499   : > { %v2682_v5 = vpack.c.bf16 %v2671_v47, %v2670_v29 }
 0x49b   : > { %4005 = vmatprep.mubr.msk.bf16.mxu1 %vm1416_vm4, %v2682_v5 }
 0x49c   : > { %4006 = vmatmul.mubr.msk.bf16.gmra.mxu1 %vm1416_vm4, %v2683_v15 }
 0x49e   : > { %v3987_v10 = vpop.f32.mrf.mxu1 }
 0x49f   : > { %v2656_v60 = vadd.f32 %v3987_v10, %v2516_v20 }
 0x4a0   : > { %v2647_v18 = vpop.f32.mrf.mxu1 }
 0x4a1   : > { %v2648_v43 = vadd.f32 %v2647_v18, %v2516_v20  ;;  %v2676_v2 = vmax.f32 %v2656_v60, 0.0 }
 0x4a2   : > { %v3988_v50 = vpop.f32.mrf.mxu1 }
 0x4a3   : > { %v2659_v33 = vadd.f32 %v3988_v50, %v2516_v20  ;;  %v2674_v12 = vmax.f32 %v2648_v43, 0.0 }
 0x4a4   : > { %v2650_v48 = vpop.f32.mrf.mxu1 }
 0x4a5   : > { %v2651_v1 = vadd.f32 %v2650_v48, %v2516_v20  ;;  %v2677_v61 = vmax.f32 %v2659_v33, 0.0 }
 0x4a7   : > { %v2675_v6 = vmax.f32 %v2651_v1, 0.0  ;;  %v2685_v52 = vpack.c.bf16 %v2677_v61, %v2676_v2 }
 0x4a9   : > { %v2684_v40 = vpack.c.bf16 %v2675_v6, %v2674_v12 }
 0x4ab   : > { %4009 = vmatprep.mubr.msk.bf16.mxu1 %vm1416_vm4, %v2684_v40 }
 0x4ac   : > { %4010 = vmatmul.mubr.msk.bf16.gmra.mxu1 %vm1416_vm4, %v2685_v52 }
 0x53c   : > { %v3999_v49 = vpop.f32.mrf.mxu1 }
 0x53d   : > { %v2789_v53 = vadd.f32 %v3999_v49, %v5777_v4 }
 0x53e   : > { %v2780_v20 = vpop.f32.mrf.mxu1 }
 0x53f   : > { %v2845_v26 = vmax.f32 %v2789_v53, 0.0  ;;  %v2781_v23 = vadd.f32 %v2780_v20, %v5777_v4 }
 0x540   : > { %v4000_v11 = vpop.f32.mrf.mxu1 }
 0x541   : > { %v2865_v30 = vmul.f32 %v5783_v8, %v2845_v26  ;;  %v2843_v44 = vmax.f32 %v2781_v23, 0.0  ;;  %v2792_v35 = vadd.f32 %v4000_v11, %v5777_v4 }
 0x542   : > { %v2783_v55 = vpop.f32.mrf.mxu1 }
 0x543   : > { %v2863_v34 = vmul.f32 %v5783_v8, %v2843_v44  ;;  %v2846_v32 = vmax.f32 %v2792_v35, 0.0  ;;  %v2784_v25 = vadd.f32 %v2783_v55, %v5777_v4  ;;  %v2885_v13 = vsel %vm1416_vm4, %v2865_v30, 0.0 }
 0x544   : > { %2886 = vadd.xlane.f32.xlu0 %v2885_v13 }
 0x545   : > { %v2844_v7 = vmax.f32 %v2784_v25, 0.0  ;;  %v2866_v41 = vmul.f32 %v5783_v8, %v2846_v32  ;;  %v2879_v46 = vsel %vm1416_vm4, %v2863_v34, 0.0 }
 0x547   : > { %v2864_v14 = vmul.f32 %v5783_v8, %v2844_v7  ;;  %v2888_v22 = vsel %vm1416_vm4, %v2866_v41, 0.0 }
 0x548   : > { %2880 = vadd.xlane.f32.xlu0 %v2879_v46 }
 0x549   : > { %v2882_v56 = vsel %vm1416_vm4, %v2864_v14, 0.0 }
 0x54a   : > { %2883 = vadd.xlane.f32.xlu1 %v2882_v56 }
 0x54c   : > { %v4003_v39 = vpop.f32.mrf.mxu1  ;;  %2889 = vadd.xlane.f32.xlu0 %v2888_v22 }
 0x54d   : > { %v2805_v57 = vadd.f32 %v4003_v39, %v5777_v4 }
 0x54e   : > { %v2796_v28 = vpop.f32.mrf.mxu1 }
 0x54f   : > { %v2849_v59 = vmax.f32 %v2805_v57, 0.0  ;;  %v2797_v3 = vadd.f32 %v2796_v28, %v5777_v4 }
 0x550   : > { %v4004_v19 = vpop.f32.mrf.mxu1 }
 0x551   : > { %v2869_v42 = vmul.f32 %v5783_v8, %v2849_v59  ;;  %v2847_v54 = vmax.f32 %v2797_v3, 0.0  ;;  %v2808_v51 = vadd.f32 %v4004_v19, %v5777_v4 }
 0x552   : > { %v2799_v24 = vpop.f32.mrf.mxu1 }
 0x553   : > { %v2867_v45 = vmul.f32 %v5783_v8, %v2847_v54  ;;  %v2850_v27 = vmax.f32 %v2808_v51, 0.0  ;;  %v2800_v38 = vadd.f32 %v2799_v24, %v5777_v4  ;;  %v2897_v0 = vsel %vm1416_vm4, %v2869_v42, 0.0 }
 0x554   : > { %2898 = vadd.xlane.f32.xlu1 %v2897_v0 }
 0x555   : > { %v2870_v58 = vmul.f32 %v5783_v8, %v2850_v27  ;;  %v2848_v9 = vmax.f32 %v2800_v38, 0.0  ;;  %v2891_v63 = vsel %vm1416_vm4, %v2867_v45, 0.0 }
 0x557   : > { %v2868_v17 = vmul.f32 %v5783_v8, %v2848_v9  ;;  %v2900_v62 = vsel %vm1416_vm4, %v2870_v58, 0.0 }
 0x558   : > { %2892 = vadd.xlane.f32.xlu1 %v2891_v63  ;;  %2901 = vadd.xlane.f32.xlu0 %v2900_v62 }
 0x559   : > { %v2894_v31 = vsel %vm1416_vm4, %v2868_v17, 0.0 }
 0x55c   : > { %v4007_v29 = vpop.f32.mrf.mxu1  ;;  %2895 = vadd.xlane.f32.xlu0 %v2894_v31 }
 0x55d   : > { %v2821_v47 = vadd.f32 %v4007_v29, %v5777_v4 }
 0x55e   : > { %v2812_v21 = vpop.f32.mrf.mxu1 }
 0x55f   : > { %v2853_v5 = vmax.f32 %v2821_v47, 0.0  ;;  %v2813_v15 = vadd.f32 %v2812_v21, %v5777_v4 }
 0x560   : > { %v4008_v10 = vpop.f32.mrf.mxu1 }
 0x561   : > { %v2873_v18 = vmul.f32 %v5783_v8, %v2853_v5  ;;  %v2851_v50 = vmax.f32 %v2813_v15, 0.0  ;;  %v2824_v43 = vadd.f32 %v4008_v10, %v5777_v4 }
 0x562   : > { %v2815_v33 = vpop.f32.mrf.mxu1 }
 0x563   : > { %v2871_v60 = vmul.f32 %v5783_v8, %v2851_v50  ;;  %v2854_v48 = vmax.f32 %v2824_v43, 0.0  ;;  %v2816_v1 = vadd.f32 %v2815_v33, %v5777_v4  ;;  %v2909_v61 = vsel %vm1416_vm4, %v2873_v18, 0.0 }
 0x564   : > { %2910 = vadd.xlane.f32.xlu1 %v2909_v61 }
 0x565   : > { %v2874_v12 = vmul.f32 %v5783_v8, %v2854_v48  ;;  %v2852_v6 = vmax.f32 %v2816_v1, 0.0  ;;  %v2903_v40 = vsel %vm1416_vm4, %v2871_v60, 0.0  ;;  %v5851_v1 = vld [vmem:[%s4929_s15 + $0x10] sm:$0xff] }
 0x567   : > { %v2872_v2 = vmul.f32 %v5783_v8, %v2852_v6  ;;  %v2912_v52 = vsel %vm1416_vm4, %v2874_v12, 0.0 }
 0x568   : > { %2904 = vadd.xlane.f32.xlu1 %v2903_v40  ;;  %2913 = vadd.xlane.f32.xlu0 %v2912_v52 }
 0x569   : > { %v2906_v37 = vsel %vm1416_vm4, %v2872_v2, 0.0  ;;  %v5855_v2 = vld [vmem:[%s4929_s15] sm:$0xff] }
 0x56c   : > { %v4011_v49 = vpop.f32.mrf.mxu1  ;;  %2907 = vadd.xlane.f32.xlu0 %v2906_v37 }
 0x56d   : > { %v2837_v53 = vadd.f32 %v4011_v49, %v5777_v4  ;;  %v5859_v49 = vld [vmem:[%s4929_s15 + $0x8] sm:$0xff] }
 0x56e   : > { %v2828_v20 = vpop.f32.mrf.mxu1 }
 0x56f   : > { %v2829_v26 = vadd.f32 %v2828_v20, %v5777_v4  ;;  %v2857_v11 = vmax.f32 %v2837_v53, 0.0 }
 0x570   : > { %v4012_v23 = vpop.f32.mrf.mxu1 }
 0x571   : > { %v2855_v30 = vmax.f32 %v2829_v26, 0.0  ;;  %v2840_v44 = vadd.f32 %v4012_v23, %v5777_v4  ;;  %v2877_v32 = vmul.f32 %v5783_v8, %v2857_v11  ;;  %v5863_v23 = vld [vmem:[%s4929_s15 + $0x18] sm:$0xff] }
 0x572   : > { %v2831_v35 = vpop.f32.mrf.mxu1 }
 0x573   : > { %v2875_v55 = vmul.f32 %v5783_v8, %v2855_v30  ;;  %v2832_v34 = vadd.f32 %v2831_v35, %v5777_v4  ;;  %v2858_v25 = vmax.f32 %v2840_v44, 0.0  ;;  %v2921_v46 = vsel %vm1416_vm4, %v2877_v32, 0.0  ;;  %v5867_v35 = vld [vmem:[%s4929_s15 + $0x30] sm:$0xff] }
 0x574   : > { %v2929_v4 = vsub.s32 4, %v5546_v36 }
 0x575   : > { %v2856_v13 = vmax.f32 %v2832_v34, 0.0  ;;  %v2915_v7 = vsel %vm1416_vm4, %v2875_v55, 0.0  ;;  %v2878_v14 = vmul.f32 %v5783_v8, %v2858_v25 }
 0x576   : > { %2916 = vadd.xlane.f32.xlu1 %v2915_v7  ;;  %v2930_v39 = vrot.slane %v6327_v16, %v2929_v4 }
 0x577   : > { %v2876_v41 = vmul.f32 %v5783_v8, %v2856_v13  ;;  %v2924_v22 = vsel %vm1416_vm4, %v2878_v14, 0.0 }
 0x579   : > { %v2918_v56 = vsel %vm1416_vm4, %v2876_v41, 0.0  ;;  %v5871_v41 = vld [vmem:[%s4929_s15 + $0x38] sm:$0xff] }
 0x57a   : > { %2922 = vadd.xlane.f32.xlu1 %v2921_v46  ;;  %2919 = vadd.xlane.f32.xlu0 %v2918_v56  ;;  %v5875_v46 = vld [vmem:[%s4929_s15 + $0x20] sm:$0xff] }
 0x57e   : > { %2925 = vadd.xlane.f32.xlu0 %v2924_v22 }
 0x5cd   : > { %v2887_v57 = vpop.xlane.xlu0 %2886 }
 0x5ce   : > { %v2933_v28 = vadd.f32 %v2930_v39, %v2887_v57 }
 0x5d0   : > { %2967 = vrot.lane.b32.xlu1 %v2933_v28, %s4284_s14 }
 0x5d1   : > { %v2881_v59 = vpop.xlane.xlu0 %2880 }
 0x5d2   : > { %v2931_v8 = vadd.f32 %v2930_v39, %v2881_v59 }
 0x5d3   : > { %v2884_v3 = vpop.xlane.xlu1 %2883 }
 0x5d4   : > { %v2932_v19 = vadd.f32 %v2930_v39, %v2884_v3  ;;  %2963 = vrot.lane.b32.xlu1 %v2931_v8, %s4284_s14  ;;  %v5879_v3 = vld [vmem:[%s4929_s15 + $0x28] sm:$0xff] }
 0x5d5   : > { %v2890_v42 = vpop.xlane.xlu0 %2889 }
 0x5d6   : > { %v2934_v54 = vadd.f32 %v2930_v39, %v2890_v42  ;;  %2965 = vrot.lane.b32.xlu0 %v2932_v19, %s4284_s14 }
 0x5d8   : > { %2969 = vrot.lane.b32.xlu1 %v2934_v54, %s4284_s14 }
 0x5dd   : > { %v2899_v51 = vpop.xlane.xlu1 %2898 }
 0x5de   : > { %v2937_v24 = vadd.f32 %v2930_v39, %v2899_v51 }
 0x5e0   : > { %2975 = vrot.lane.b32.xlu0 %v2937_v24, %s4284_s14 }
 0x5e1   : > { %v2893_v16 = vpop.xlane.xlu1 %2892  ;;  %v2902_v45 = vpop.xlane.xlu0 %2901 }
 0x5e2   : > { %v2935_v27 = vadd.f32 %v2930_v39, %v2893_v16  ;;  %v2938_v38 = vadd.f32 %v2930_v39, %v2902_v45  ;;  %v5883_v16 = vld [vmem:[%s4929_s15 + $0x50] sm:$0xff] }
 0x5e4   : > { %2971 = vrot.lane.b32.xlu0 %v2935_v27, %s4284_s14  ;;  %2977 = vrot.lane.b32.xlu1 %v2938_v38, %s4284_s14 }
 0x5e5   : > { %v2896_v0 = vpop.xlane.xlu0 %2895 }
 0x5e6   : > { %v2936_v58 = vadd.f32 %v2930_v39, %v2896_v0 }
 0x5e8   : > { %2973 = vrot.lane.b32.xlu1 %v2936_v58, %s4284_s14 }
 0x5ed   : > { %v2911_v9 = vpop.xlane.xlu1 %2910 }
 0x5ee   : > { %v2941_v17 = vadd.f32 %v2930_v39, %v2911_v9 }
 0x5f0   : > { %2983 = vrot.lane.b32.xlu0 %v2941_v17, %s4284_s14 }
 0x5f1   : > { %v2905_v63 = vpop.xlane.xlu1 %2904  ;;  %v2914_v62 = vpop.xlane.xlu0 %2913 }
 0x5f2   : > { %v2939_v31 = vadd.f32 %v2930_v39, %v2905_v63  ;;  %v2942_v29 = vadd.f32 %v2930_v39, %v2914_v62  ;;  %v5890_v62 = vld [vmem:[%s4929_s15 + $0x58] sm:$0xff] }
 0x5f4   : > { %2979 = vrot.lane.b32.xlu0 %v2939_v31, %s4284_s14  ;;  %2985 = vrot.lane.b32.xlu1 %v2942_v29, %s4284_s14  ;;  %v5894_v29 = vld [vmem:[%s4929_s15 + $0x40] sm:$0xff] }
 0x5f5   : > { %v2908_v47 = vpop.xlane.xlu0 %2907 }
 0x5f6   : > { %v2940_v21 = vadd.f32 %v2930_v39, %v2908_v47 }
 0x5f8   : > { %2981 = vrot.lane.b32.xlu1 %v2940_v21, %s4284_s14 }
 0x5ff   : > { %v2917_v5 = vpop.xlane.xlu1 %2916 }
 0x600   : > { %v2943_v15 = vadd.f32 %v2930_v39, %v2917_v5 }
 0x602   : > { %2987 = vrot.lane.b32.xlu0 %v2943_v15, %s4284_s14 }
 0x603   : > { %v2923_v10 = vpop.xlane.xlu1 %2922  ;;  %v2920_v18 = vpop.xlane.xlu0 %2919 }
 0x604   : > { %v2945_v50 = vadd.f32 %v2930_v39, %v2923_v10  ;;  %v2944_v43 = vadd.f32 %v2930_v39, %v2920_v18 }
 0x606   : > { %2991 = vrot.lane.b32.xlu0 %v2945_v50, %s4284_s14  ;;  %2989 = vrot.lane.b32.xlu1 %v2944_v43, %s4284_s14 }
 0x607   : > { %v2926_v33 = vpop.xlane.xlu0 %2925 }
 0x608   : > { %v2946_v60 = vadd.f32 %v2930_v39, %v2926_v33 }
 0x60a   : > { %2993 = vrot.lane.b32.xlu1 %v2946_v60, %s4284_s14 }
 0x642   : > { %v2968_v48 = vpop.permute.xlu1 %2967 }
 0x643   : > { %v3013_v61 = vadd.f32 %v5851_v1, %v2968_v48 }
 0x645   : > { %v3849_v12 = vmul.f32 -1.442695, %v3013_v61  ;;  %v5903_v61 = vld [vmem:[%s4929_s15 + $0x48] sm:$0xff] }
 0x646   : > { %v2964_v6 = vpop.permute.xlu1 %2963 }
 0x647   : > { %4125 = vpow2.f32 %v3849_v12  ;;  %v3011_v40 = vadd.f32 %v5855_v2, %v2964_v6 }
 0x648   : > { %v2966_v52 = vpop.permute.xlu0 %2965 }
 0x649   : > { %v3847_v37 = vmul.f32 -1.442695, %v3011_v40  ;;  %v3012_v53 = vadd.f32 %v5859_v49, %v2966_v52 }
 0x64a   : > { %v2970_v20 = vpop.permute.xlu1 %2969 }
 0x64b   : > { %4127 = vpow2.f32 %v3847_v37  ;;  %v3848_v26 = vmul.f32 -1.442695, %v3012_v53  ;;  %v3014_v11 = vadd.f32 %v5863_v23, %v2970_v20 }
 0x64d   : > { %4129 = vpow2.f32 %v3848_v26  ;;  %v3850_v30 = vmul.f32 -1.442695, %v3014_v11 }
 0x64f   : > { %4131 = vpow2.f32 %v3850_v30 }
 0x652   : > { %v2976_v44 = vpop.permute.xlu0 %2975 }
 0x653   : > { %v3017_v55 = vadd.f32 %v5867_v35, %v2976_v44 }
 0x654   : > { %v4126_v34 = vpop.eup %4125 }
 0x655   : > { %v3077_v32 = vadd.f32 1.0, %v4126_v34  ;;  %v3853_v25 = vmul.f32 -1.442695, %v3017_v55 }
 0x656   : > { %v2978_v13 = vpop.permute.xlu1 %2977  ;;  %v2972_v7 = vpop.permute.xlu0 %2971 }
 0x657   : > { %4133 = vrcp.f32 %v3077_v32  ;;  %v3018_v14 = vadd.f32 %v5871_v41, %v2978_v13  ;;  %v3015_v56 = vadd.f32 %v5875_v46, %v2972_v7 }
 0x658   : > { %v4128_v22 = vpop.eup %4127  ;;  %4135 = vpow2.f32 %v3853_v25 }
 0x659   : > { %v3075_v4 = vadd.f32 1.0, %v4128_v22  ;;  %v3854_v39 = vmul.f32 -1.442695, %v3018_v14  ;;  %v3851_v28 = vmul.f32 -1.442695, %v3015_v56  ;;  %v5913_v56 = vld [vmem:[%s4929_s15 + $0x60] sm:$0xff] }
 0x65a   : > { %v4130_v57 = vpop.eup %4129  ;;  %v2974_v59 = vpop.permute.xlu1 %2973 }
 0x65b   : > { %4137 = vrcp.f32 %v3075_v4  ;;  %v3076_v8 = vadd.f32 1.0, %v4130_v57  ;;  %v3016_v19 = vadd.f32 %v5879_v3, %v2974_v59 }
 0x65c   : > { %v4132_v42 = vpop.eup %4131  ;;  %4139 = vpow2.f32 %v3854_v39 }
 0x65d   : > { %4141 = vrcp.f32 %v3076_v8  ;;  %v3078_v54 = vadd.f32 1.0, %v4132_v42  ;;  %v3852_v51 = vmul.f32 -1.442695, %v3016_v19 }
 0x65e   : > { %4143 = vpow2.f32 %v3851_v28 }
 0x65f   : > { %4145 = vrcp.f32 %v3078_v54 }
 0x660   : > { %4147 = vpow2.f32 %v3852_v51 }
 0x662   : > { %v2984_v24 = vpop.permute.xlu0 %2983 }
 0x663   : > { %v3021_v45 = vadd.f32 %v5883_v16, %v2984_v24 }
 0x664   : > { %v5886_v27 = vpop.eup %4133 }
 0x665   : > { %v4136_v38 = vpop.eup %4135  ;;  %v3857_v0 = vmul.f32 -1.442695, %v3021_v45  ;;  %v3125_v58 = vmax.f32 %v5886_v27, 1e-07  ;;  %v5920_v45 = vld [vmem:[%s4929_s15 + $0x68] sm:$0xff] }
 0x666   : > { %v3081_v9 = vadd.f32 1.0, %v4136_v38  ;;  %v2986_v17 = vpop.permute.xlu1 %2985  ;;  %v2980_v63 = vpop.permute.xlu0 %2979 }
 0x667   : > { %4149 = vpow2.f32 %v3857_v0  ;;  %v3022_v31 = vadd.f32 %v5890_v62, %v2986_v17  ;;  %v3019_v47 = vadd.f32 %v5894_v29, %v2980_v63  ;;  %v3141_v21 = vmin.f32 %v3125_v58, 0.9999999  ;;  %v5924_v0 = vld [vmem:[%s4929_s15 + $0x70] sm:$0xff] }
 0x668   : > { %v5897_v5 = vpop.eup %4137  ;;  %4151 = vrcp.f32 %v3081_v9 }
 0x669   : > { %v4140_v15 = vpop.eup %4139  ;;  %v3858_v10 = vmul.f32 -1.442695, %v3022_v31  ;;  %v3855_v18 = vmul.f32 -1.442695, %v3019_v47  ;;  %4153 = vlog2.f32 %v3141_v21  ;;  %v3123_v50 = vmax.f32 %v5897_v5, 1e-07 }
 0x66a   : > { %v5900_v43 = vpop.eup %4141  ;;  %v3082_v33 = vadd.f32 1.0, %v4140_v15  ;;  %v2982_v60 = vpop.permute.xlu1 %2981  ;;  %v3285_v30 = vsub.f32 1.0, %v3141_v21 }
 0x66b   : > { %v4144_v48 = vpop.eup %4143  ;;  %4155 = vpow2.f32 %v3858_v10  ;;  %v3020_v12 = vadd.f32 %v5903_v61, %v2982_v60  ;;  %v3139_v52 = vmin.f32 %v3123_v50, 0.9999999  ;;  %v3124_v26 = vmax.f32 %v5900_v43, 1e-07  ;;  %v5935_v60 = vld [vmem:[%s4929_s15 + $0x78] sm:$0xff]  ;;  %s4286_s15 = smov 124  }
 0x66c   : > { %v5906_v6 = vpop.eup %4145  ;;  %4157 = vrcp.f32 %v3082_v33  ;;  %v3079_v40 = vadd.f32 1.0, %v4144_v48 }
 0x66d   : > { %v4148_v37 = vpop.eup %4147  ;;  %4159 = vpow2.f32 %v3855_v18  ;;  %v3856_v53 = vmul.f32 -1.442695, %v3020_v12  ;;  %v3126_v20 = vmax.f32 %v5906_v6, 1e-07  ;;  %v3140_v55 = vmin.f32 %v3124_v26, 0.9999999 }
 0x66e   : > { %4161 = vrcp.f32 %v3079_v40  ;;  %v3080_v11 = vadd.f32 1.0, %v4148_v37  ;;  %v3283_v34 = vsub.f32 1.0, %v3139_v52 }
 0x66f   : > { %4163 = vpow2.f32 %v3856_v53  ;;  %v3142_v44 = vmin.f32 %v3126_v20, 0.9999999  ;;  %v3284_v54 = vsub.f32 1.0, %v3140_v55 }
 0x670   : > { %4165 = vrcp.f32 %v3080_v11 }
 0x671   : > { %4167 = vlog2.f32 %v3139_v52  ;;  %v3286_v13 = vsub.f32 1.0, %v3142_v44 }
 0x672   : > { %4169 = vlog2.f32 %v3285_v30 }
 0x673   : > { %4171 = vlog2.f32 %v3142_v44 }
 0x674   : > { %v4150_v32 = vpop.eup %4149  ;;  %v2988_v25 = vpop.permute.xlu0 %2987  ;;  %4173 = vlog2.f32 %v3140_v55 }
 0x675   : > { %v5910_v7 = vpop.eup %4151  ;;  %v3085_v14 = vadd.f32 1.0, %v4150_v32  ;;  %v3023_v22 = vadd.f32 %v5913_v56, %v2988_v25  ;;  %4175 = vlog2.f32 %v3283_v34 }
 0x676   : > { %v4154_v4 = vpop.eup %4153  ;;  %v3129_v39 = vmax.f32 %v5910_v7, 1e-07 }
 0x677   : > { %4177 = vrcp.f32 %v3085_v14  ;;  %v3859_v57 = vmul.f32 -1.442695, %v3023_v22  ;;  %v3160_v28 = vmul.f32 0.6931472, %v4154_v4 }
 0x678   : > { %v4156_v59 = vpop.eup %4155  ;;  %v2990_v8 = vpop.permute.xlu1 %2989  ;;  %4179 = vlog2.f32 %v3286_v13  ;;  %v3145_v42 = vmin.f32 %v3129_v39, 0.9999999 }
 0x679   : > { %v2992_v19 = vpop.permute.xlu0 %2991  ;;  %v5917_v51 = vpop.eup %4157  ;;  %v3086_v24 = vadd.f32 1.0, %v4156_v59  ;;  %4181 = vpow2.f32 %v3859_v57  ;;  %v3024_v38 = vadd.f32 %v5920_v45, %v2990_v8  ;;  %3207 = vrot.lane.b32.xlu0 %v3160_v28, %s4285_s29 }
 0x67a   : > { %v3025_v58 = vadd.f32 %v5924_v0, %v2992_v19  ;;  %v4160_v9 = vpop.eup %4159  ;;  %4183 = vlog2.f32 %v3145_v42  ;;  %v3130_v47 = vmax.f32 %v5917_v51, 1e-07  ;;  %v3289_v30 = vsub.f32 1.0, %v3145_v42 }
 0x67b   : > { %v5928_v17 = vpop.eup %4161  ;;  %4185 = vrcp.f32 %v3086_v24  ;;  %v3083_v63 = vadd.f32 1.0, %v4160_v9  ;;  %v3860_v31 = vmul.f32 -1.442695, %v3024_v38 }
 0x67c   : > { %v4164_v21 = vpop.eup %4163  ;;  %v3861_v15 = vmul.f32 -1.442695, %v3025_v58  ;;  %v2994_v10 = vpop.permute.xlu1 %2993  ;;  %4187 = vlog2.f32 %v3284_v54  ;;  %v3127_v18 = vmax.f32 %v5928_v17, 1e-07  ;;  %v3146_v26 = vmin.f32 %v3130_v47, 0.9999999 }
 0x67d   : > { %v5932_v50 = vpop.eup %4165  ;;  %4189 = vrcp.f32 %v3083_v63  ;;  %v3084_v33 = vadd.f32 1.0, %v4164_v21  ;;  %v3026_v48 = vadd.f32 %v5935_v60, %v2994_v10 }
 0x67e   : > { %v4168_v12 = vpop.eup %4167  ;;  %4191 = vpow2.f32 %v3860_v31  ;;  %v3143_v40 = vmin.f32 %v3127_v18, 0.9999999  ;;  %v3128_v52 = vmax.f32 %v5932_v50, 1e-07  ;;  %v3290_v39 = vsub.f32 1.0, %v3146_v26 }
 0x67f   : > { %v4170_v37 = vpop.eup %4169  ;;  %4193 = vrcp.f32 %v3084_v33  ;;  %v3862_v53 = vmul.f32 -1.442695, %v3026_v48  ;;  %v3156_v20 = vmul.f32 0.6931472, %v4168_v12 }
 0x680   : > { %v4172_v11 = vpop.eup %4171  ;;  %4195 = vpow2.f32 %v3861_v15  ;;  %v3144_v55 = vmin.f32 %v3128_v52, 0.9999999  ;;  %v3304_v25 = vmul.f32 0.6931472, %v4170_v37  ;;  %v3287_v14 = vsub.f32 1.0, %v3143_v40 }
 0x681   : > { %4197 = vpow2.f32 %v3862_v53  ;;  %3203 = vrot.lane.b32.xlu0 %v3156_v20, %s4285_s29  ;;  %v3162_v44 = vmul.f32 0.6931472, %v4172_v11  ;;  %v4174_v34 = vpop.eup %4173 }
 0x682   : > { %4199 = vlog2.f32 %v3143_v40  ;;  %v4176_v32 = vpop.eup %4175  ;;  %v3158_v4 = vmul.f32 0.6931472, %v4174_v34  ;;  %v3288_v42 = vsub.f32 1.0, %v3144_v55 }
 0x683   : > { %3209 = vrot.lane.b32.xlu1 %v3162_v44, %s4285_s29  ;;  %4201 = vlog2.f32 %v3146_v26  ;;  %v3300_v8 = vmul.f32 0.6931472, %v4176_v32 }
 0x684   : > { %v5941_v13 = vpop.eup %4177  ;;  %4203 = vlog2.f32 %v3289_v30 }
 0x685   : > { %v4180_v22 = vpop.eup %4179  ;;  %3351 = vrot.lane.b32.xlu0 %v3304_v25, %s4285_s29  ;;  %4205 = vlog2.f32 %v3144_v55  ;;  %v3133_v57 = vmax.f32 %v5941_v13, 1e-07 }
 0x686   : > { %v4182_v28 = vpop.eup %4181  ;;  %4207 = vlog2.f32 %v3287_v14  ;;  %v3306_v58 = vmul.f32 0.6931472, %v4180_v22 }
 0x687   : > { %v4184_v59 = vpop.eup %4183  ;;  %3205 = vrot.lane.b32.xlu1 %v3158_v4, %s4285_s29  ;;  %v3149_v19 = vmin.f32 %v3133_v57, 0.9999999  ;;  %v3087_v24 = vadd.f32 1.0, %v4182_v28  ;;  %4209 = vlog2.f32 %v3290_v39 }
 0x688   : > { %v5946_v54 = vpop.eup %4185  ;;  %v3168_v9 = vmul.f32 0.6931472, %v4184_v59 }
 0x689   : > { %v4188_v38 = vpop.eup %4187  ;;  %3347 = vrot.lane.b32.xlu0 %v3300_v8, %s4285_s29  ;;  %v3134_v63 = vmax.f32 %v5946_v54, 1e-07  ;;  %4211 = vlog2.f32 %v3149_v19  ;;  %v3293_v30 = vsub.f32 1.0, %v3149_v19 }
 0x68a   : > { %v5950_v31 = vpop.eup %4189  ;;  %4213 = vlog2.f32 %v3288_v42  ;;  %v3302_v48 = vmul.f32 0.6931472, %v4188_v38 }
 0x68b   : > { %v4192_v47 = vpop.eup %4191  ;;  %3353 = vrot.lane.b32.xlu1 %v3306_v58, %s4285_s29  ;;  %v3131_v21 = vmax.f32 %v5950_v31, 1e-07  ;;  %v3150_v15 = vmin.f32 %v3134_v63, 0.9999999  ;;  %4215 = vrcp.f32 %v3087_v24 }
 0x68c   : > { %v5954_v10 = vpop.eup %4193  ;;  %v3088_v18 = vadd.f32 1.0, %v4192_v47 }
 0x68d   : > { %v4196_v33 = vpop.eup %4195  ;;  %3215 = vrot.lane.b32.xlu0 %v3168_v9, %s4285_s29  ;;  %v3147_v12 = vmin.f32 %v3131_v21, 0.9999999  ;;  %4217 = vlog2.f32 %v3150_v15  ;;  %v3132_v40 = vmax.f32 %v5954_v10, 1e-07  ;;  %v3294_v39 = vsub.f32 1.0, %v3150_v15 }
 0x68e   : > { %v4198_v52 = vpop.eup %4197  ;;  %4219 = vrcp.f32 %v3088_v18  ;;  %v3089_v37 = vadd.f32 1.0, %v4196_v33 }
 0x68f   : > { %v4200_v53 = vpop.eup %4199  ;;  %v3090_v20 = vadd.f32 1.0, %v4198_v52  ;;  %3349 = vrot.lane.b32.xlu1 %v3302_v48, %s4285_s29  ;;  %4221 = vlog2.f32 %v3147_v12  ;;  %v3148_v34 = vmin.f32 %v3132_v40, 0.9999999  ;;  %v3291_v14 = vsub.f32 1.0, %v3147_v12 }
 0x690   : > { %v4202_v26 = vpop.eup %4201  ;;  %4223 = vrcp.f32 %v3089_v37  ;;  %v3164_v11 = vmul.f32 0.6931472, %v4200_v53 }
 0x691   : > { %v4204_v44 = vpop.eup %4203  ;;  %4225 = vrcp.f32 %v3090_v20  ;;  %v3170_v55 = vmul.f32 0.6931472, %v4202_v26  ;;  %v3292_v24 = vsub.f32 1.0, %v3148_v34 }
 0x692   : > { %v4206_v32 = vpop.eup %4205  ;;  %3211 = vrot.lane.b32.xlu0 %v3164_v11, %s4285_s29  ;;  %v3312_v25 = vmul.f32 0.6931472, %v4204_v44  ;;  %4227 = vlog2.f32 %v3293_v30 }
 0x693   : > { %3217 = vrot.lane.b32.xlu1 %v3170_v55, %s4285_s29  ;;  %v4208_v22 = vpop.eup %4207  ;;  %v3166_v4 = vmul.f32 0.6931472, %v4206_v32  ;;  %4229 = vlog2.f32 %v3148_v34 }
 0x694   : > { %v4210_v57 = vpop.eup %4209  ;;  %v3308_v8 = vmul.f32 0.6931472, %v4208_v22  ;;  %4231 = vlog2.f32 %v3291_v14 }
 0x695   : > { %v3314_v42 = vmul.f32 0.6931472, %v4210_v57  ;;  %4233 = vlog2.f32 %v3294_v39 }
 0x696   : > { %3359 = vrot.lane.b32.xlu0 %v3312_v25, %s4285_s29  ;;  %v4212_v28 = vpop.eup %4211  ;;  %4235 = vlog2.f32 %v3292_v24 }
 0x697   : > { %3213 = vrot.lane.b32.xlu1 %v3166_v4, %s4285_s29  ;;  %v4214_v59 = vpop.eup %4213  ;;  %v3176_v58 = vmul.f32 0.6931472, %v4212_v28 }
 0x698   : > { %v5963_v19 = vpop.eup %4215  ;;  %v3310_v15 = vmul.f32 0.6931472, %v4214_v59 }
 0x699   : > { %v3135_v47 = vmax.f32 %v5963_v19, 1e-07 }
 0x69a   : > { %v4218_v38 = vpop.eup %4217  ;;  %3355 = vrot.lane.b32.xlu0 %v3308_v8, %s4285_s29 }
 0x69b   : > { %v5966_v9 = vpop.eup %4219  ;;  %3361 = vrot.lane.b32.xlu1 %v3314_v42, %s4285_s29  ;;  %v3151_v37 = vmin.f32 %v3135_v47, 0.9999999  ;;  %v3178_v20 = vmul.f32 0.6931472, %v4218_v38 }
 0x69c   : > { %v4222_v63 = vpop.eup %4221  ;;  %v3136_v18 = vmax.f32 %v5966_v9, 1e-07 }
 0x69d   : > { %v5970_v21 = vpop.eup %4223  ;;  %v3172_v48 = vmul.f32 0.6931472, %v4222_v63  ;;  %v3295_v55 = vsub.f32 1.0, %v3151_v37 }
 0x69e   : > { %v5973_v33 = vpop.eup %4225  ;;  %3223 = vrot.lane.b32.xlu0 %v3176_v58, %s4285_s29  ;;  %v3137_v12 = vmax.f32 %v5970_v21, 1e-07  ;;  %v3152_v11 = vmin.f32 %v3136_v18, 0.9999999 }
 0x69f   : > { %3357 = vrot.lane.b32.xlu1 %v3310_v15, %s4285_s29  ;;  %v3138_v40 = vmax.f32 %v5973_v33, 1e-07  ;;  %v4228_v53 = vpop.eup %4227 }
 0x6a0   : > { %v3153_v52 = vmin.f32 %v3137_v12, 0.9999999  ;;  %v4230_v30 = vpop.eup %4229  ;;  %v3320_v44 = vmul.f32 0.6931472, %v4228_v53  ;;  %v3296_v25 = vsub.f32 1.0, %v3152_v11 }
 0x6a1   : > { %v3154_v26 = vmin.f32 %v3138_v40, 0.9999999  ;;  %v4232_v34 = vpop.eup %4231  ;;  %v3174_v32 = vmul.f32 0.6931472, %v4230_v30 }
 0x6a2   : > { %3219 = vrot.lane.b32.xlu0 %v3172_v48, %s4285_s29  ;;  %4237 = vlog2.f32 %v3153_v52  ;;  %v4234_v14 = vpop.eup %4233  ;;  %v3316_v22 = vmul.f32 0.6931472, %v4232_v34  ;;  %v3297_v4 = vsub.f32 1.0, %v3153_v52 }
 0x6a3   : > { %3225 = vrot.lane.b32.xlu1 %v3178_v20, %s4285_s29  ;;  %4239 = vlog2.f32 %v3154_v26  ;;  %v3322_v39 = vmul.f32 0.6931472, %v4234_v14  ;;  %v3298_v57 = vsub.f32 1.0, %v3154_v26  ;;  %v4236_v28 = vpop.eup %4235 }
 0x6a4   : > { %4241 = vlog2.f32 %v3151_v37  ;;  %v3318_v59 = vmul.f32 0.6931472, %v4236_v28 }
 0x6a5   : > { %4243 = vlog2.f32 %v3152_v11 }
 0x6a6   : > { %3367 = vrot.lane.b32.xlu0 %v3320_v44, %s4285_s29  ;;  %4245 = vlog2.f32 %v3295_v55 }
 0x6a7   : > { %3221 = vrot.lane.b32.xlu1 %v3174_v32, %s4285_s29  ;;  %4247 = vlog2.f32 %v3296_v25  ;;  %v3446_v32 = vadd.s32 8, %v5546_v36 }
 0x6a8   : > { %4249 = vlog2.f32 %v3297_v4 }
 0x6a9   : > { %4251 = vlog2.f32 %v3298_v57 }
 0x6aa   : > { %3363 = vrot.lane.b32.xlu0 %v3316_v22, %s4285_s29 }
 0x6ab   : > { %3369 = vrot.lane.b32.xlu1 %v3322_v39, %s4285_s29 }
 0x6af   : > { %v4238_v8 = vpop.eup %4237  ;;  %3365 = vrot.lane.b32.xlu1 %v3318_v59, %s4285_s29 }
 0x6b0   : > { %v4240_v42 = vpop.eup %4239  ;;  %v3184_v24 = vmul.f32 0.6931472, %v4238_v8 }
 0x6b1   : > { %v4242_v38 = vpop.eup %4241  ;;  %v3186_v58 = vmul.f32 0.6931472, %v4240_v42 }
 0x6b2   : > { %v4244_v63 = vpop.eup %4243  ;;  %3231 = vrot.lane.b32.xlu0 %v3184_v24, %s4285_s29  ;;  %v3180_v47 = vmul.f32 0.6931472, %v4242_v38 }
 0x6b3   : > { %3233 = vrot.lane.b32.xlu1 %v3186_v58, %s4285_s29  ;;  %v4246_v15 = vpop.eup %4245  ;;  %v3182_v18 = vmul.f32 0.6931472, %v4244_v63 }
 0x6b4   : > { %v4248_v48 = vpop.eup %4247  ;;  %v3324_v12 = vmul.f32 0.6931472, %v4246_v15 }
 0x6b5   : > { %v4250_v40 = vpop.eup %4249  ;;  %v3326_v52 = vmul.f32 0.6931472, %v4248_v48 }
 0x6b6   : > { %3227 = vrot.lane.b32.xlu0 %v3180_v47, %s4285_s29  ;;  %v4252_v37 = vpop.eup %4251  ;;  %v3328_v53 = vmul.f32 0.6931472, %v4250_v40  ;;  %v3451_v47 = vadd.s32 48, %v5546_v36 }
 0x6b7   : > { %3229 = vrot.lane.b32.xlu1 %v3182_v18, %s4285_s29  ;;  %v3330_v20 = vmul.f32 0.6931472, %v4252_v37  ;;  %v3273_v18 = vsub.f32 1.0, %v5867_v35  ;;  %v3452_v37 = vadd.s32 56, %v5546_v36 }
 0x6ba   : > { %3371 = vrot.lane.b32.xlu0 %v3324_v12, %s4285_s29 }
 0x6bb   : > { %3373 = vrot.lane.b32.xlu1 %v3326_v52, %s4285_s29  ;;  %v3449_v52 = vadd.s32 32, %v5546_v36 }
 0x6be   : > { %3375 = vrot.lane.b32.xlu0 %v3328_v53, %s4285_s29 }
 0x6bf   : > { %3377 = vrot.lane.b32.xlu1 %v3330_v20, %s4285_s29 }
 0x6c2   : > { %3526 = vrot.lane.b32.xlu0 %v5897_v5, %s4286_s15 }
 0x6c3   : > { %3528 = vrot.lane.b32.xlu1 %v5900_v43, %s4286_s15  ;;  %v3447_v43 = vadd.s32 16, %v5546_v36 }
 0x6c6   : > { %3530 = vrot.lane.b32.xlu0 %v5886_v27, %s4286_s15 }
 0x6c7   : > { %3532 = vrot.lane.b32.xlu1 %v5906_v6, %s4286_s15  ;;  %v3269_v6 = vsub.f32 1.0, %v5851_v1 }
 0x6ca   : > { %3534 = vrot.lane.b32.xlu0 %v5928_v17, %s4286_s15 }
 0x6cb   : > { %3536 = vrot.lane.b32.xlu1 %v5932_v50, %s4286_s15 }
 0x6ce   : > { %3538 = vrot.lane.b32.xlu0 %v5910_v7, %s4286_s15  ;;  %v6030_v7 = vstv %s3863_s30 }
 0x6cf   : > { %3540 = vrot.lane.b32.xlu1 %v5917_v51, %s4286_s15  ;;  %v3464_v50 = vadd.s32 %v6030_v7, %v3447_v43  ;;  %v3462_v26 = vadd.s32 %v6030_v7, %v5546_v36  ;;  %v3463_v59 = vadd.s32 %v6030_v7, %v3446_v32  ;;  %v3274_v43 = vsub.f32 1.0, %v5871_v41 }
 0x6d1   : > { %vm3480_vm5 = vcmp.lt.s32.totalorder %v3464_v50, 256  ;;  %vm3478_vm6 = vcmp.lt.s32.totalorder %v3462_v26, 256  ;;  %vm3479_vm8 = vcmp.lt.s32.totalorder %v3463_v59, 256  ;;  %v3469_v50 = vadd.s32 %v6030_v7, %v3452_v37 }
 0x6d2   : > { %3542 = vrot.lane.b32.xlu0 %v5950_v31, %s4286_s15  ;;  %v3267_v31 = vsub.f32 1.0, %v5855_v2 }
 0x6d3   : > { %3544 = vrot.lane.b32.xlu1 %v5954_v10, %s4286_s15  ;;  %vm3485_vm11 = vcmp.lt.s32.totalorder %v3469_v50, 256 }
 0x6d6   : > { %3546 = vrot.lane.b32.xlu0 %v5941_v13, %s4286_s15 }
 0x6d7   : > { %3548 = vrot.lane.b32.xlu1 %v5946_v54, %s4286_s15 }
 0x6da   : > { %3550 = vrot.lane.b32.xlu0 %v5963_v19, %s4286_s15  ;;  %v3448_v19 = vadd.s32 24, %v5546_v36 }
 0x6db   : > { %3552 = vrot.lane.b32.xlu1 %v5966_v9, %s4286_s15 }
 0x6dc   : > { %v3465_v34 = vadd.s32 %v6030_v7, %v3448_v19 }
 0x6de   : > { %3554 = vrot.lane.b32.xlu0 %v5970_v21, %s4286_s15  ;;  %v3270_v21 = vsub.f32 1.0, %v5863_v23  ;;  %vm3481_vm7 = vcmp.lt.s32.totalorder %v3465_v34, 256 }
 0x6df   : > { %3556 = vrot.lane.b32.xlu1 %v5973_v33, %s4286_s15 }
 0x6eb   : > { %v3208_v27 = vpop.permute.xlu0 %3207 }
 0x6ec   : > { %v3253_v13 = vmul.f32 %v5851_v1, %v3208_v27  ;;  %v3268_v1 = vsub.f32 1.0, %v5859_v49 }
 0x6f3   : > { %v3204_v5 = vpop.permute.xlu0 %3203 }
 0x6f4   : > { %v3251_v11 = vmul.f32 %v5855_v2, %v3204_v5  ;;  %v3271_v5 = vsub.f32 1.0, %v5875_v46 }
 0x6f5   : > { %v3210_v51 = vpop.permute.xlu1 %3209 }
 0x6f6   : > { %v3254_v25 = vmul.f32 %v5863_v23, %v3210_v51 }
 0x6f7   : > { %v3352_v17 = vpop.permute.xlu0 %3351 }
 0x6f8   : > { %v3397_v54 = vmul.f32 %v3352_v17, %v3269_v6  ;;  %v3466_v17 = vadd.s32 %v6030_v7, %v3449_v52  ;;  %v3454_v52 = vadd.s32 72, %v5546_v36 }
 0x6f9   : > { %v3206_v10 = vpop.permute.xlu1 %3205 }
 0x6fa   : > { %v3413_v9 = vadd.f32 %v3397_v54, %v3253_v13  ;;  %v3252_v8 = vmul.f32 %v5859_v49, %v3206_v10  ;;  %v3468_v49 = vadd.s32 %v6030_v7, %v3451_v47  ;;  %v3450_v10 = vadd.s32 40, %v5546_v36 }
 0x6fb   : > { %v3348_v33 = vpop.permute.xlu0 %3347  ;;  %vm3482_vm10 = vcmp.lt.s32.totalorder %v3466_v17, 256 }
 0x6fc   : > { %v3429_v30 = vsub.f32 0.0, %v3413_v9  ;;  %v3395_v44 = vmul.f32 %v3348_v33, %v3267_v31  ;;  %vm3484_vm9 = vcmp.lt.s32.totalorder %v3468_v49, 256 }
 0x6fd   : > { %v3354_v55 = vpop.permute.xlu1 %3353 }
 0x6fe   : > { %v3411_v14 = vadd.f32 %v3395_v44, %v3251_v11  ;;  %v3398_v22 = vmul.f32 %v3354_v55, %v3270_v21  ;;  %v3496_v4 = vsel %vm3480_vm5, %v3429_v30, 0.0  ;;  %v3272_v21 = vsub.f32 1.0, %v5879_v3 }
 0x6ff   : > { %3594 = vrot.lane.b32.xlu0 %v3496_v4, %s4286_s15  ;;  %v3216_v39 = vpop.permute.xlu0 %3215  ;;  %v3455_v4 = vadd.s32 80, %v5546_v36  ;;  %vm3638_vm5 = vcmask 7168  }
 0x700   : > { %v3427_v57 = vsub.f32 0.0, %v3411_v14  ;;  %v3414_v2 = vadd.f32 %v3398_v22, %v3254_v25  ;;  %v3257_v53 = vmul.f32 %v5867_v35, %v3216_v39 }
 0x701   : > { %v3350_v28 = vpop.permute.xlu1 %3349 }
 0x702   : > { %v3430_v42 = vsub.f32 0.0, %v3414_v2  ;;  %v3396_v24 = vmul.f32 %v3350_v28, %v3268_v1  ;;  %v3494_v38 = vsel %vm3478_vm6, %v3427_v57, 0.0  ;;  %v3277_v57 = vsub.f32 1.0, %v5883_v16 }
 0x703   : > { %3590 = vrot.lane.b32.xlu0 %v3494_v38, %s4286_s15  ;;  %vm3655_vm6 = vcmask 15360  }
 0x704   : > { %v3412_v23 = vadd.f32 %v3396_v24, %v3252_v8  ;;  %v3212_v58 = vpop.permute.xlu0 %3211  ;;  %v3497_v63 = vsel %vm3481_vm7, %v3430_v42, 0.0  ;;  %v3453_v8 = vadd.s32 64, %v5546_v36  ;;  %v3456_v42 = vadd.s32 88, %v5546_v36 }
 0x705   : > { %3596 = vrot.lane.b32.xlu1 %v3497_v63, %s4286_s15  ;;  %v3218_v15 = vpop.permute.xlu1 %3217  ;;  %v3255_v13 = vmul.f32 %v5875_v46, %v3212_v58  ;;  %v3467_v46 = vadd.s32 %v6030_v7, %v3450_v10  ;;  %v3275_v58 = vsub.f32 1.0, %v5894_v29  ;;  %v3278_v63 = vsub.f32 1.0, %v5890_v62 }
 0x706   : > { %v3428_v48 = vsub.f32 0.0, %v3412_v23  ;;  %v3258_v19 = vmul.f32 %v5871_v41, %v3218_v15 }
 0x707   : > { %vm3483_vm12 = vcmp.lt.s32.totalorder %v3467_v46, 256 }
 0x708   : > { %v3360_v12 = vpop.permute.xlu0 %3359  ;;  %v3495_v40 = vsel %vm3479_vm8, %v3428_v48, 0.0  ;;  %v3473_v48 = vadd.s32 %v6030_v7, %v3456_v42 }
 0x709   : > { %v3401_v20 = vmul.f32 %v3360_v12, %v3273_v18  ;;  %3592 = vrot.lane.b32.xlu1 %v3495_v40, %s4286_s15  ;;  %v3214_v27 = vpop.permute.xlu1 %3213  ;;  %v3470_v18 = vadd.s32 %v6030_v7, %v3453_v8 }
 0x70a   : > { %v3256_v1 = vmul.f32 %v5879_v3, %v3214_v27  ;;  %v3472_v3 = vadd.s32 %v6030_v7, %v3455_v4  ;;  %vm3489_vm15 = vcmp.lt.s32.totalorder %v3473_v48, 256 }
 0x70b   : > { %v3417_v6 = vadd.f32 %v3401_v20, %v3257_v53  ;;  %v3276_v20 = vsub.f32 1.0, %v5903_v61  ;;  %vm3486_vm14 = vcmp.lt.s32.totalorder %v3470_v18, 256 }
 0x70c   : > { %v3356_v51 = vpop.permute.xlu0 %3355  ;;  %vm3488_vm13 = vcmp.lt.s32.totalorder %v3472_v3, 256 }
 0x70d   : > { %v3433_v54 = vsub.f32 0.0, %v3417_v6  ;;  %v3399_v31 = vmul.f32 %v3356_v51, %v3271_v5  ;;  %v3362_v35 = vpop.permute.xlu1 %3361 }
 0x70e   : > { %v3402_v9 = vmul.f32 %v3362_v35, %v3274_v43 }
 0x70f   : > { %v3415_v33 = vadd.f32 %v3399_v31, %v3255_v13  ;;  %v3500_v26 = vsel %vm3484_vm9, %v3433_v54, 0.0 }
 0x710   : > { %v3418_v11 = vadd.f32 %v3402_v9, %v3258_v19  ;;  %3602 = vrot.lane.b32.xlu0 %v3500_v26, %s4286_s15  ;;  %v3224_v30 = vpop.permute.xlu0 %3223  ;;  %v3458_v26 = vadd.s32 104, %v5546_v36 }
 0x711   : > { %v3431_v44 = vsub.f32 0.0, %v3415_v33  ;;  %v3358_v55 = vpop.permute.xlu1 %3357  ;;  %v3261_v24 = vmul.f32 %v5883_v16, %v3224_v30  ;;  %v3457_v33 = vadd.s32 96, %v5546_v36  ;;  %v3280_v30 = vsub.f32 1.0, %v5920_v45 }
 0x712   : > { %v3434_v34 = vsub.f32 0.0, %v3418_v11  ;;  %v3400_v32 = vmul.f32 %v3358_v55, %v3272_v21  ;;  %v3279_v11 = vsub.f32 1.0, %v5913_v56  ;;  %v3475_v46 = vadd.s32 %v6030_v7, %v3458_v26 }
 0x713   : > { %v3498_v41 = vsel %vm3482_vm10, %v3431_v44, 0.0  ;;  %v3474_v55 = vadd.s32 %v6030_v7, %v3457_v33 }
 0x714   : > { %v3416_v25 = vadd.f32 %v3400_v32, %v3256_v1  ;;  %3598 = vrot.lane.b32.xlu0 %v3498_v41, %s4286_s15  ;;  %v3220_v14 = vpop.permute.xlu0 %3219  ;;  %v3501_v22 = vsel %vm3485_vm11, %v3434_v34, 0.0  ;;  %v3459_v1 = vadd.s32 112, %v5546_v36  ;;  %vm3491_vm2 = vcmp.lt.s32.totalorder %v3475_v46, 256 }
 0x715   : > { %3604 = vrot.lane.b32.xlu1 %v3501_v22, %s4286_s15  ;;  %v3226_v39 = vpop.permute.xlu1 %3225  ;;  %v3259_v12 = vmul.f32 %v5894_v29, %v3220_v14  ;;  %v3471_v29 = vadd.s32 %v6030_v7, %v3454_v52  ;;  %v3460_v14 = vadd.s32 120, %v5546_v36  ;;  %vm3490_vm1 = vcmp.lt.s32.totalorder %v3474_v55, 256 }
 0x716   : > { %v3432_v2 = vsub.f32 0.0, %v3416_v25  ;;  %v3262_v37 = vmul.f32 %v5890_v62, %v3226_v39  ;;  %v3281_v25 = vsub.f32 1.0, %v5924_v0  ;;  %v3282_v39 = vsub.f32 1.0, %v5935_v60 }
 0x717   : > { %vm3487_vm0 = vcmp.lt.s32.totalorder %v3471_v29, 256 }
 0x718   : > { %v3368_v28 = vpop.permute.xlu0 %3367  ;;  %v3499_v59 = vsel %vm3483_vm12, %v3432_v2, 0.0 }
 0x719   : > { %v3405_v38 = vmul.f32 %v3368_v28, %v3277_v57  ;;  %3600 = vrot.lane.b32.xlu1 %v3499_v59, %s4286_s15  ;;  %v3222_v23 = vpop.permute.xlu1 %3221  ;;  %v3476_v59 = vadd.s32 %v6030_v7, %v3459_v1 }
 0x71a   : > { %v3260_v17 = vmul.f32 %v5903_v61, %v3222_v23 }
 0x71b   : > { %v3421_v47 = vadd.f32 %v3405_v38, %v3261_v24  ;;  %v3477_v24 = vadd.s32 %v6030_v7, %v3460_v14  ;;  %vm3492_vm3 = vcmp.lt.s32.totalorder %v3476_v59, 256 }
 0x71c   : > { %v3364_v15 = vpop.permute.xlu0 %3363 }
 0x71d   : > { %v3437_v40 = vsub.f32 0.0, %v3421_v47  ;;  %v3403_v49 = vmul.f32 %v3364_v15, %v3275_v58  ;;  %v3370_v16 = vpop.permute.xlu1 %3369  ;;  %vm3493_vm4 = vcmp.lt.s32.totalorder %v3477_v24, 256 }
 0x71e   : > { %v3406_v53 = vmul.f32 %v3370_v16, %v3278_v63 }
 0x71f   : > { %v3419_v27 = vadd.f32 %v3403_v49, %v3259_v12  ;;  %v3504_v5 = vsel %vm3488_vm13, %v3437_v40, 0.0 }
 0x720   : > { %v3422_v43 = vadd.f32 %v3406_v53, %v3262_v37  ;;  %3610 = vrot.lane.b32.xlu0 %v3504_v5, %s4286_s15 }
 0x721   : > { %v3435_v6 = vsub.f32 0.0, %v3419_v27  ;;  %v3366_v51 = vpop.permute.xlu1 %3365 }
 0x722   : > { %v3438_v50 = vsub.f32 0.0, %v3422_v43  ;;  %v3404_v13 = vmul.f32 %v3366_v51, %v3276_v20 }
 0x723   : > { %v3502_v54 = vsel %vm3486_vm14, %v3435_v6, 0.0 }
 0x724   : > { %v3420_v62 = vadd.f32 %v3404_v13, %v3260_v17  ;;  %3606 = vrot.lane.b32.xlu0 %v3502_v54, %s4286_s15  ;;  %v3232_v31 = vpop.permute.xlu0 %3231  ;;  %v3505_v35 = vsel %vm3489_vm15, %v3438_v50, 0.0 }
 0x725   : > { %3612 = vrot.lane.b32.xlu1 %v3505_v35, %s4286_s15  ;;  %v3234_v10 = vpop.permute.xlu1 %3233 }
 0x726   : > { %v3436_v19 = vsub.f32 0.0, %v3420_v62  ;;  %v3266_v36 = vmul.f32 %v5935_v60, %v3234_v10 }
 0x728   : > { %v3228_v9 = vpop.permute.xlu0 %3227  ;;  %v3503_v21 = vsel %vm3487_vm0, %v3436_v19, 0.0 }
 0x729   : > { %3608 = vrot.lane.b32.xlu1 %v3503_v21, %s4286_s15  ;;  %v3230_v61 = vpop.permute.xlu1 %3229  ;;  %v3263_v34 = vmul.f32 %v5913_v56, %v3228_v9  ;;  %v3265_v56 = vmul.f32 %v5924_v0, %v3232_v31 }
 0x72a   : > { %v3264_v22 = vmul.f32 %v5920_v45, %v3230_v61 }
 0x72c   : > { %v3372_v44 = vpop.permute.xlu0 %3371 }
 0x72d   : > { %v3407_v32 = vmul.f32 %v3372_v44, %v3279_v11  ;;  %v3374_v41 = vpop.permute.xlu1 %3373 }
 0x72e   : > { %v3408_v4 = vmul.f32 %v3374_v41, %v3280_v30 }
 0x72f   : > { %v3423_v57 = vadd.f32 %v3407_v32, %v3263_v34 }
 0x730   : > { %v3424_v2 = vadd.f32 %v3408_v4, %v3264_v22  ;;  %v3376_v28 = vpop.permute.xlu0 %3375 }
 0x731   : > { %v3439_v3 = vsub.f32 0.0, %v3423_v57  ;;  %v3409_v8 = vmul.f32 %v3376_v28, %v3281_v25  ;;  %v3378_v42 = vpop.permute.xlu1 %3377 }
 0x732   : > { %v3440_v45 = vsub.f32 0.0, %v3424_v2  ;;  %v3410_v38 = vmul.f32 %v3378_v42, %v3282_v39 }
 0x733   : > { %v3425_v23 = vadd.f32 %v3409_v8, %v3265_v56  ;;  %v3506_v58 = vsel %vm3490_vm1, %v3439_v3, 0.0 }
 0x734   : > { %v3426_v63 = vadd.f32 %v3410_v38, %v3266_v36  ;;  %3614 = vrot.lane.b32.xlu0 %v3506_v58, %s4286_s15  ;;  %v3507_v47 = vsel %vm3491_vm2, %v3440_v45, 0.0  ;;  %v3527_v60 = vpop.permute.xlu0 %3526 }
 0x735   : > { %v3441_v15 = vsub.f32 0.0, %v3425_v23  ;;  %3616 = vrot.lane.b32.xlu1 %v3507_v47, %s4286_s15  ;;  %v3529_v48 = vpop.permute.xlu1 %3528 }
 0x736   : > { %v3442_v0 = vsub.f32 0.0, %v3426_v63 }
 0x737   : > { %v3508_v18 = vsel %vm3492_vm3, %v3441_v15, 0.0 }
 0x738   : > { %3618 = vrot.lane.b32.xlu0 %v3508_v18, %s4286_s15  ;;  %v3509_v7 = vsel %vm3493_vm4, %v3442_v0, 0.0  ;;  %v3531_v12 = vpop.permute.xlu0 %3530 }
 0x739   : > { %3620 = vrot.lane.b32.xlu1 %v3509_v7, %s4286_s15  ;;  %v3533_v40 = vpop.permute.xlu1 %3532 }
 0x73c   : > { %v3535_v49 = vpop.permute.xlu0 %3534 }
 0x73d   : > { %v3537_v16 = vpop.permute.xlu1 %3536 }
 0x740   : > { %v3539_v52 = vpop.permute.xlu0 %3538 }
 0x741   : > { %v3541_v37 = vpop.permute.xlu1 %3540 }
 0x744   : > { %v3543_v53 = vpop.permute.xlu0 %3542 }
 0x745   : > { %v3545_v20 = vpop.permute.xlu1 %3544 }
 0x748   : > { %v3547_v27 = vpop.permute.xlu0 %3546 }
 0x749   : > { %v3549_v5 = vpop.permute.xlu1 %3548 }
 0x74c   : > { %v3551_v43 = vpop.permute.xlu0 %3550 }
 0x74d   : > { %v3553_v6 = vpop.permute.xlu1 %3552 }
 0x750   : > { %v3555_v51 = vpop.permute.xlu0 %3554 }
 0x751   : > { %v3557_v50 = vpop.permute.xlu1 %3556 }
 0x771   : > { %v3595_v29 = vpop.permute.xlu0 %3594 }
 0x772   : > { %v3641_v17 = vsel %vm3638_vm5, %v3531_v12, %v3595_v29 }
 0x773   : > { %3658 = vst.msk [vmem:[%s6114_s19 + $0x10] sm:$0xff] %vm3655_vm6, %v3641_v17 }
 0x775   : > { %v3591_v13 = vpop.permute.xlu0 %3590 }
 0x776   : > { %v3639_v54 = vsel %vm3638_vm5, %v3527_v60, %v3591_v13 }
 0x777   : > { %3656 = vst.msk [vmem:[%s6114_s19] sm:$0xff] %vm3655_vm6, %v3639_v54  ;;  %v3597_v62 = vpop.permute.xlu1 %3596 }
 0x778   : > { %v3642_v31 = vsel %vm3638_vm5, %v3533_v40, %v3597_v62 }
 0x779   : > { %3659 = vst.msk [vmem:[%s6114_s19 + $0x18] sm:$0xff] %vm3655_vm6, %v3642_v31 }
 0x77b   : > { %v3593_v35 = vpop.permute.xlu1 %3592 }
 0x77c   : > { %v3640_v10 = vsel %vm3638_vm5, %v3529_v48, %v3593_v35 }
 0x77d   : > { %3657 = vst.msk [vmem:[%s6114_s19 + $0x8] sm:$0xff] %vm3655_vm6, %v3640_v10 }
 0x782   : > { %v3603_v19 = vpop.permute.xlu0 %3602 }
 0x783   : > { %v3645_v9 = vsel %vm3638_vm5, %v3539_v52, %v3603_v19 }
 0x784   : > { %3662 = vst.msk [vmem:[%s6114_s19 + $0x30] sm:$0xff] %vm3655_vm6, %v3645_v9 }
 0x786   : > { %v3599_v21 = vpop.permute.xlu0 %3598 }
 0x787   : > { %v3643_v33 = vsel %vm3638_vm5, %v3535_v49, %v3599_v21  ;;  %v3605_v26 = vpop.permute.xlu1 %3604 }
 0x788   : > { %3660 = vst.msk [vmem:[%s6114_s19 + $0x20] sm:$0xff] %vm3655_vm6, %v3643_v33  ;;  %v3646_v61 = vsel %vm3638_vm5, %v3541_v37, %v3605_v26 }
 0x789   : > { %3663 = vst.msk [vmem:[%s6114_s19 + $0x38] sm:$0xff] %vm3655_vm6, %v3646_v61 }
 0x78b   : > { %v3601_v11 = vpop.permute.xlu1 %3600 }
 0x78c   : > { %v3644_v30 = vsel %vm3638_vm5, %v3537_v16, %v3601_v11 }
 0x78d   : > { %3661 = vst.msk [vmem:[%s6114_s19 + $0x28] sm:$0xff] %vm3655_vm6, %v3644_v30 }
 0x792   : > { %v3611_v44 = vpop.permute.xlu0 %3610 }
 0x793   : > { %v3649_v55 = vsel %vm3638_vm5, %v3547_v27, %v3611_v44 }
 0x794   : > { %3666 = vst.msk [vmem:[%s6114_s19 + $0x50] sm:$0xff] %vm3655_vm6, %v3649_v55 }
 0x796   : > { %v3607_v46 = vpop.permute.xlu0 %3606 }
 0x797   : > { %v3647_v1 = vsel %vm3638_vm5, %v3543_v53, %v3607_v46  ;;  %v3613_v34 = vpop.permute.xlu1 %3612 }
 0x798   : > { %3664 = vst.msk [vmem:[%s6114_s19 + $0x40] sm:$0xff] %vm3655_vm6, %v3647_v1  ;;  %v3650_v32 = vsel %vm3638_vm5, %v3549_v5, %v3613_v34 }
 0x799   : > { %3667 = vst.msk [vmem:[%s6114_s19 + $0x58] sm:$0xff] %vm3655_vm6, %v3650_v32 }
 0x79b   : > { %v3609_v41 = vpop.permute.xlu1 %3608 }
 0x79c   : > { %v3648_v25 = vsel %vm3638_vm5, %v3545_v20, %v3609_v41 }
 0x79d   : > { %3665 = vst.msk [vmem:[%s6114_s19 + $0x48] sm:$0xff] %vm3655_vm6, %v3648_v25 }
 0x7a6   : > { %v3615_v14 = vpop.permute.xlu0 %3614 }
 0x7a7   : > { %v3651_v22 = vsel %vm3638_vm5, %v3551_v43, %v3615_v14  ;;  %v3617_v4 = vpop.permute.xlu1 %3616 }
 0x7a8   : > { %3668 = vst.msk [vmem:[%s6114_s19 + $0x60] sm:$0xff] %vm3655_vm6, %v3651_v22  ;;  %v3652_v39 = vsel %vm3638_vm5, %v3553_v6, %v3617_v4 }
 0x7a9   : > { %3669 = vst.msk [vmem:[%s6114_s19 + $0x68] sm:$0xff] %vm3655_vm6, %v3652_v39 }
 0x7aa   : > { %v3619_v57 = vpop.permute.xlu0 %3618 }
 0x7ab   : > { %v3653_v2 = vsel %vm3638_vm5, %v3555_v51, %v3619_v57  ;;  %v3621_v28 = vpop.permute.xlu1 %3620 }
 0x7ac   : > { %3670 = vst.msk [vmem:[%s6114_s19 + $0x70] sm:$0xff] %vm3655_vm6, %v3653_v2  ;;  %v3654_v59 = vsel %vm3638_vm5, %v3557_v50, %v3621_v28 }
 0x7ad   : > { %3671 = vst.msk [vmem:[%s6114_s19 + $0x78] sm:$0xff] %vm3655_vm6, %v3654_v59 }
 0x7ae PF: > { %s21_s17 = sadd.s32 1, %s4275_s17  }
 0x7af   : > { %p18_p4 = scmp.ge.s32.totalorder %s21_s17, 4  }
 0x7b1   :  { %20 = sbr.rel (!%p18_p4) target bundleno = 1 (0x1), region = 97 }

</bundles_post_ra>
